<compile_context>
chip_gen: v7x
topology: tpu7x:2x2x1
jax: 0.10.0
libtpu: 0.0.40
codegen_flags: <defaults>
</compile_context>

<pallas_src>
import functools

import jax
import jax.numpy as jnp
import numpy as np
from jax.experimental import pallas as pl
from jax.experimental.pallas import tpu as pltpu

F32 = jnp.float32
_LANES = 128
_SUBLANES = 8


def _sig(x):
    # sigmoid(x) == 0.5 * tanh(0.5 * x) + 0.5  (keeps the transcendental on the EUP).
    return 0.5 * jnp.tanh(0.5 * x) + 0.5


# --------------------------------------------------------------------------------------
# Parameter layout: flat {name: (rows, cols) f32 array} dict, gate order [r, z, n].
# --------------------------------------------------------------------------------------
def _param_list(cfg):
    """Ordered (name, rows, cols, init_scale) list for every parameter."""
    nx, ny, H = cfg["nx"], cfg["ny"], cfg["nh_rnn"]
    mdims = list(cfg["nh_mlp"])
    nl = cfg["num_layers"]
    s_h = 1.0 / np.sqrt(H)
    out = []

    def gru(prefix, din, bi_dir):
        dirs = ("fwd", "bwd") if bi_dir else ("fwd",)
        for l in range(nl):
            in_dim = din if l == 0 else (2 * H if bi_dir else H)
            for d in dirs:
                p = f"{prefix}.{l}.{d}"
                out.extend([(p + ".wi", in_dim, 3 * H, s_h),
                            (p + ".wh", H, 3 * H, s_h),
                            (p + ".bi", 1, 3 * H, s_h),
                            (p + ".bh", 1, 3 * H, s_h)])

    gru("x_rnn", nx, cfg["x_birnn"])
    gru("e_rnn", ny, cfg["e_birnn"])

    # e_mlp first layer acts on concat([h_x, h_y]) -> stored split over the two halves.
    s1 = 1.0 / np.sqrt(2 * H)
    out.extend([("e_mlp.w1x", H, mdims[0], s1),
                ("e_mlp.w1y", H, mdims[0], s1),
                ("e_mlp.b1", 1, mdims[0], s1)])
    for i in range(1, len(mdims)):
        s = 1.0 / np.sqrt(mdims[i - 1])
        out.extend([(f"e_mlp.{i}.w", mdims[i - 1], mdims[i], s),
                    (f"e_mlp.{i}.b", 1, mdims[i], s)])
    s = 1.0 / np.sqrt(mdims[-1])
    out.extend([("e_out.w", mdims[-1], H, s), ("e_out.b", 1, H, s)])

    # d_rnn input is cat([h_x, z, y_p]) -> weight stored as split blocks, fused gates.
    out.extend([("d_rnn.wi_hx", H, 3 * H, s_h),
                ("d_rnn.wi_z", H, 3 * H, s_h),
                ("d_rnn.wi_y", ny, 3 * H, s_h),
                ("d_rnn.wh", H, 3 * H, s_h),
                ("d_rnn.bi", 1, 3 * H, s_h),
                ("d_rnn.bh", 1, 3 * H, s_h)])

    dims = [H] + mdims
    for i in range(1, len(dims)):
        s = 1.0 / np.sqrt(dims[i - 1])
        out.extend([(f"d_mlp.{i}.w", dims[i - 1], dims[i], s),
                    (f"d_mlp.{i}.b", 1, dims[i], s)])
    s = 1.0 / np.sqrt(mdims[-1])
    out.extend([("d_out.w", mdims[-1], ny, s), ("d_out.b", 1, ny, s)])
    return out


def init_params(key, cfg):
    params = {}
    for name, r, c, s in _param_list(cfg):
        key, k = jax.random.split(key)
        params[name] = jax.random.uniform(k, (r, c), F32, -s, s)
    return params


def pack_params(params, cfg):
    """Pack all params into ONE (rows, 128) f32 buffer; each param 8-row aligned.

    Done once on the host (not per call) -> one prologue DMA instead of ~35.
    """
    spec = {}
    blocks = []
    off = 0
    for name, r, c, _ in _param_list(cfg):
        a = np.asarray(params[name], np.float32)
        assert a.shape == (r, c), (name, a.shape, (r, c))
        rp = ((r + _SUBLANES - 1) // _SUBLANES) * _SUBLANES
        blk = np.zeros((rp, _LANES), np.float32)
        blk[:r, :c] = a
        blocks.append(blk)
        spec[name] = (off, r, c)
        off += rp
    return jnp.asarray(np.concatenate(blocks, axis=0)), spec


# --------------------------------------------------------------------------------------
# Fused kernel
# --------------------------------------------------------------------------------------
def _make_kernel(cfg, spec, B, Tx, Ty):
    H = cfg["nh_rnn"]
    H3 = 3 * H
    nl = cfg["num_layers"]
    x_bi, e_bi = cfg["x_birnn"], cfg["e_birnn"]
    mdims = list(cfg["nh_mlp"])
    horizon = cfg["horizon"]
    ny = cfg["ny"]

    def kernel(x_ref, y_ref, p_ref, out_ref):
        def P(name):
            off, r, c = spec[name]
            return p_ref[off:off + r, 0:c]          # static slice of the packed buffer

        def gru_dir(seq_flat, T, prefix, reverse):
            """One GRU direction; returns list of (B, H) hidden states in processing order."""
            wi = P(prefix + ".wi")                               # (D, 3H)
            wh = P(prefix + ".wh")                               # (H, 3H)
            bi = P(prefix + ".bi")                               # (1, 3H)
            bh = jnp.broadcast_to(P(prefix + ".bh"), (B, H3))    # hoisted broadcast
            # Batched input projection for all timesteps (off the recurrent chain).
            gi_all = jnp.dot(seq_flat, wi, preferred_element_type=F32) + bi   # (T*B, 3H)
            h = None
            outs = []
            order = range(T - 1, -1, -1) if reverse else range(T)
            for step, t in enumerate(order):
                gi = gi_all[t * B:(t + 1) * B, :]
                if step == 0:
                    gh = bh                                       # h == 0: skip dot(0, Wh)
                else:
                    gh = jnp.dot(h, wh, preferred_element_type=F32) + bh
                r = _sig(gi[:, 0:H] + gh[:, 0:H])
                z = _sig(gi[:, H:2 * H] + gh[:, H:2 * H])
                n = jnp.tanh(gi[:, 2 * H:H3] + r * gh[:, 2 * H:H3])
                h = (1.0 - z) * n if step == 0 else (1.0 - z) * n + z * h
                outs.append(h)
            return outs

        def encode(seq_flat, T, prefix, bi_dir):
            """RNN.forward: summed final states (bidirectional) or last output (uni)."""
            sflat = seq_flat
            for l in range(nl):
                last = l == nl - 1
                out_f = gru_dir(sflat, T, f"{prefix}.{l}.fwd", reverse=False)
                if bi_dir:
                    out_b = gru_dir(sflat, T, f"{prefix}.{l}.bwd", reverse=True)
                    if last:
                        return out_f[-1] + out_b[-1]
                    out_b_t = out_b[::-1]
                    sflat = jnp.concatenate(
                        [jnp.concatenate([f, b], axis=-1) for f, b in zip(out_f, out_b_t)],
                        axis=0)
                else:
                    if last:
                        return out_f[-1]
                    sflat = jnp.concatenate(out_f, axis=0)

        x_flat = x_ref[...]                  # (Tx*B, nx)  time-major rows
        y_flat = y_ref[...]                  # (Ty*B, ny)

        h_x = encode(x_flat, Tx, "x_rnn", x_bi)     # (B, H)
        h_y = encode(y_flat, Ty, "e_rnn", e_bi)     # (B, H)

        # ---- e_mlp + e_out (split first-layer matmul instead of concat([h_x, h_y])) --
        h = jax.nn.relu(jnp.dot(h_x, P("e_mlp.w1x"), preferred_element_type=F32)
                        + jnp.dot(h_y, P("e_mlp.w1y"), preferred_element_type=F32)
                        + P("e_mlp.b1"))
        for i in range(1, len(mdims)):
            h = jax.nn.relu(jnp.dot(h, P(f"e_mlp.{i}.w"), preferred_element_type=F32)
                            + P(f"e_mlp.{i}.b"))
        z_lat = jnp.dot(h, P("e_out.w"), preferred_element_type=F32) + P("e_out.b")

        # ---- decoder -----------------------------------------------------------------
        wi_y = P("d_rnn.wi_y")
        wh_d = P("d_rnn.wh")
        bh_d = jnp.broadcast_to(P("d_rnn.bh"), (B, H3))
        # Time-invariant projection of [h_x, z] hoisted out of the horizon loop.
        gi_const = (jnp.dot(h_x, P("d_rnn.wi_hx"), preferred_element_type=F32)
                    + jnp.dot(z_lat, P("d_rnn.wi_z"), preferred_element_type=F32)
                    + P("d_rnn.bi"))                                  # (B, 3H)

        dims = [H] + mdims
        d_mlp_w = [P(f"d_mlp.{i}.w") for i in range(1, len(dims))]
        d_mlp_b = [jnp.broadcast_to(P(f"d_mlp.{i}.b"), (B, dims[i]))
                   for i in range(1, len(dims))]
        d_out_w = P("d_out.w")
        d_out_b = jnp.broadcast_to(P("d_out.b"), (B, ny))

        # TODO(synk): use_drnn_mlp=True (decoder h_0 produced by drnn_mlp) not implemented;
        #             spec default is False and the test config does not exercise it.
        h_d = None                                                    # h_0 == 0
        y_prev = x_flat[(Tx - 1) * B:Tx * B, :]                       # x[:, -1, :]
        for i in range(horizon):
            gi = gi_const + jnp.dot(y_prev, wi_y, preferred_element_type=F32)
            if i == 0:
                gh = bh_d                                             # h_0 == 0: skip matmul
            else:
                gh = jnp.dot(h_d, wh_d, preferred_element_type=F32) + bh_d
            r = _sig(gi[:, 0:H] + gh[:, 0:H])
            zg = _sig(gi[:, H:2 * H] + gh[:, H:2 * H])
            n = jnp.tanh(gi[:, 2 * H:H3] + r * gh[:, 2 * H:H3])
            h_d = (1.0 - zg) * n if i == 0 else (1.0 - zg) * n + zg * h_d
            t = h_d
            for w, b in zip(d_mlp_w, d_mlp_b):
                t = jax.nn.relu(jnp.dot(t, w, preferred_element_type=F32) + b)
            y_prev = jnp.dot(t, d_out_w, preferred_element_type=F32) + d_out_b
            out_ref[i] = y_prev                  # VMEM store; single HBM flush at end

    return kernel


def gru_autoencoder_forward(packed, x, y, *, spec, cfg):
    """forward(x, y): z = encode(x, y); return decode(x, z) — output (B, horizon, ny)."""
    B, Tx, nx = x.shape
    _, Ty, ny = y.shape
    horizon = cfg["horizon"]

    x_flat = jnp.transpose(x, (1, 0, 2)).reshape(Tx * B, nx).astype(F32)
    y_flat = jnp.transpose(y, (1, 0, 2)).reshape(Ty * B, ny).astype(F32)

    kernel = _make_kernel(cfg, spec, B, Tx, Ty)
    vmem = pl.BlockSpec(memory_space=pltpu.MemorySpace.VMEM)
    out = pl.pallas_call(
        kernel,
        out_shape=jax.ShapeDtypeStruct((horizon, B, ny), F32),
        in_specs=[vmem, vmem, vmem],
        out_specs=vmem,
    )(x_flat, y_flat, packed)
    return jnp.transpose(out, (1, 0, 2))          # (B, horizon, ny)


# --------------------------------------------------------------------------------------
# Pure-JAX reference (HIGHEST precision) for correctness check
# --------------------------------------------------------------------------------------
def _dotp(a, b):
    return jnp.dot(a, b, precision=jax.lax.Precision.HIGHEST)


def _gru_dir_ref(x_tbd, params, prefix, H, reverse):
    T, B, _ = x_tbd.shape
    wi, wh = params[prefix + ".wi"], params[prefix + ".wh"]
    bi, bh = params[prefix + ".bi"], params[prefix + ".bh"]
    h = jnp.zeros((B, H), F32)
    outs = []
    order = range(T - 1, -1, -1) if reverse else range(T)
    for t in order:
        gi = _dotp(x_tbd[t], wi) + bi
        gh = _dotp(h, wh) + bh
        r = jax.nn.sigmoid(gi[:, :H] + gh[:, :H])
        z = jax.nn.sigmoid(gi[:, H:2 * H] + gh[:, H:2 * H])
        n = jnp.tanh(gi[:, 2 * H:] + r * gh[:, 2 * H:])
        h = (1.0 - z) * n + z * h
        outs.append(h)
    return outs


def _encode_ref(x_btd, params, prefix, bi_dir, H, nl):
    seq = jnp.transpose(x_btd, (1, 0, 2))
    for l in range(nl):
        last = l == nl - 1
        out_f = _gru_dir_ref(seq, params, f"{prefix}.{l}.fwd", H, False)
        if bi_dir:
            out_b = _gru_dir_ref(seq, params, f"{prefix}.{l}.bwd", H, True)
            if last:
                return out_f[-1] + out_b[-1]
            seq = jnp.stack([jnp.concatenate([f, b], -1)
                             for f, b in zip(out_f, out_b[::-1])], axis=0)
        else:
            if last:
                return out_f[-1]
            seq = jnp.stack(out_f, axis=0)


def forward_ref(params, x, y, cfg):
    H = cfg["nh_rnn"]
    nl = cfg["num_layers"]
    mdims = list(cfg["nh_mlp"])
    h_x = _encode_ref(x, params, "x_rnn", cfg["x_birnn"], H, nl)
    h_y = _encode_ref(y, params, "e_rnn", cfg["e_birnn"], H, nl)

    h = jax.nn.relu(_dotp(h_x, params["e_mlp.w1x"]) + _dotp(h_y, params["e_mlp.w1y"])
                    + params["e_mlp.b1"])
    for i in range(1, len(mdims)):
        h = jax.nn.relu(_dotp(h, params[f"e_mlp.{i}.w"]) + params[f"e_mlp.{i}.b"])
    z = _dotp(h, params["e_out.w"]) + params["e_out.b"]

    B = x.shape[0]
    dims = [H] + mdims
    h_d = jnp.zeros((B, H), F32)
    y_prev = x[:, -1, :]
    ys = []
    for _ in range(cfg["horizon"]):
        gi = (_dotp(h_x, params["d_rnn.wi_hx"]) + _dotp(z, params["d_rnn.wi_z"])
              + _dotp(y_prev, params["d_rnn.wi_y"]) + params["d_rnn.bi"])
        gh = _dotp(h_d, params["d_rnn.wh"]) + params["d_rnn.bh"]
        r = jax.nn.sigmoid(gi[:, :H] + gh[:, :H])
        zg = jax.nn.sigmoid(gi[:, H:2 * H] + gh[:, H:2 * H])
        n = jnp.tanh(gi[:, 2 * H:] + r * gh[:, 2 * H:])
        h_d = (1.0 - zg) * n + zg * h_d
        t = h_d
        for i in range(1, len(dims)):
            t = jax.nn.relu(_dotp(t, params[f"d_mlp.{i}.w"]) + params[f"d_mlp.{i}.b"])
        y_prev = _dotp(t, params["d_out.w"]) + params["d_out.b"]
        ys.append(y_prev)
    return jnp.stack(ys, axis=1)


# --------------------------------------------------------------------------------------
if __name__ == "__main__":
    cfg = dict(nx=4, ny=4, horizon=6, nh_rnn=32, nh_mlp=[64, 48],
               x_birnn=True, e_birnn=True, use_drnn_mlp=False, num_layers=1)
    B, Tx, Ty = 2, 8, 6

    key = jax.random.PRNGKey(0)
    kp, kx, ky = jax.random.split(key, 3)
    params = init_params(kp, cfg)
    x = jax.random.normal(kx, (B, Tx, cfg["nx"]), F32)
    y = jax.random.normal(ky, (B, Ty, cfg["ny"]), F32)

    packed, spec = pack_params(params, cfg)      # pack ONCE, not per call

    fwd = jax.jit(functools.partial(gru_autoencoder_forward, spec=spec, cfg=cfg))
    out = jax.block_until_ready(fwd(packed, x, y))
    assert out.shape == (B, cfg["horizon"], cfg["ny"]), out.shape

    ref = forward_ref(params, x, y, cfg)
    err = float(np.max(np.abs(np.asarray(out) - np.asarray(ref))))
    assert np.allclose(np.asarray(out), np.asarray(ref), atol=2e-3, rtol=2e-3), err

    print("KERNEL_OK")
</pallas_src>

<mosaic_0001>
module attributes {stable_mosaic.version = 11 : i64} {
  func.func @kernel(%arg0: memref<16x4xf32, #tpu.memory_space<vmem>>, %arg1: memref<12x4xf32, #tpu.memory_space<vmem>>, %arg2: memref<712x128xf32, #tpu.memory_space<vmem>>, %arg3: memref<6x2x4xf32, #tpu.memory_space<vmem>>) attributes {dimension_semantics = [], scalar_prefetch = 0 : i64, scratch_operands = 0 : i64, tpu.core_type = #tpu.core_type<tc>} {
    %c0 = arith.constant 0 : index
    %c0_0 = arith.constant 0 : index
    %0 = vector.load %arg0[%c0, %c0_0] : memref<16x4xf32, #tpu.memory_space<vmem>>, vector<16x4xf32>
    %c0_1 = arith.constant 0 : index
    %c0_2 = arith.constant 0 : index
    %1 = vector.load %arg1[%c0_1, %c0_2] : memref<12x4xf32, #tpu.memory_space<vmem>>, vector<12x4xf32>
    %c0_3 = arith.constant 0 : index
    %c0_4 = arith.constant 0 : index
    %2 = vector.load %arg2[%c0_3, %c0_4] : memref<712x128xf32, #tpu.memory_space<vmem>>, vector<4x96xf32>
    %c8 = arith.constant 8 : index
    %c0_5 = arith.constant 0 : index
    %3 = vector.load %arg2[%c8, %c0_5] : memref<712x128xf32, #tpu.memory_space<vmem>>, vector<32x96xf32>
    %c40 = arith.constant 40 : index
    %c0_6 = arith.constant 0 : index
    %4 = vector.load %arg2[%c40, %c0_6] : memref<712x128xf32, #tpu.memory_space<vmem>>, vector<1x96xf32>
    %c48 = arith.constant 48 : index
    %c0_7 = arith.constant 0 : index
    %5 = vector.load %arg2[%c48, %c0_7] : memref<712x128xf32, #tpu.memory_space<vmem>>, vector<1x96xf32>
    %6 = vector.shape_cast %5 : vector<1x96xf32> to vector<1x96xf32>
    %7 = vector.broadcast %6 : vector<1x96xf32> to vector<2x96xf32>
    %cst = arith.constant dense<0.000000e+00> : vector<16x96xf32>
    %8 = tpu.matmul %0, %2, %cst {dimension_numbers = #tpu.dot_dimension_numbers<[1], [0], [0], [1], [0, 0, 1, 1], [], []>} : vector<16x4xf32>, vector<4x96xf32>, vector<16x96xf32> -> vector<16x96xf32>
    %9 = vector.broadcast %4 : vector<1x96xf32> to vector<16x96xf32>
    %10 = arith.addf %8, %9 : vector<16x96xf32>
    %11 = vector.extract_strided_slice %10 {offsets = [0, 0], sizes = [2, 96], strides = [1, 1]} : vector<16x96xf32> to vector<2x96xf32>
    %12 = vector.extract_strided_slice %11 {offsets = [0, 0], sizes = [2, 32], strides = [1, 1]} : vector<2x96xf32> to vector<2x32xf32>
    %13 = vector.extract_strided_slice %7 {offsets = [0, 0], sizes = [2, 32], strides = [1, 1]} : vector<2x96xf32> to vector<2x32xf32>
    %14 = arith.addf %12, %13 : vector<2x32xf32>
    %cst_8 = arith.constant 5.000000e-01 : f32
    %15 = vector.broadcast %cst_8 : f32 to vector<2x32xf32>
    %16 = arith.mulf %15, %14 : vector<2x32xf32>
    %17 = math.tanh %16 : vector<2x32xf32>
    %cst_9 = arith.constant 5.000000e-01 : f32
    %18 = vector.broadcast %cst_9 : f32 to vector<2x32xf32>
    %19 = arith.mulf %18, %17 : vector<2x32xf32>
    %cst_10 = arith.constant 5.000000e-01 : f32
    %20 = vector.broadcast %cst_10 : f32 to vector<2x32xf32>
    %21 = arith.addf %19, %20 : vector<2x32xf32>
    %22 = vector.extract_strided_slice %11 {offsets = [0, 32], sizes = [2, 32], strides = [1, 1]} : vector<2x96xf32> to vector<2x32xf32>
    %23 = vector.extract_strided_slice %7 {offsets = [0, 32], sizes = [2, 32], strides = [1, 1]} : vector<2x96xf32> to vector<2x32xf32>
    %24 = arith.addf %22, %23 : vector<2x32xf32>
    %cst_11 = arith.constant 5.000000e-01 : f32
    %25 = vector.broadcast %cst_11 : f32 to vector<2x32xf32>
    %26 = arith.mulf %25, %24 : vector<2x32xf32>
    %27 = math.tanh %26 : vector<2x32xf32>
    %cst_12 = arith.constant 5.000000e-01 : f32
    %28 = vector.broadcast %cst_12 : f32 to vector<2x32xf32>
    %29 = arith.mulf %28, %27 : vector<2x32xf32>
    %cst_13 = arith.constant 5.000000e-01 : f32
    %30 = vector.broadcast %cst_13 : f32 to vector<2x32xf32>
    %31 = arith.addf %29, %30 : vector<2x32xf32>
    %32 = vector.extract_strided_slice %11 {offsets = [0, 64], sizes = [2, 32], strides = [1, 1]} : vector<2x96xf32> to vector<2x32xf32>
    %33 = vector.extract_strided_slice %7 {offsets = [0, 64], sizes = [2, 32], strides = [1, 1]} : vector<2x96xf32> to vector<2x32xf32>
    %34 = arith.mulf %21, %33 : vector<2x32xf32>
    %35 = arith.addf %32, %34 : vector<2x32xf32>
    %36 = math.tanh %35 : vector<2x32xf32>
    %cst_14 = arith.constant 1.000000e+00 : f32
    %37 = vector.broadcast %cst_14 : f32 to vector<2x32xf32>
    %38 = arith.subf %37, %31 : vector<2x32xf32>
    %39 = arith.mulf %38, %36 : vector<2x32xf32>
    %40 = vector.extract_strided_slice %10 {offsets = [2, 0], sizes = [2, 96], strides = [1, 1]} : vector<16x96xf32> to vector<2x96xf32>
    %cst_15 = arith.constant dense<0.000000e+00> : vector<2x96xf32>
    %41 = tpu.matmul %39, %3, %cst_15 {dimension_numbers = #tpu.dot_dimension_numbers<[1], [0], [0], [1], [0, 0, 1, 1], [], []>} : vector<2x32xf32>, vector<32x96xf32>, vector<2x96xf32> -> vector<2x96xf32>
    %42 = arith.addf %41, %7 : vector<2x96xf32>
    %43 = vector.extract_strided_slice %40 {offsets = [0, 0], sizes = [2, 32], strides = [1, 1]} : vector<2x96xf32> to vector<2x32xf32>
    %44 = vector.extract_strided_slice %42 {offsets = [0, 0], sizes = [2, 32], strides = [1, 1]} : vector<2x96xf32> to vector<2x32xf32>
    %45 = arith.addf %43, %44 : vector<2x32xf32>
    %cst_16 = arith.constant 5.000000e-01 : f32
    %46 = vector.broadcast %cst_16 : f32 to vector<2x32xf32>
    %47 = arith.mulf %46, %45 : vector<2x32xf32>
    %48 = math.tanh %47 : vector<2x32xf32>
    %cst_17 = arith.constant 5.000000e-01 : f32
    %49 = vector.broadcast %cst_17 : f32 to vector<2x32xf32>
    %50 = arith.mulf %49, %48 : vector<2x32xf32>
    %cst_18 = arith.constant 5.000000e-01 : f32
    %51 = vector.broadcast %cst_18 : f32 to vector<2x32xf32>
    %52 = arith.addf %50, %51 : vector<2x32xf32>
    %53 = vector.extract_strided_slice %40 {offsets = [0, 32], sizes = [2, 32], strides = [1, 1]} : vector<2x96xf32> to vector<2x32xf32>
    %54 = vector.extract_strided_slice %42 {offsets = [0, 32], sizes = [2, 32], strides = [1, 1]} : vector<2x96xf32> to vector<2x32xf32>
    %55 = arith.addf %53, %54 : vector<2x32xf32>
    %cst_19 = arith.constant 5.000000e-01 : f32
    %56 = vector.broadcast %cst_19 : f32 to vector<2x32xf32>
    %57 = arith.mulf %56, %55 : vector<2x32xf32>
    %58 = math.tanh %57 : vector<2x32xf32>
    %cst_20 = arith.constant 5.000000e-01 : f32
    %59 = vector.broadcast %cst_20 : f32 to vector<2x32xf32>
    %60 = arith.mulf %59, %58 : vector<2x32xf32>
    %cst_21 = arith.constant 5.000000e-01 : f32
    %61 = vector.broadcast %cst_21 : f32 to vector<2x32xf32>
    %62 = arith.addf %60, %61 : vector<2x32xf32>
    %63 = vector.extract_strided_slice %40 {offsets = [0, 64], sizes = [2, 32], strides = [1, 1]} : vector<2x96xf32> to vector<2x32xf32>
    %64 = vector.extract_strided_slice %42 {offsets = [0, 64], sizes = [2, 32], strides = [1, 1]} : vector<2x96xf32> to vector<2x32xf32>
    %65 = arith.mulf %52, %64 : vector<2x32xf32>
    %66 = arith.addf %63, %65 : vector<2x32xf32>
    %67 = math.tanh %66 : vector<2x32xf32>
    %cst_22 = arith.constant 1.000000e+00 : f32
    %68 = vector.broadcast %cst_22 : f32 to vector<2x32xf32>
    %69 = arith.subf %68, %62 : vector<2x32xf32>
    %70 = arith.mulf %69, %67 : vector<2x32xf32>
    %71 = arith.mulf %62, %39 : vector<2x32xf32>
    %72 = arith.addf %70, %71 : vector<2x32xf32>
    %73 = vector.extract_strided_slice %10 {offsets = [4, 0], sizes = [2, 96], strides = [1, 1]} : vector<16x96xf32> to vector<2x96xf32>
    %cst_23 = arith.constant dense<0.000000e+00> : vector<2x96xf32>
    %74 = tpu.matmul %72, %3, %cst_23 {dimension_numbers = #tpu.dot_dimension_numbers<[1], [0], [0], [1], [0, 0, 1, 1], [], []>} : vector<2x32xf32>, vector<32x96xf32>, vector<2x96xf32> -> vector<2x96xf32>
    %75 = arith.addf %74, %7 : vector<2x96xf32>
    %76 = vector.extract_strided_slice %73 {offsets = [0, 0], sizes = [2, 32], strides = [1, 1]} : vector<2x96xf32> to vector<2x32xf32>
    %77 = vector.extract_strided_slice %75 {offsets = [0, 0], sizes = [2, 32], strides = [1, 1]} : vector<2x96xf32> to vector<2x32xf32>
    %78 = arith.addf %76, %77 : vector<2x32xf32>
    %cst_24 = arith.constant 5.000000e-01 : f32
    %79 = vector.broadcast %cst_24 : f32 to vector<2x32xf32>
    %80 = arith.mulf %79, %78 : vector<2x32xf32>
    %81 = math.tanh %80 : vector<2x32xf32>
    %cst_25 = arith.constant 5.000000e-01 : f32
    %82 = vector.broadcast %cst_25 : f32 to vector<2x32xf32>
    %83 = arith.mulf %82, %81 : vector<2x32xf32>
    %cst_26 = arith.constant 5.000000e-01 : f32
    %84 = vector.broadcast %cst_26 : f32 to vector<2x32xf32>
    %85 = arith.addf %83, %84 : vector<2x32xf32>
    %86 = vector.extract_strided_slice %73 {offsets = [0, 32], sizes = [2, 32], strides = [1, 1]} : vector<2x96xf32> to vector<2x32xf32>
    %87 = vector.extract_strided_slice %75 {offsets = [0, 32], sizes = [2, 32], strides = [1, 1]} : vector<2x96xf32> to vector<2x32xf32>
    %88 = arith.addf %86, %87 : vector<2x32xf32>
    %cst_27 = arith.constant 5.000000e-01 : f32
    %89 = vector.broadcast %cst_27 : f32 to vector<2x32xf32>
    %90 = arith.mulf %89, %88 : vector<2x32xf32>
    %91 = math.tanh %90 : vector<2x32xf32>
    %cst_28 = arith.constant 5.000000e-01 : f32
    %92 = vector.broadcast %cst_28 : f32 to vector<2x32xf32>
    %93 = arith.mulf %92, %91 : vector<2x32xf32>
    %cst_29 = arith.constant 5.000000e-01 : f32
    %94 = vector.broadcast %cst_29 : f32 to vector<2x32xf32>
    %95 = arith.addf %93, %94 : vector<2x32xf32>
    %96 = vector.extract_strided_slice %73 {offsets = [0, 64], sizes = [2, 32], strides = [1, 1]} : vector<2x96xf32> to vector<2x32xf32>
    %97 = vector.extract_strided_slice %75 {offsets = [0, 64], sizes = [2, 32], strides = [1, 1]} : vector<2x96xf32> to vector<2x32xf32>
    %98 = arith.mulf %85, %97 : vector<2x32xf32>
    %99 = arith.addf %96, %98 : vector<2x32xf32>
    %100 = math.tanh %99 : vector<2x32xf32>
    %cst_30 = arith.constant 1.000000e+00 : f32
    %101 = vector.broadcast %cst_30 : f32 to vector<2x32xf32>
    %102 = arith.subf %101, %95 : vector<2x32xf32>
    %103 = arith.mulf %102, %100 : vector<2x32xf32>
    %104 = arith.mulf %95, %72 : vector<2x32xf32>
    %105 = arith.addf %103, %104 : vector<2x32xf32>
    %106 = vector.extract_strided_slice %10 {offsets = [6, 0], sizes = [2, 96], strides = [1, 1]} : vector<16x96xf32> to vector<2x96xf32>
    %cst_31 = arith.constant dense<0.000000e+00> : vector<2x96xf32>
    %107 = tpu.matmul %105, %3, %cst_31 {dimension_numbers = #tpu.dot_dimension_numbers<[1], [0], [0], [1], [0, 0, 1, 1], [], []>} : vector<2x32xf32>, vector<32x96xf32>, vector<2x96xf32> -> vector<2x96xf32>
    %108 = arith.addf %107, %7 : vector<2x96xf32>
    %109 = vector.extract_strided_slice %106 {offsets = [0, 0], sizes = [2, 32], strides = [1, 1]} : vector<2x96xf32> to vector<2x32xf32>
    %110 = vector.extract_strided_slice %108 {offsets = [0, 0], sizes = [2, 32], strides = [1, 1]} : vector<2x96xf32> to vector<2x32xf32>
    %111 = arith.addf %109, %110 : vector<2x32xf32>
    %cst_32 = arith.constant 5.000000e-01 : f32
    %112 = vector.broadcast %cst_32 : f32 to vector<2x32xf32>
    %113 = arith.mulf %112, %111 : vector<2x32xf32>
    %114 = math.tanh %113 : vector<2x32xf32>
    %cst_33 = arith.constant 5.000000e-01 : f32
    %115 = vector.broadcast %cst_33 : f32 to vector<2x32xf32>
    %116 = arith.mulf %115, %114 : vector<2x32xf32>
    %cst_34 = arith.constant 5.000000e-01 : f32
    %117 = vector.broadcast %cst_34 : f32 to vector<2x32xf32>
    %118 = arith.addf %116, %117 : vector<2x32xf32>
    %119 = vector.extract_strided_slice %106 {offsets = [0, 32], sizes = [2, 32], strides = [1, 1]} : vector<2x96xf32> to vector<2x32xf32>
    %120 = vector.extract_strided_slice %108 {offsets = [0, 32], sizes = [2, 32], strides = [1, 1]} : vector<2x96xf32> to vector<2x32xf32>
    %121 = arith.addf %119, %120 : vector<2x32xf32>
    %cst_35 = arith.constant 5.000000e-01 : f32
    %122 = vector.broadcast %cst_35 : f32 to vector<2x32xf32>
    %123 = arith.mulf %122, %121 : vector<2x32xf32>
    %124 = math.tanh %123 : vector<2x32xf32>
    %cst_36 = arith.constant 5.000000e-01 : f32
    %125 = vector.broadcast %cst_36 : f32 to vector<2x32xf32>
    %126 = arith.mulf %125, %124 : vector<2x32xf32>
    %cst_37 = arith.constant 5.000000e-01 : f32
    %127 = vector.broadcast %cst_37 : f32 to vector<2x32xf32>
    %128 = arith.addf %126, %127 : vector<2x32xf32>
    %129 = vector.extract_strided_slice %106 {offsets = [0, 64], sizes = [2, 32], strides = [1, 1]} : vector<2x96xf32> to vector<2x32xf32>
    %130 = vector.extract_strided_slice %108 {offsets = [0, 64], sizes = [2, 32], strides = [1, 1]} : vector<2x96xf32> to vector<2x32xf32>
    %131 = arith.mulf %118, %130 : vector<2x32xf32>
    %132 = arith.addf %129, %131 : vector<2x32xf32>
    %133 = math.tanh %132 : vector<2x32xf32>
    %cst_38 = arith.constant 1.000000e+00 : f32
    %134 = vector.broadcast %cst_38 : f32 to vector<2x32xf32>
    %135 = arith.subf %134, %128 : vector<2x32xf32>
    %136 = arith.mulf %135, %133 : vector<2x32xf32>
    %137 = arith.mulf %128, %105 : vector<2x32xf32>
    %138 = arith.addf %136, %137 : vector<2x32xf32>
    %139 = vector.extract_strided_slice %10 {offsets = [8, 0], sizes = [2, 96], strides = [1, 1]} : vector<16x96xf32> to vector<2x96xf32>
    %cst_39 = arith.constant dense<0.000000e+00> : vector<2x96xf32>
    %140 = tpu.matmul %138, %3, %cst_39 {dimension_numbers = #tpu.dot_dimension_numbers<[1], [0], [0], [1], [0, 0, 1, 1], [], []>} : vector<2x32xf32>, vector<32x96xf32>, vector<2x96xf32> -> vector<2x96xf32>
    %141 = arith.addf %140, %7 : vector<2x96xf32>
    %142 = vector.extract_strided_slice %139 {offsets = [0, 0], sizes = [2, 32], strides = [1, 1]} : vector<2x96xf32> to vector<2x32xf32>
    %143 = vector.extract_strided_slice %141 {offsets = [0, 0], sizes = [2, 32], strides = [1, 1]} : vector<2x96xf32> to vector<2x32xf32>
    %144 = arith.addf %142, %143 : vector<2x32xf32>
    %cst_40 = arith.constant 5.000000e-01 : f32
    %145 = vector.broadcast %cst_40 : f32 to vector<2x32xf32>
    %146 = arith.mulf %145, %144 : vector<2x32xf32>
    %147 = math.tanh %146 : vector<2x32xf32>
    %cst_41 = arith.constant 5.000000e-01 : f32
    %148 = vector.broadcast %cst_41 : f32 to vector<2x32xf32>
    %149 = arith.mulf %148, %147 : vector<2x32xf32>
    %cst_42 = arith.constant 5.000000e-01 : f32
    %150 = vector.broadcast %cst_42 : f32 to vector<2x32xf32>
    %151 = arith.addf %149, %150 : vector<2x32xf32>
    %152 = vector.extract_strided_slice %139 {offsets = [0, 32], sizes = [2, 32], strides = [1, 1]} : vector<2x96xf32> to vector<2x32xf32>
    %153 = vector.extract_strided_slice %141 {offsets = [0, 32], sizes = [2, 32], strides = [1, 1]} : vector<2x96xf32> to vector<2x32xf32>
    %154 = arith.addf %152, %153 : vector<2x32xf32>
    %cst_43 = arith.constant 5.000000e-01 : f32
    %155 = vector.broadcast %cst_43 : f32 to vector<2x32xf32>
    %156 = arith.mulf %155, %154 : vector<2x32xf32>
    %157 = math.tanh %156 : vector<2x32xf32>
    %cst_44 = arith.constant 5.000000e-01 : f32
    %158 = vector.broadcast %cst_44 : f32 to vector<2x32xf32>
    %159 = arith.mulf %158, %157 : vector<2x32xf32>
    %cst_45 = arith.constant 5.000000e-01 : f32
    %160 = vector.broadcast %cst_45 : f32 to vector<2x32xf32>
    %161 = arith.addf %159, %160 : vector<2x32xf32>
    %162 = vector.extract_strided_slice %139 {offsets = [0, 64], sizes = [2, 32], strides = [1, 1]} : vector<2x96xf32> to vector<2x32xf32>
    %163 = vector.extract_strided_slice %141 {offsets = [0, 64], sizes = [2, 32], strides = [1, 1]} : vector<2x96xf32> to vector<2x32xf32>
    %164 = arith.mulf %151, %163 : vector<2x32xf32>
    %165 = arith.addf %162, %164 : vector<2x32xf32>
    %166 = math.tanh %165 : vector<2x32xf32>
    %cst_46 = arith.constant 1.000000e+00 : f32
    %167 = vector.broadcast %cst_46 : f32 to vector<2x32xf32>
    %168 = arith.subf %167, %161 : vector<2x32xf32>
    %169 = arith.mulf %168, %166 : vector<2x32xf32>
    %170 = arith.mulf %161, %138 : vector<2x32xf32>
    %171 = arith.addf %169, %170 : vector<2x32xf32>
    %172 = vector.extract_strided_slice %10 {offsets = [10, 0], sizes = [2, 96], strides = [1, 1]} : vector<16x96xf32> to vector<2x96xf32>
    %cst_47 = arith.constant dense<0.000000e+00> : vector<2x96xf32>
    %173 = tpu.matmul %171, %3, %cst_47 {dimension_numbers = #tpu.dot_dimension_numbers<[1], [0], [0], [1], [0, 0, 1, 1], [], []>} : vector<2x32xf32>, vector<32x96xf32>, vector<2x96xf32> -> vector<2x96xf32>
    %174 = arith.addf %173, %7 : vector<2x96xf32>
    %175 = vector.extract_strided_slice %172 {offsets = [0, 0], sizes = [2, 32], strides = [1, 1]} : vector<2x96xf32> to vector<2x32xf32>
    %176 = vector.extract_strided_slice %174 {offsets = [0, 0], sizes = [2, 32], strides = [1, 1]} : vector<2x96xf32> to vector<2x32xf32>
    %177 = arith.addf %175, %176 : vector<2x32xf32>
    %cst_48 = arith.constant 5.000000e-01 : f32
    %178 = vector.broadcast %cst_48 : f32 to vector<2x32xf32>
    %179 = arith.mulf %178, %177 : vector<2x32xf32>
    %180 = math.tanh %179 : vector<2x32xf32>
    %cst_49 = arith.constant 5.000000e-01 : f32
    %181 = vector.broadcast %cst_49 : f32 to vector<2x32xf32>
    %182 = arith.mulf %181, %180 : vector<2x32xf32>
    %cst_50 = arith.constant 5.000000e-01 : f32
    %183 = vector.broadcast %cst_50 : f32 to vector<2x32xf32>
    %184 = arith.addf %182, %183 : vector<2x32xf32>
    %185 = vector.extract_strided_slice %172 {offsets = [0, 32], sizes = [2, 32], strides = [1, 1]} : vector<2x96xf32> to vector<2x32xf32>
    %186 = vector.extract_strided_slice %174 {offsets = [0, 32], sizes = [2, 32], strides = [1, 1]} : vector<2x96xf32> to vector<2x32xf32>
    %187 = arith.addf %185, %186 : vector<2x32xf32>
    %cst_51 = arith.constant 5.000000e-01 : f32
    %188 = vector.broadcast %cst_51 : f32 to vector<2x32xf32>
    %189 = arith.mulf %188, %187 : vector<2x32xf32>
    %190 = math.tanh %189 : vector<2x32xf32>
    %cst_52 = arith.constant 5.000000e-01 : f32
    %191 = vector.broadcast %cst_52 : f32 to vector<2x32xf32>
    %192 = arith.mulf %191, %190 : vector<2x32xf32>
    %cst_53 = arith.constant 5.000000e-01 : f32
    %193 = vector.broadcast %cst_53 : f32 to vector<2x32xf32>
    %194 = arith.addf %192, %193 : vector<2x32xf32>
    %195 = vector.extract_strided_slice %172 {offsets = [0, 64], sizes = [2, 32], strides = [1, 1]} : vector<2x96xf32> to vector<2x32xf32>
    %196 = vector.extract_strided_slice %174 {offsets = [0, 64], sizes = [2, 32], strides = [1, 1]} : vector<2x96xf32> to vector<2x32xf32>
    %197 = arith.mulf %184, %196 : vector<2x32xf32>
    %198 = arith.addf %195, %197 : vector<2x32xf32>
    %199 = math.tanh %198 : vector<2x32xf32>
    %cst_54 = arith.constant 1.000000e+00 : f32
    %200 = vector.broadcast %cst_54 : f32 to vector<2x32xf32>
    %201 = arith.subf %200, %194 : vector<2x32xf32>
    %202 = arith.mulf %201, %199 : vector<2x32xf32>
    %203 = arith.mulf %194, %171 : vector<2x32xf32>
    %204 = arith.addf %202, %203 : vector<2x32xf32>
    %205 = vector.extract_strided_slice %10 {offsets = [12, 0], sizes = [2, 96], strides = [1, 1]} : vector<16x96xf32> to vector<2x96xf32>
    %cst_55 = arith.constant dense<0.000000e+00> : vector<2x96xf32>
    %206 = tpu.matmul %204, %3, %cst_55 {dimension_numbers = #tpu.dot_dimension_numbers<[1], [0], [0], [1], [0, 0, 1, 1], [], []>} : vector<2x32xf32>, vector<32x96xf32>, vector<2x96xf32> -> vector<2x96xf32>
    %207 = arith.addf %206, %7 : vector<2x96xf32>
    %208 = vector.extract_strided_slice %205 {offsets = [0, 0], sizes = [2, 32], strides = [1, 1]} : vector<2x96xf32> to vector<2x32xf32>
    %209 = vector.extract_strided_slice %207 {offsets = [0, 0], sizes = [2, 32], strides = [1, 1]} : vector<2x96xf32> to vector<2x32xf32>
    %210 = arith.addf %208, %209 : vector<2x32xf32>
    %cst_56 = arith.constant 5.000000e-01 : f32
    %211 = vector.broadcast %cst_56 : f32 to vector<2x32xf32>
    %212 = arith.mulf %211, %210 : vector<2x32xf32>
    %213 = math.tanh %212 : vector<2x32xf32>
    %cst_57 = arith.constant 5.000000e-01 : f32
    %214 = vector.broadcast %cst_57 : f32 to vector<2x32xf32>
    %215 = arith.mulf %214, %213 : vector<2x32xf32>
    %cst_58 = arith.constant 5.000000e-01 : f32
    %216 = vector.broadcast %cst_58 : f32 to vector<2x32xf32>
    %217 = arith.addf %215, %216 : vector<2x32xf32>
    %218 = vector.extract_strided_slice %205 {offsets = [0, 32], sizes = [2, 32], strides = [1, 1]} : vector<2x96xf32> to vector<2x32xf32>
    %219 = vector.extract_strided_slice %207 {offsets = [0, 32], sizes = [2, 32], strides = [1, 1]} : vector<2x96xf32> to vector<2x32xf32>
    %220 = arith.addf %218, %219 : vector<2x32xf32>
    %cst_59 = arith.constant 5.000000e-01 : f32
    %221 = vector.broadcast %cst_59 : f32 to vector<2x32xf32>
    %222 = arith.mulf %221, %220 : vector<2x32xf32>
    %223 = math.tanh %222 : vector<2x32xf32>
    %cst_60 = arith.constant 5.000000e-01 : f32
    %224 = vector.broadcast %cst_60 : f32 to vector<2x32xf32>
    %225 = arith.mulf %224, %223 : vector<2x32xf32>
    %cst_61 = arith.constant 5.000000e-01 : f32
    %226 = vector.broadcast %cst_61 : f32 to vector<2x32xf32>
    %227 = arith.addf %225, %226 : vector<2x32xf32>
    %228 = vector.extract_strided_slice %205 {offsets = [0, 64], sizes = [2, 32], strides = [1, 1]} : vector<2x96xf32> to vector<2x32xf32>
    %229 = vector.extract_strided_slice %207 {offsets = [0, 64], sizes = [2, 32], strides = [1, 1]} : vector<2x96xf32> to vector<2x32xf32>
    %230 = arith.mulf %217, %229 : vector<2x32xf32>
    %231 = arith.addf %228, %230 : vector<2x32xf32>
    %232 = math.tanh %231 : vector<2x32xf32>
    %cst_62 = arith.constant 1.000000e+00 : f32
    %233 = vector.broadcast %cst_62 : f32 to vector<2x32xf32>
    %234 = arith.subf %233, %227 : vector<2x32xf32>
    %235 = arith.mulf %234, %232 : vector<2x32xf32>
    %236 = arith.mulf %227, %204 : vector<2x32xf32>
    %237 = arith.addf %235, %236 : vector<2x32xf32>
    %238 = vector.extract_strided_slice %10 {offsets = [14, 0], sizes = [2, 96], strides = [1, 1]} : vector<16x96xf32> to vector<2x96xf32>
    %cst_63 = arith.constant dense<0.000000e+00> : vector<2x96xf32>
    %239 = tpu.matmul %237, %3, %cst_63 {dimension_numbers = #tpu.dot_dimension_numbers<[1], [0], [0], [1], [0, 0, 1, 1], [], []>} : vector<2x32xf32>, vector<32x96xf32>, vector<2x96xf32> -> vector<2x96xf32>
    %240 = arith.addf %239, %7 : vector<2x96xf32>
    %241 = vector.extract_strided_slice %238 {offsets = [0, 0], sizes = [2, 32], strides = [1, 1]} : vector<2x96xf32> to vector<2x32xf32>
    %242 = vector.extract_strided_slice %240 {offsets = [0, 0], sizes = [2, 32], strides = [1, 1]} : vector<2x96xf32> to vector<2x32xf32>
    %243 = arith.addf %241, %242 : vector<2x32xf32>
    %cst_64 = arith.constant 5.000000e-01 : f32
    %244 = vector.broadcast %cst_64 : f32 to vector<2x32xf32>
    %245 = arith.mulf %244, %243 : vector<2x32xf32>
    %246 = math.tanh %245 : vector<2x32xf32>
    %cst_65 = arith.constant 5.000000e-01 : f32
    %247 = vector.broadcast %cst_65 : f32 to vector<2x32xf32>
    %248 = arith.mulf %247, %246 : vector<2x32xf32>
    %cst_66 = arith.constant 5.000000e-01 : f32
    %249 = vector.broadcast %cst_66 : f32 to vector<2x32xf32>
    %250 = arith.addf %248, %249 : vector<2x32xf32>
    %251 = vector.extract_strided_slice %238 {offsets = [0, 32], sizes = [2, 32], strides = [1, 1]} : vector<2x96xf32> to vector<2x32xf32>
    %252 = vector.extract_strided_slice %240 {offsets = [0, 32], sizes = [2, 32], strides = [1, 1]} : vector<2x96xf32> to vector<2x32xf32>
    %253 = arith.addf %251, %252 : vector<2x32xf32>
    %cst_67 = arith.constant 5.000000e-01 : f32
    %254 = vector.broadcast %cst_67 : f32 to vector<2x32xf32>
    %255 = arith.mulf %254, %253 : vector<2x32xf32>
    %256 = math.tanh %255 : vector<2x32xf32>
    %cst_68 = arith.constant 5.000000e-01 : f32
    %257 = vector.broadcast %cst_68 : f32 to vector<2x32xf32>
    %258 = arith.mulf %257, %256 : vector<2x32xf32>
    %cst_69 = arith.constant 5.000000e-01 : f32
    %259 = vector.broadcast %cst_69 : f32 to vector<2x32xf32>
    %260 = arith.addf %258, %259 : vector<2x32xf32>
    %261 = vector.extract_strided_slice %238 {offsets = [0, 64], sizes = [2, 32], strides = [1, 1]} : vector<2x96xf32> to vector<2x32xf32>
    %262 = vector.extract_strided_slice %240 {offsets = [0, 64], sizes = [2, 32], strides = [1, 1]} : vector<2x96xf32> to vector<2x32xf32>
    %263 = arith.mulf %250, %262 : vector<2x32xf32>
    %264 = arith.addf %261, %263 : vector<2x32xf32>
    %265 = math.tanh %264 : vector<2x32xf32>
    %cst_70 = arith.constant 1.000000e+00 : f32
    %266 = vector.broadcast %cst_70 : f32 to vector<2x32xf32>
    %267 = arith.subf %266, %260 : vector<2x32xf32>
    %268 = arith.mulf %267, %265 : vector<2x32xf32>
    %269 = arith.mulf %260, %237 : vector<2x32xf32>
    %270 = arith.addf %268, %269 : vector<2x32xf32>
    %c56 = arith.constant 56 : index
    %c0_71 = arith.constant 0 : index
    %271 = vector.load %arg2[%c56, %c0_71] : memref<712x128xf32, #tpu.memory_space<vmem>>, vector<4x96xf32>
    %c64 = arith.constant 64 : index
    %c0_72 = arith.constant 0 : index
    %272 = vector.load %arg2[%c64, %c0_72] : memref<712x128xf32, #tpu.memory_space<vmem>>, vector<32x96xf32>
    %c96 = arith.constant 96 : index
    %c0_73 = arith.constant 0 : index
    %273 = vector.load %arg2[%c96, %c0_73] : memref<712x128xf32, #tpu.memory_space<vmem>>, vector<1x96xf32>
    %c104 = arith.constant 104 : index
    %c0_74 = arith.constant 0 : index
    %274 = vector.load %arg2[%c104, %c0_74] : memref<712x128xf32, #tpu.memory_space<vmem>>, vector<1x96xf32>
    %275 = vector.shape_cast %274 : vector<1x96xf32> to vector<1x96xf32>
    %276 = vector.broadcast %275 : vector<1x96xf32> to vector<2x96xf32>
    %cst_75 = arith.constant dense<0.000000e+00> : vector<16x96xf32>
    %277 = tpu.matmul %0, %271, %cst_75 {dimension_numbers = #tpu.dot_dimension_numbers<[1], [0], [0], [1], [0, 0, 1, 1], [], []>} : vector<16x4xf32>, vector<4x96xf32>, vector<16x96xf32> -> vector<16x96xf32>
    %278 = vector.broadcast %273 : vector<1x96xf32> to vector<16x96xf32>
    %279 = arith.addf %277, %278 : vector<16x96xf32>
    %280 = vector.extract_strided_slice %279 {offsets = [14, 0], sizes = [2, 96], strides = [1, 1]} : vector<16x96xf32> to vector<2x96xf32>
    %281 = vector.extract_strided_slice %280 {offsets = [0, 0], sizes = [2, 32], strides = [1, 1]} : vector<2x96xf32> to vector<2x32xf32>
    %282 = vector.extract_strided_slice %276 {offsets = [0, 0], sizes = [2, 32], strides = [1, 1]} : vector<2x96xf32> to vector<2x32xf32>
    %283 = arith.addf %281, %282 : vector<2x32xf32>
    %cst_76 = arith.constant 5.000000e-01 : f32
    %284 = vector.broadcast %cst_76 : f32 to vector<2x32xf32>
    %285 = arith.mulf %284, %283 : vector<2x32xf32>
    %286 = math.tanh %285 : vector<2x32xf32>
    %cst_77 = arith.constant 5.000000e-01 : f32
    %287 = vector.broadcast %cst_77 : f32 to vector<2x32xf32>
    %288 = arith.mulf %287, %286 : vector<2x32xf32>
    %cst_78 = arith.constant 5.000000e-01 : f32
    %289 = vector.broadcast %cst_78 : f32 to vector<2x32xf32>
    %290 = arith.addf %288, %289 : vector<2x32xf32>
    %291 = vector.extract_strided_slice %280 {offsets = [0, 32], sizes = [2, 32], strides = [1, 1]} : vector<2x96xf32> to vector<2x32xf32>
    %292 = vector.extract_strided_slice %276 {offsets = [0, 32], sizes = [2, 32], strides = [1, 1]} : vector<2x96xf32> to vector<2x32xf32>
    %293 = arith.addf %291, %292 : vector<2x32xf32>
    %cst_79 = arith.constant 5.000000e-01 : f32
    %294 = vector.broadcast %cst_79 : f32 to vector<2x32xf32>
    %295 = arith.mulf %294, %293 : vector<2x32xf32>
    %296 = math.tanh %295 : vector<2x32xf32>
    %cst_80 = arith.constant 5.000000e-01 : f32
    %297 = vector.broadcast %cst_80 : f32 to vector<2x32xf32>
    %298 = arith.mulf %297, %296 : vector<2x32xf32>
    %cst_81 = arith.constant 5.000000e-01 : f32
    %299 = vector.broadcast %cst_81 : f32 to vector<2x32xf32>
    %300 = arith.addf %298, %299 : vector<2x32xf32>
    %301 = vector.extract_strided_slice %280 {offsets = [0, 64], sizes = [2, 32], strides = [1, 1]} : vector<2x96xf32> to vector<2x32xf32>
    %302 = vector.extract_strided_slice %276 {offsets = [0, 64], sizes = [2, 32], strides = [1, 1]} : vector<2x96xf32> to vector<2x32xf32>
    %303 = arith.mulf %290, %302 : vector<2x32xf32>
    %304 = arith.addf %301, %303 : vector<2x32xf32>
    %305 = math.tanh %304 : vector<2x32xf32>
    %cst_82 = arith.constant 1.000000e+00 : f32
    %306 = vector.broadcast %cst_82 : f32 to vector<2x32xf32>
    %307 = arith.subf %306, %300 : vector<2x32xf32>
    %308 = arith.mulf %307, %305 : vector<2x32xf32>
    %309 = vector.extract_strided_slice %279 {offsets = [12, 0], sizes = [2, 96], strides = [1, 1]} : vector<16x96xf32> to vector<2x96xf32>
    %cst_83 = arith.constant dense<0.000000e+00> : vector<2x96xf32>
    %310 = tpu.matmul %308, %272, %cst_83 {dimension_numbers = #tpu.dot_dimension_numbers<[1], [0], [0], [1], [0, 0, 1, 1], [], []>} : vector<2x32xf32>, vector<32x96xf32>, vector<2x96xf32> -> vector<2x96xf32>
    %311 = arith.addf %310, %276 : vector<2x96xf32>
    %312 = vector.extract_strided_slice %309 {offsets = [0, 0], sizes = [2, 32], strides = [1, 1]} : vector<2x96xf32> to vector<2x32xf32>
    %313 = vector.extract_strided_slice %311 {offsets = [0, 0], sizes = [2, 32], strides = [1, 1]} : vector<2x96xf32> to vector<2x32xf32>
    %314 = arith.addf %312, %313 : vector<2x32xf32>
    %cst_84 = arith.constant 5.000000e-01 : f32
    %315 = vector.broadcast %cst_84 : f32 to vector<2x32xf32>
    %316 = arith.mulf %315, %314 : vector<2x32xf32>
    %317 = math.tanh %316 : vector<2x32xf32>
    %cst_85 = arith.constant 5.000000e-01 : f32
    %318 = vector.broadcast %cst_85 : f32 to vector<2x32xf32>
    %319 = arith.mulf %318, %317 : vector<2x32xf32>
    %cst_86 = arith.constant 5.000000e-01 : f32
    %320 = vector.broadcast %cst_86 : f32 to vector<2x32xf32>
    %321 = arith.addf %319, %320 : vector<2x32xf32>
    %322 = vector.extract_strided_slice %309 {offsets = [0, 32], sizes = [2, 32], strides = [1, 1]} : vector<2x96xf32> to vector<2x32xf32>
    %323 = vector.extract_strided_slice %311 {offsets = [0, 32], sizes = [2, 32], strides = [1, 1]} : vector<2x96xf32> to vector<2x32xf32>
    %324 = arith.addf %322, %323 : vector<2x32xf32>
    %cst_87 = arith.constant 5.000000e-01 : f32
    %325 = vector.broadcast %cst_87 : f32 to vector<2x32xf32>
    %326 = arith.mulf %325, %324 : vector<2x32xf32>
    %327 = math.tanh %326 : vector<2x32xf32>
    %cst_88 = arith.constant 5.000000e-01 : f32
    %328 = vector.broadcast %cst_88 : f32 to vector<2x32xf32>
    %329 = arith.mulf %328, %327 : vector<2x32xf32>
    %cst_89 = arith.constant 5.000000e-01 : f32
    %330 = vector.broadcast %cst_89 : f32 to vector<2x32xf32>
    %331 = arith.addf %329, %330 : vector<2x32xf32>
    %332 = vector.extract_strided_slice %309 {offsets = [0, 64], sizes = [2, 32], strides = [1, 1]} : vector<2x96xf32> to vector<2x32xf32>
    %333 = vector.extract_strided_slice %311 {offsets = [0, 64], sizes = [2, 32], strides = [1, 1]} : vector<2x96xf32> to vector<2x32xf32>
    %334 = arith.mulf %321, %333 : vector<2x32xf32>
    %335 = arith.addf %332, %334 : vector<2x32xf32>
    %336 = math.tanh %335 : vector<2x32xf32>
    %cst_90 = arith.constant 1.000000e+00 : f32
    %337 = vector.broadcast %cst_90 : f32 to vector<2x32xf32>
    %338 = arith.subf %337, %331 : vector<2x32xf32>
    %339 = arith.mulf %338, %336 : vector<2x32xf32>
    %340 = arith.mulf %331, %308 : vector<2x32xf32>
    %341 = arith.addf %339, %340 : vector<2x32xf32>
    %342 = vector.extract_strided_slice %279 {offsets = [10, 0], sizes = [2, 96], strides = [1, 1]} : vector<16x96xf32> to vector<2x96xf32>
    %cst_91 = arith.constant dense<0.000000e+00> : vector<2x96xf32>
    %343 = tpu.matmul %341, %272, %cst_91 {dimension_numbers = #tpu.dot_dimension_numbers<[1], [0], [0], [1], [0, 0, 1, 1], [], []>} : vector<2x32xf32>, vector<32x96xf32>, vector<2x96xf32> -> vector<2x96xf32>
    %344 = arith.addf %343, %276 : vector<2x96xf32>
    %345 = vector.extract_strided_slice %342 {offsets = [0, 0], sizes = [2, 32], strides = [1, 1]} : vector<2x96xf32> to vector<2x32xf32>
    %346 = vector.extract_strided_slice %344 {offsets = [0, 0], sizes = [2, 32], strides = [1, 1]} : vector<2x96xf32> to vector<2x32xf32>
    %347 = arith.addf %345, %346 : vector<2x32xf32>
    %cst_92 = arith.constant 5.000000e-01 : f32
    %348 = vector.broadcast %cst_92 : f32 to vector<2x32xf32>
    %349 = arith.mulf %348, %347 : vector<2x32xf32>
    %350 = math.tanh %349 : vector<2x32xf32>
    %cst_93 = arith.constant 5.000000e-01 : f32
    %351 = vector.broadcast %cst_93 : f32 to vector<2x32xf32>
    %352 = arith.mulf %351, %350 : vector<2x32xf32>
    %cst_94 = arith.constant 5.000000e-01 : f32
    %353 = vector.broadcast %cst_94 : f32 to vector<2x32xf32>
    %354 = arith.addf %352, %353 : vector<2x32xf32>
    %355 = vector.extract_strided_slice %342 {offsets = [0, 32], sizes = [2, 32], strides = [1, 1]} : vector<2x96xf32> to vector<2x32xf32>
    %356 = vector.extract_strided_slice %344 {offsets = [0, 32], sizes = [2, 32], strides = [1, 1]} : vector<2x96xf32> to vector<2x32xf32>
    %357 = arith.addf %355, %356 : vector<2x32xf32>
    %cst_95 = arith.constant 5.000000e-01 : f32
    %358 = vector.broadcast %cst_95 : f32 to vector<2x32xf32>
    %359 = arith.mulf %358, %357 : vector<2x32xf32>
    %360 = math.tanh %359 : vector<2x32xf32>
    %cst_96 = arith.constant 5.000000e-01 : f32
    %361 = vector.broadcast %cst_96 : f32 to vector<2x32xf32>
    %362 = arith.mulf %361, %360 : vector<2x32xf32>
    %cst_97 = arith.constant 5.000000e-01 : f32
    %363 = vector.broadcast %cst_97 : f32 to vector<2x32xf32>
    %364 = arith.addf %362, %363 : vector<2x32xf32>
    %365 = vector.extract_strided_slice %342 {offsets = [0, 64], sizes = [2, 32], strides = [1, 1]} : vector<2x96xf32> to vector<2x32xf32>
    %366 = vector.extract_strided_slice %344 {offsets = [0, 64], sizes = [2, 32], strides = [1, 1]} : vector<2x96xf32> to vector<2x32xf32>
    %367 = arith.mulf %354, %366 : vector<2x32xf32>
    %368 = arith.addf %365, %367 : vector<2x32xf32>
    %369 = math.tanh %368 : vector<2x32xf32>
    %cst_98 = arith.constant 1.000000e+00 : f32
    %370 = vector.broadcast %cst_98 : f32 to vector<2x32xf32>
    %371 = arith.subf %370, %364 : vector<2x32xf32>
    %372 = arith.mulf %371, %369 : vector<2x32xf32>
    %373 = arith.mulf %364, %341 : vector<2x32xf32>
    %374 = arith.addf %372, %373 : vector<2x32xf32>
    %375 = vector.extract_strided_slice %279 {offsets = [8, 0], sizes = [2, 96], strides = [1, 1]} : vector<16x96xf32> to vector<2x96xf32>
    %cst_99 = arith.constant dense<0.000000e+00> : vector<2x96xf32>
    %376 = tpu.matmul %374, %272, %cst_99 {dimension_numbers = #tpu.dot_dimension_numbers<[1], [0], [0], [1], [0, 0, 1, 1], [], []>} : vector<2x32xf32>, vector<32x96xf32>, vector<2x96xf32> -> vector<2x96xf32>
    %377 = arith.addf %376, %276 : vector<2x96xf32>
    %378 = vector.extract_strided_slice %375 {offsets = [0, 0], sizes = [2, 32], strides = [1, 1]} : vector<2x96xf32> to vector<2x32xf32>
    %379 = vector.extract_strided_slice %377 {offsets = [0, 0], sizes = [2, 32], strides = [1, 1]} : vector<2x96xf32> to vector<2x32xf32>
    %380 = arith.addf %378, %379 : vector<2x32xf32>
    %cst_100 = arith.constant 5.000000e-01 : f32
    %381 = vector.broadcast %cst_100 : f32 to vector<2x32xf32>
    %382 = arith.mulf %381, %380 : vector<2x32xf32>
    %383 = math.tanh %382 : vector<2x32xf32>
    %cst_101 = arith.constant 5.000000e-01 : f32
    %384 = vector.broadcast %cst_101 : f32 to vector<2x32xf32>
    %385 = arith.mulf %384, %383 : vector<2x32xf32>
    %cst_102 = arith.constant 5.000000e-01 : f32
    %386 = vector.broadcast %cst_102 : f32 to vector<2x32xf32>
    %387 = arith.addf %385, %386 : vector<2x32xf32>
    %388 = vector.extract_strided_slice %375 {offsets = [0, 32], sizes = [2, 32], strides = [1, 1]} : vector<2x96xf32> to vector<2x32xf32>
    %389 = vector.extract_strided_slice %377 {offsets = [0, 32], sizes = [2, 32], strides = [1, 1]} : vector<2x96xf32> to vector<2x32xf32>
    %390 = arith.addf %388, %389 : vector<2x32xf32>
    %cst_103 = arith.constant 5.000000e-01 : f32
    %391 = vector.broadcast %cst_103 : f32 to vector<2x32xf32>
    %392 = arith.mulf %391, %390 : vector<2x32xf32>
    %393 = math.tanh %392 : vector<2x32xf32>
    %cst_104 = arith.constant 5.000000e-01 : f32
    %394 = vector.broadcast %cst_104 : f32 to vector<2x32xf32>
    %395 = arith.mulf %394, %393 : vector<2x32xf32>
    %cst_105 = arith.constant 5.000000e-01 : f32
    %396 = vector.broadcast %cst_105 : f32 to vector<2x32xf32>
    %397 = arith.addf %395, %396 : vector<2x32xf32>
    %398 = vector.extract_strided_slice %375 {offsets = [0, 64], sizes = [2, 32], strides = [1, 1]} : vector<2x96xf32> to vector<2x32xf32>
    %399 = vector.extract_strided_slice %377 {offsets = [0, 64], sizes = [2, 32], strides = [1, 1]} : vector<2x96xf32> to vector<2x32xf32>
    %400 = arith.mulf %387, %399 : vector<2x32xf32>
    %401 = arith.addf %398, %400 : vector<2x32xf32>
    %402 = math.tanh %401 : vector<2x32xf32>
    %cst_106 = arith.constant 1.000000e+00 : f32
    %403 = vector.broadcast %cst_106 : f32 to vector<2x32xf32>
    %404 = arith.subf %403, %397 : vector<2x32xf32>
    %405 = arith.mulf %404, %402 : vector<2x32xf32>
    %406 = arith.mulf %397, %374 : vector<2x32xf32>
    %407 = arith.addf %405, %406 : vector<2x32xf32>
    %408 = vector.extract_strided_slice %279 {offsets = [6, 0], sizes = [2, 96], strides = [1, 1]} : vector<16x96xf32> to vector<2x96xf32>
    %cst_107 = arith.constant dense<0.000000e+00> : vector<2x96xf32>
    %409 = tpu.matmul %407, %272, %cst_107 {dimension_numbers = #tpu.dot_dimension_numbers<[1], [0], [0], [1], [0, 0, 1, 1], [], []>} : vector<2x32xf32>, vector<32x96xf32>, vector<2x96xf32> -> vector<2x96xf32>
    %410 = arith.addf %409, %276 : vector<2x96xf32>
    %411 = vector.extract_strided_slice %408 {offsets = [0, 0], sizes = [2, 32], strides = [1, 1]} : vector<2x96xf32> to vector<2x32xf32>
    %412 = vector.extract_strided_slice %410 {offsets = [0, 0], sizes = [2, 32], strides = [1, 1]} : vector<2x96xf32> to vector<2x32xf32>
    %413 = arith.addf %411, %412 : vector<2x32xf32>
    %cst_108 = arith.constant 5.000000e-01 : f32
    %414 = vector.broadcast %cst_108 : f32 to vector<2x32xf32>
    %415 = arith.mulf %414, %413 : vector<2x32xf32>
    %416 = math.tanh %415 : vector<2x32xf32>
    %cst_109 = arith.constant 5.000000e-01 : f32
    %417 = vector.broadcast %cst_109 : f32 to vector<2x32xf32>
    %418 = arith.mulf %417, %416 : vector<2x32xf32>
    %cst_110 = arith.constant 5.000000e-01 : f32
    %419 = vector.broadcast %cst_110 : f32 to vector<2x32xf32>
    %420 = arith.addf %418, %419 : vector<2x32xf32>
    %421 = vector.extract_strided_slice %408 {offsets = [0, 32], sizes = [2, 32], strides = [1, 1]} : vector<2x96xf32> to vector<2x32xf32>
    %422 = vector.extract_strided_slice %410 {offsets = [0, 32], sizes = [2, 32], strides = [1, 1]} : vector<2x96xf32> to vector<2x32xf32>
    %423 = arith.addf %421, %422 : vector<2x32xf32>
    %cst_111 = arith.constant 5.000000e-01 : f32
    %424 = vector.broadcast %cst_111 : f32 to vector<2x32xf32>
    %425 = arith.mulf %424, %423 : vector<2x32xf32>
    %426 = math.tanh %425 : vector<2x32xf32>
    %cst_112 = arith.constant 5.000000e-01 : f32
    %427 = vector.broadcast %cst_112 : f32 to vector<2x32xf32>
    %428 = arith.mulf %427, %426 : vector<2x32xf32>
    %cst_113 = arith.constant 5.000000e-01 : f32
    %429 = vector.broadcast %cst_113 : f32 to vector<2x32xf32>
    %430 = arith.addf %428, %429 : vector<2x32xf32>
    %431 = vector.extract_strided_slice %408 {offsets = [0, 64], sizes = [2, 32], strides = [1, 1]} : vector<2x96xf32> to vector<2x32xf32>
    %432 = vector.extract_strided_slice %410 {offsets = [0, 64], sizes = [2, 32], strides = [1, 1]} : vector<2x96xf32> to vector<2x32xf32>
    %433 = arith.mulf %420, %432 : vector<2x32xf32>
    %434 = arith.addf %431, %433 : vector<2x32xf32>
    %435 = math.tanh %434 : vector<2x32xf32>
    %cst_114 = arith.constant 1.000000e+00 : f32
    %436 = vector.broadcast %cst_114 : f32 to vector<2x32xf32>
    %437 = arith.subf %436, %430 : vector<2x32xf32>
    %438 = arith.mulf %437, %435 : vector<2x32xf32>
    %439 = arith.mulf %430, %407 : vector<2x32xf32>
    %440 = arith.addf %438, %439 : vector<2x32xf32>
    %441 = vector.extract_strided_slice %279 {offsets = [4, 0], sizes = [2, 96], strides = [1, 1]} : vector<16x96xf32> to vector<2x96xf32>
    %cst_115 = arith.constant dense<0.000000e+00> : vector<2x96xf32>
    %442 = tpu.matmul %440, %272, %cst_115 {dimension_numbers = #tpu.dot_dimension_numbers<[1], [0], [0], [1], [0, 0, 1, 1], [], []>} : vector<2x32xf32>, vector<32x96xf32>, vector<2x96xf32> -> vector<2x96xf32>
    %443 = arith.addf %442, %276 : vector<2x96xf32>
    %444 = vector.extract_strided_slice %441 {offsets = [0, 0], sizes = [2, 32], strides = [1, 1]} : vector<2x96xf32> to vector<2x32xf32>
    %445 = vector.extract_strided_slice %443 {offsets = [0, 0], sizes = [2, 32], strides = [1, 1]} : vector<2x96xf32> to vector<2x32xf32>
    %446 = arith.addf %444, %445 : vector<2x32xf32>
    %cst_116 = arith.constant 5.000000e-01 : f32
    %447 = vector.broadcast %cst_116 : f32 to vector<2x32xf32>
    %448 = arith.mulf %447, %446 : vector<2x32xf32>
    %449 = math.tanh %448 : vector<2x32xf32>
    %cst_117 = arith.constant 5.000000e-01 : f32
    %450 = vector.broadcast %cst_117 : f32 to vector<2x32xf32>
    %451 = arith.mulf %450, %449 : vector<2x32xf32>
    %cst_118 = arith.constant 5.000000e-01 : f32
    %452 = vector.broadcast %cst_118 : f32 to vector<2x32xf32>
    %453 = arith.addf %451, %452 : vector<2x32xf32>
    %454 = vector.extract_strided_slice %441 {offsets = [0, 32], sizes = [2, 32], strides = [1, 1]} : vector<2x96xf32> to vector<2x32xf32>
    %455 = vector.extract_strided_slice %443 {offsets = [0, 32], sizes = [2, 32], strides = [1, 1]} : vector<2x96xf32> to vector<2x32xf32>
    %456 = arith.addf %454, %455 : vector<2x32xf32>
    %cst_119 = arith.constant 5.000000e-01 : f32
    %457 = vector.broadcast %cst_119 : f32 to vector<2x32xf32>
    %458 = arith.mulf %457, %456 : vector<2x32xf32>
    %459 = math.tanh %458 : vector<2x32xf32>
    %cst_120 = arith.constant 5.000000e-01 : f32
    %460 = vector.broadcast %cst_120 : f32 to vector<2x32xf32>
    %461 = arith.mulf %460, %459 : vector<2x32xf32>
    %cst_121 = arith.constant 5.000000e-01 : f32
    %462 = vector.broadcast %cst_121 : f32 to vector<2x32xf32>
    %463 = arith.addf %461, %462 : vector<2x32xf32>
    %464 = vector.extract_strided_slice %441 {offsets = [0, 64], sizes = [2, 32], strides = [1, 1]} : vector<2x96xf32> to vector<2x32xf32>
    %465 = vector.extract_strided_slice %443 {offsets = [0, 64], sizes = [2, 32], strides = [1, 1]} : vector<2x96xf32> to vector<2x32xf32>
    %466 = arith.mulf %453, %465 : vector<2x32xf32>
    %467 = arith.addf %464, %466 : vector<2x32xf32>
    %468 = math.tanh %467 : vector<2x32xf32>
    %cst_122 = arith.constant 1.000000e+00 : f32
    %469 = vector.broadcast %cst_122 : f32 to vector<2x32xf32>
    %470 = arith.subf %469, %463 : vector<2x32xf32>
    %471 = arith.mulf %470, %468 : vector<2x32xf32>
    %472 = arith.mulf %463, %440 : vector<2x32xf32>
    %473 = arith.addf %471, %472 : vector<2x32xf32>
    %474 = vector.extract_strided_slice %279 {offsets = [2, 0], sizes = [2, 96], strides = [1, 1]} : vector<16x96xf32> to vector<2x96xf32>
    %cst_123 = arith.constant dense<0.000000e+00> : vector<2x96xf32>
    %475 = tpu.matmul %473, %272, %cst_123 {dimension_numbers = #tpu.dot_dimension_numbers<[1], [0], [0], [1], [0, 0, 1, 1], [], []>} : vector<2x32xf32>, vector<32x96xf32>, vector<2x96xf32> -> vector<2x96xf32>
    %476 = arith.addf %475, %276 : vector<2x96xf32>
    %477 = vector.extract_strided_slice %474 {offsets = [0, 0], sizes = [2, 32], strides = [1, 1]} : vector<2x96xf32> to vector<2x32xf32>
    %478 = vector.extract_strided_slice %476 {offsets = [0, 0], sizes = [2, 32], strides = [1, 1]} : vector<2x96xf32> to vector<2x32xf32>
    %479 = arith.addf %477, %478 : vector<2x32xf32>
    %cst_124 = arith.constant 5.000000e-01 : f32
    %480 = vector.broadcast %cst_124 : f32 to vector<2x32xf32>
    %481 = arith.mulf %480, %479 : vector<2x32xf32>
    %482 = math.tanh %481 : vector<2x32xf32>
    %cst_125 = arith.constant 5.000000e-01 : f32
    %483 = vector.broadcast %cst_125 : f32 to vector<2x32xf32>
    %484 = arith.mulf %483, %482 : vector<2x32xf32>
    %cst_126 = arith.constant 5.000000e-01 : f32
    %485 = vector.broadcast %cst_126 : f32 to vector<2x32xf32>
    %486 = arith.addf %484, %485 : vector<2x32xf32>
    %487 = vector.extract_strided_slice %474 {offsets = [0, 32], sizes = [2, 32], strides = [1, 1]} : vector<2x96xf32> to vector<2x32xf32>
    %488 = vector.extract_strided_slice %476 {offsets = [0, 32], sizes = [2, 32], strides = [1, 1]} : vector<2x96xf32> to vector<2x32xf32>
    %489 = arith.addf %487, %488 : vector<2x32xf32>
    %cst_127 = arith.constant 5.000000e-01 : f32
    %490 = vector.broadcast %cst_127 : f32 to vector<2x32xf32>
    %491 = arith.mulf %490, %489 : vector<2x32xf32>
    %492 = math.tanh %491 : vector<2x32xf32>
    %cst_128 = arith.constant 5.000000e-01 : f32
    %493 = vector.broadcast %cst_128 : f32 to vector<2x32xf32>
    %494 = arith.mulf %493, %492 : vector<2x32xf32>
    %cst_129 = arith.constant 5.000000e-01 : f32
    %495 = vector.broadcast %cst_129 : f32 to vector<2x32xf32>
    %496 = arith.addf %494, %495 : vector<2x32xf32>
    %497 = vector.extract_strided_slice %474 {offsets = [0, 64], sizes = [2, 32], strides = [1, 1]} : vector<2x96xf32> to vector<2x32xf32>
    %498 = vector.extract_strided_slice %476 {offsets = [0, 64], sizes = [2, 32], strides = [1, 1]} : vector<2x96xf32> to vector<2x32xf32>
    %499 = arith.mulf %486, %498 : vector<2x32xf32>
    %500 = arith.addf %497, %499 : vector<2x32xf32>
    %501 = math.tanh %500 : vector<2x32xf32>
    %cst_130 = arith.constant 1.000000e+00 : f32
    %502 = vector.broadcast %cst_130 : f32 to vector<2x32xf32>
    %503 = arith.subf %502, %496 : vector<2x32xf32>
    %504 = arith.mulf %503, %501 : vector<2x32xf32>
    %505 = arith.mulf %496, %473 : vector<2x32xf32>
    %506 = arith.addf %504, %505 : vector<2x32xf32>
    %507 = vector.extract_strided_slice %279 {offsets = [0, 0], sizes = [2, 96], strides = [1, 1]} : vector<16x96xf32> to vector<2x96xf32>
    %cst_131 = arith.constant dense<0.000000e+00> : vector<2x96xf32>
    %508 = tpu.matmul %506, %272, %cst_131 {dimension_numbers = #tpu.dot_dimension_numbers<[1], [0], [0], [1], [0, 0, 1, 1], [], []>} : vector<2x32xf32>, vector<32x96xf32>, vector<2x96xf32> -> vector<2x96xf32>
    %509 = arith.addf %508, %276 : vector<2x96xf32>
    %510 = vector.extract_strided_slice %507 {offsets = [0, 0], sizes = [2, 32], strides = [1, 1]} : vector<2x96xf32> to vector<2x32xf32>
    %511 = vector.extract_strided_slice %509 {offsets = [0, 0], sizes = [2, 32], strides = [1, 1]} : vector<2x96xf32> to vector<2x32xf32>
    %512 = arith.addf %510, %511 : vector<2x32xf32>
    %cst_132 = arith.constant 5.000000e-01 : f32
    %513 = vector.broadcast %cst_132 : f32 to vector<2x32xf32>
    %514 = arith.mulf %513, %512 : vector<2x32xf32>
    %515 = math.tanh %514 : vector<2x32xf32>
    %cst_133 = arith.constant 5.000000e-01 : f32
    %516 = vector.broadcast %cst_133 : f32 to vector<2x32xf32>
    %517 = arith.mulf %516, %515 : vector<2x32xf32>
    %cst_134 = arith.constant 5.000000e-01 : f32
    %518 = vector.broadcast %cst_134 : f32 to vector<2x32xf32>
    %519 = arith.addf %517, %518 : vector<2x32xf32>
    %520 = vector.extract_strided_slice %507 {offsets = [0, 32], sizes = [2, 32], strides = [1, 1]} : vector<2x96xf32> to vector<2x32xf32>
    %521 = vector.extract_strided_slice %509 {offsets = [0, 32], sizes = [2, 32], strides = [1, 1]} : vector<2x96xf32> to vector<2x32xf32>
    %522 = arith.addf %520, %521 : vector<2x32xf32>
    %cst_135 = arith.constant 5.000000e-01 : f32
    %523 = vector.broadcast %cst_135 : f32 to vector<2x32xf32>
    %524 = arith.mulf %523, %522 : vector<2x32xf32>
    %525 = math.tanh %524 : vector<2x32xf32>
    %cst_136 = arith.constant 5.000000e-01 : f32
    %526 = vector.broadcast %cst_136 : f32 to vector<2x32xf32>
    %527 = arith.mulf %526, %525 : vector<2x32xf32>
    %cst_137 = arith.constant 5.000000e-01 : f32
    %528 = vector.broadcast %cst_137 : f32 to vector<2x32xf32>
    %529 = arith.addf %527, %528 : vector<2x32xf32>
    %530 = vector.extract_strided_slice %507 {offsets = [0, 64], sizes = [2, 32], strides = [1, 1]} : vector<2x96xf32> to vector<2x32xf32>
    %531 = vector.extract_strided_slice %509 {offsets = [0, 64], sizes = [2, 32], strides = [1, 1]} : vector<2x96xf32> to vector<2x32xf32>
    %532 = arith.mulf %519, %531 : vector<2x32xf32>
    %533 = arith.addf %530, %532 : vector<2x32xf32>
    %534 = math.tanh %533 : vector<2x32xf32>
    %cst_138 = arith.constant 1.000000e+00 : f32
    %535 = vector.broadcast %cst_138 : f32 to vector<2x32xf32>
    %536 = arith.subf %535, %529 : vector<2x32xf32>
    %537 = arith.mulf %536, %534 : vector<2x32xf32>
    %538 = arith.mulf %529, %506 : vector<2x32xf32>
    %539 = arith.addf %537, %538 : vector<2x32xf32>
    %540 = arith.addf %270, %539 : vector<2x32xf32>
    %c112 = arith.constant 112 : index
    %c0_139 = arith.constant 0 : index
    %541 = vector.load %arg2[%c112, %c0_139] : memref<712x128xf32, #tpu.memory_space<vmem>>, vector<4x96xf32>
    %c120 = arith.constant 120 : index
    %c0_140 = arith.constant 0 : index
    %542 = vector.load %arg2[%c120, %c0_140] : memref<712x128xf32, #tpu.memory_space<vmem>>, vector<32x96xf32>
    %c152 = arith.constant 152 : index
    %c0_141 = arith.constant 0 : index
    %543 = vector.load %arg2[%c152, %c0_141] : memref<712x128xf32, #tpu.memory_space<vmem>>, vector<1x96xf32>
    %c160 = arith.constant 160 : index
    %c0_142 = arith.constant 0 : index
    %544 = vector.load %arg2[%c160, %c0_142] : memref<712x128xf32, #tpu.memory_space<vmem>>, vector<1x96xf32>
    %545 = vector.shape_cast %544 : vector<1x96xf32> to vector<1x96xf32>
    %546 = vector.broadcast %545 : vector<1x96xf32> to vector<2x96xf32>
    %cst_143 = arith.constant dense<0.000000e+00> : vector<12x96xf32>
    %547 = tpu.matmul %1, %541, %cst_143 {dimension_numbers = #tpu.dot_dimension_numbers<[1], [0], [0], [1], [0, 0, 1, 1], [], []>} : vector<12x4xf32>, vector<4x96xf32>, vector<12x96xf32> -> vector<12x96xf32>
    %548 = vector.broadcast %543 : vector<1x96xf32> to vector<12x96xf32>
    %549 = arith.addf %547, %548 : vector<12x96xf32>
    %550 = vector.extract_strided_slice %549 {offsets = [0, 0], sizes = [2, 96], strides = [1, 1]} : vector<12x96xf32> to vector<2x96xf32>
    %551 = vector.extract_strided_slice %550 {offsets = [0, 0], sizes = [2, 32], strides = [1, 1]} : vector<2x96xf32> to vector<2x32xf32>
    %552 = vector.extract_strided_slice %546 {offsets = [0, 0], sizes = [2, 32], strides = [1, 1]} : vector<2x96xf32> to vector<2x32xf32>
    %553 = arith.addf %551, %552 : vector<2x32xf32>
    %cst_144 = arith.constant 5.000000e-01 : f32
    %554 = vector.broadcast %cst_144 : f32 to vector<2x32xf32>
    %555 = arith.mulf %554, %553 : vector<2x32xf32>
    %556 = math.tanh %555 : vector<2x32xf32>
    %cst_145 = arith.constant 5.000000e-01 : f32
    %557 = vector.broadcast %cst_145 : f32 to vector<2x32xf32>
    %558 = arith.mulf %557, %556 : vector<2x32xf32>
    %cst_146 = arith.constant 5.000000e-01 : f32
    %559 = vector.broadcast %cst_146 : f32 to vector<2x32xf32>
    %560 = arith.addf %558, %559 : vector<2x32xf32>
    %561 = vector.extract_strided_slice %550 {offsets = [0, 32], sizes = [2, 32], strides = [1, 1]} : vector<2x96xf32> to vector<2x32xf32>
    %562 = vector.extract_strided_slice %546 {offsets = [0, 32], sizes = [2, 32], strides = [1, 1]} : vector<2x96xf32> to vector<2x32xf32>
    %563 = arith.addf %561, %562 : vector<2x32xf32>
    %cst_147 = arith.constant 5.000000e-01 : f32
    %564 = vector.broadcast %cst_147 : f32 to vector<2x32xf32>
    %565 = arith.mulf %564, %563 : vector<2x32xf32>
    %566 = math.tanh %565 : vector<2x32xf32>
    %cst_148 = arith.constant 5.000000e-01 : f32
    %567 = vector.broadcast %cst_148 : f32 to vector<2x32xf32>
    %568 = arith.mulf %567, %566 : vector<2x32xf32>
    %cst_149 = arith.constant 5.000000e-01 : f32
    %569 = vector.broadcast %cst_149 : f32 to vector<2x32xf32>
    %570 = arith.addf %568, %569 : vector<2x32xf32>
    %571 = vector.extract_strided_slice %550 {offsets = [0, 64], sizes = [2, 32], strides = [1, 1]} : vector<2x96xf32> to vector<2x32xf32>
    %572 = vector.extract_strided_slice %546 {offsets = [0, 64], sizes = [2, 32], strides = [1, 1]} : vector<2x96xf32> to vector<2x32xf32>
    %573 = arith.mulf %560, %572 : vector<2x32xf32>
    %574 = arith.addf %571, %573 : vector<2x32xf32>
    %575 = math.tanh %574 : vector<2x32xf32>
    %cst_150 = arith.constant 1.000000e+00 : f32
    %576 = vector.broadcast %cst_150 : f32 to vector<2x32xf32>
    %577 = arith.subf %576, %570 : vector<2x32xf32>
    %578 = arith.mulf %577, %575 : vector<2x32xf32>
    %579 = vector.extract_strided_slice %549 {offsets = [2, 0], sizes = [2, 96], strides = [1, 1]} : vector<12x96xf32> to vector<2x96xf32>
    %cst_151 = arith.constant dense<0.000000e+00> : vector<2x96xf32>
    %580 = tpu.matmul %578, %542, %cst_151 {dimension_numbers = #tpu.dot_dimension_numbers<[1], [0], [0], [1], [0, 0, 1, 1], [], []>} : vector<2x32xf32>, vector<32x96xf32>, vector<2x96xf32> -> vector<2x96xf32>
    %581 = arith.addf %580, %546 : vector<2x96xf32>
    %582 = vector.extract_strided_slice %579 {offsets = [0, 0], sizes = [2, 32], strides = [1, 1]} : vector<2x96xf32> to vector<2x32xf32>
    %583 = vector.extract_strided_slice %581 {offsets = [0, 0], sizes = [2, 32], strides = [1, 1]} : vector<2x96xf32> to vector<2x32xf32>
    %584 = arith.addf %582, %583 : vector<2x32xf32>
    %cst_152 = arith.constant 5.000000e-01 : f32
    %585 = vector.broadcast %cst_152 : f32 to vector<2x32xf32>
    %586 = arith.mulf %585, %584 : vector<2x32xf32>
    %587 = math.tanh %586 : vector<2x32xf32>
    %cst_153 = arith.constant 5.000000e-01 : f32
    %588 = vector.broadcast %cst_153 : f32 to vector<2x32xf32>
    %589 = arith.mulf %588, %587 : vector<2x32xf32>
    %cst_154 = arith.constant 5.000000e-01 : f32
    %590 = vector.broadcast %cst_154 : f32 to vector<2x32xf32>
    %591 = arith.addf %589, %590 : vector<2x32xf32>
    %592 = vector.extract_strided_slice %579 {offsets = [0, 32], sizes = [2, 32], strides = [1, 1]} : vector<2x96xf32> to vector<2x32xf32>
    %593 = vector.extract_strided_slice %581 {offsets = [0, 32], sizes = [2, 32], strides = [1, 1]} : vector<2x96xf32> to vector<2x32xf32>
    %594 = arith.addf %592, %593 : vector<2x32xf32>
    %cst_155 = arith.constant 5.000000e-01 : f32
    %595 = vector.broadcast %cst_155 : f32 to vector<2x32xf32>
    %596 = arith.mulf %595, %594 : vector<2x32xf32>
    %597 = math.tanh %596 : vector<2x32xf32>
    %cst_156 = arith.constant 5.000000e-01 : f32
    %598 = vector.broadcast %cst_156 : f32 to vector<2x32xf32>
    %599 = arith.mulf %598, %597 : vector<2x32xf32>
    %cst_157 = arith.constant 5.000000e-01 : f32
    %600 = vector.broadcast %cst_157 : f32 to vector<2x32xf32>
    %601 = arith.addf %599, %600 : vector<2x32xf32>
    %602 = vector.extract_strided_slice %579 {offsets = [0, 64], sizes = [2, 32], strides = [1, 1]} : vector<2x96xf32> to vector<2x32xf32>
    %603 = vector.extract_strided_slice %581 {offsets = [0, 64], sizes = [2, 32], strides = [1, 1]} : vector<2x96xf32> to vector<2x32xf32>
    %604 = arith.mulf %591, %603 : vector<2x32xf32>
    %605 = arith.addf %602, %604 : vector<2x32xf32>
    %606 = math.tanh %605 : vector<2x32xf32>
    %cst_158 = arith.constant 1.000000e+00 : f32
    %607 = vector.broadcast %cst_158 : f32 to vector<2x32xf32>
    %608 = arith.subf %607, %601 : vector<2x32xf32>
    %609 = arith.mulf %608, %606 : vector<2x32xf32>
    %610 = arith.mulf %601, %578 : vector<2x32xf32>
    %611 = arith.addf %609, %610 : vector<2x32xf32>
    %612 = vector.extract_strided_slice %549 {offsets = [4, 0], sizes = [2, 96], strides = [1, 1]} : vector<12x96xf32> to vector<2x96xf32>
    %cst_159 = arith.constant dense<0.000000e+00> : vector<2x96xf32>
    %613 = tpu.matmul %611, %542, %cst_159 {dimension_numbers = #tpu.dot_dimension_numbers<[1], [0], [0], [1], [0, 0, 1, 1], [], []>} : vector<2x32xf32>, vector<32x96xf32>, vector<2x96xf32> -> vector<2x96xf32>
    %614 = arith.addf %613, %546 : vector<2x96xf32>
    %615 = vector.extract_strided_slice %612 {offsets = [0, 0], sizes = [2, 32], strides = [1, 1]} : vector<2x96xf32> to vector<2x32xf32>
    %616 = vector.extract_strided_slice %614 {offsets = [0, 0], sizes = [2, 32], strides = [1, 1]} : vector<2x96xf32> to vector<2x32xf32>
    %617 = arith.addf %615, %616 : vector<2x32xf32>
    %cst_160 = arith.constant 5.000000e-01 : f32
    %618 = vector.broadcast %cst_160 : f32 to vector<2x32xf32>
    %619 = arith.mulf %618, %617 : vector<2x32xf32>
    %620 = math.tanh %619 : vector<2x32xf32>
    %cst_161 = arith.constant 5.000000e-01 : f32
    %621 = vector.broadcast %cst_161 : f32 to vector<2x32xf32>
    %622 = arith.mulf %621, %620 : vector<2x32xf32>
    %cst_162 = arith.constant 5.000000e-01 : f32
    %623 = vector.broadcast %cst_162 : f32 to vector<2x32xf32>
    %624 = arith.addf %622, %623 : vector<2x32xf32>
    %625 = vector.extract_strided_slice %612 {offsets = [0, 32], sizes = [2, 32], strides = [1, 1]} : vector<2x96xf32> to vector<2x32xf32>
    %626 = vector.extract_strided_slice %614 {offsets = [0, 32], sizes = [2, 32], strides = [1, 1]} : vector<2x96xf32> to vector<2x32xf32>
    %627 = arith.addf %625, %626 : vector<2x32xf32>
    %cst_163 = arith.constant 5.000000e-01 : f32
    %628 = vector.broadcast %cst_163 : f32 to vector<2x32xf32>
    %629 = arith.mulf %628, %627 : vector<2x32xf32>
    %630 = math.tanh %629 : vector<2x32xf32>
    %cst_164 = arith.constant 5.000000e-01 : f32
    %631 = vector.broadcast %cst_164 : f32 to vector<2x32xf32>
    %632 = arith.mulf %631, %630 : vector<2x32xf32>
    %cst_165 = arith.constant 5.000000e-01 : f32
    %633 = vector.broadcast %cst_165 : f32 to vector<2x32xf32>
    %634 = arith.addf %632, %633 : vector<2x32xf32>
    %635 = vector.extract_strided_slice %612 {offsets = [0, 64], sizes = [2, 32], strides = [1, 1]} : vector<2x96xf32> to vector<2x32xf32>
    %636 = vector.extract_strided_slice %614 {offsets = [0, 64], sizes = [2, 32], strides = [1, 1]} : vector<2x96xf32> to vector<2x32xf32>
    %637 = arith.mulf %624, %636 : vector<2x32xf32>
    %638 = arith.addf %635, %637 : vector<2x32xf32>
    %639 = math.tanh %638 : vector<2x32xf32>
    %cst_166 = arith.constant 1.000000e+00 : f32
    %640 = vector.broadcast %cst_166 : f32 to vector<2x32xf32>
    %641 = arith.subf %640, %634 : vector<2x32xf32>
    %642 = arith.mulf %641, %639 : vector<2x32xf32>
    %643 = arith.mulf %634, %611 : vector<2x32xf32>
    %644 = arith.addf %642, %643 : vector<2x32xf32>
    %645 = vector.extract_strided_slice %549 {offsets = [6, 0], sizes = [2, 96], strides = [1, 1]} : vector<12x96xf32> to vector<2x96xf32>
    %cst_167 = arith.constant dense<0.000000e+00> : vector<2x96xf32>
    %646 = tpu.matmul %644, %542, %cst_167 {dimension_numbers = #tpu.dot_dimension_numbers<[1], [0], [0], [1], [0, 0, 1, 1], [], []>} : vector<2x32xf32>, vector<32x96xf32>, vector<2x96xf32> -> vector<2x96xf32>
    %647 = arith.addf %646, %546 : vector<2x96xf32>
    %648 = vector.extract_strided_slice %645 {offsets = [0, 0], sizes = [2, 32], strides = [1, 1]} : vector<2x96xf32> to vector<2x32xf32>
    %649 = vector.extract_strided_slice %647 {offsets = [0, 0], sizes = [2, 32], strides = [1, 1]} : vector<2x96xf32> to vector<2x32xf32>
    %650 = arith.addf %648, %649 : vector<2x32xf32>
    %cst_168 = arith.constant 5.000000e-01 : f32
    %651 = vector.broadcast %cst_168 : f32 to vector<2x32xf32>
    %652 = arith.mulf %651, %650 : vector<2x32xf32>
    %653 = math.tanh %652 : vector<2x32xf32>
    %cst_169 = arith.constant 5.000000e-01 : f32
    %654 = vector.broadcast %cst_169 : f32 to vector<2x32xf32>
    %655 = arith.mulf %654, %653 : vector<2x32xf32>
    %cst_170 = arith.constant 5.000000e-01 : f32
    %656 = vector.broadcast %cst_170 : f32 to vector<2x32xf32>
    %657 = arith.addf %655, %656 : vector<2x32xf32>
    %658 = vector.extract_strided_slice %645 {offsets = [0, 32], sizes = [2, 32], strides = [1, 1]} : vector<2x96xf32> to vector<2x32xf32>
    %659 = vector.extract_strided_slice %647 {offsets = [0, 32], sizes = [2, 32], strides = [1, 1]} : vector<2x96xf32> to vector<2x32xf32>
    %660 = arith.addf %658, %659 : vector<2x32xf32>
    %cst_171 = arith.constant 5.000000e-01 : f32
    %661 = vector.broadcast %cst_171 : f32 to vector<2x32xf32>
    %662 = arith.mulf %661, %660 : vector<2x32xf32>
    %663 = math.tanh %662 : vector<2x32xf32>
    %cst_172 = arith.constant 5.000000e-01 : f32
    %664 = vector.broadcast %cst_172 : f32 to vector<2x32xf32>
    %665 = arith.mulf %664, %663 : vector<2x32xf32>
    %cst_173 = arith.constant 5.000000e-01 : f32
    %666 = vector.broadcast %cst_173 : f32 to vector<2x32xf32>
    %667 = arith.addf %665, %666 : vector<2x32xf32>
    %668 = vector.extract_strided_slice %645 {offsets = [0, 64], sizes = [2, 32], strides = [1, 1]} : vector<2x96xf32> to vector<2x32xf32>
    %669 = vector.extract_strided_slice %647 {offsets = [0, 64], sizes = [2, 32], strides = [1, 1]} : vector<2x96xf32> to vector<2x32xf32>
    %670 = arith.mulf %657, %669 : vector<2x32xf32>
    %671 = arith.addf %668, %670 : vector<2x32xf32>
    %672 = math.tanh %671 : vector<2x32xf32>
    %cst_174 = arith.constant 1.000000e+00 : f32
    %673 = vector.broadcast %cst_174 : f32 to vector<2x32xf32>
    %674 = arith.subf %673, %667 : vector<2x32xf32>
    %675 = arith.mulf %674, %672 : vector<2x32xf32>
    %676 = arith.mulf %667, %644 : vector<2x32xf32>
    %677 = arith.addf %675, %676 : vector<2x32xf32>
    %678 = vector.extract_strided_slice %549 {offsets = [8, 0], sizes = [2, 96], strides = [1, 1]} : vector<12x96xf32> to vector<2x96xf32>
    %cst_175 = arith.constant dense<0.000000e+00> : vector<2x96xf32>
    %679 = tpu.matmul %677, %542, %cst_175 {dimension_numbers = #tpu.dot_dimension_numbers<[1], [0], [0], [1], [0, 0, 1, 1], [], []>} : vector<2x32xf32>, vector<32x96xf32>, vector<2x96xf32> -> vector<2x96xf32>
    %680 = arith.addf %679, %546 : vector<2x96xf32>
    %681 = vector.extract_strided_slice %678 {offsets = [0, 0], sizes = [2, 32], strides = [1, 1]} : vector<2x96xf32> to vector<2x32xf32>
    %682 = vector.extract_strided_slice %680 {offsets = [0, 0], sizes = [2, 32], strides = [1, 1]} : vector<2x96xf32> to vector<2x32xf32>
    %683 = arith.addf %681, %682 : vector<2x32xf32>
    %cst_176 = arith.constant 5.000000e-01 : f32
    %684 = vector.broadcast %cst_176 : f32 to vector<2x32xf32>
    %685 = arith.mulf %684, %683 : vector<2x32xf32>
    %686 = math.tanh %685 : vector<2x32xf32>
    %cst_177 = arith.constant 5.000000e-01 : f32
    %687 = vector.broadcast %cst_177 : f32 to vector<2x32xf32>
    %688 = arith.mulf %687, %686 : vector<2x32xf32>
    %cst_178 = arith.constant 5.000000e-01 : f32
    %689 = vector.broadcast %cst_178 : f32 to vector<2x32xf32>
    %690 = arith.addf %688, %689 : vector<2x32xf32>
    %691 = vector.extract_strided_slice %678 {offsets = [0, 32], sizes = [2, 32], strides = [1, 1]} : vector<2x96xf32> to vector<2x32xf32>
    %692 = vector.extract_strided_slice %680 {offsets = [0, 32], sizes = [2, 32], strides = [1, 1]} : vector<2x96xf32> to vector<2x32xf32>
    %693 = arith.addf %691, %692 : vector<2x32xf32>
    %cst_179 = arith.constant 5.000000e-01 : f32
    %694 = vector.broadcast %cst_179 : f32 to vector<2x32xf32>
    %695 = arith.mulf %694, %693 : vector<2x32xf32>
    %696 = math.tanh %695 : vector<2x32xf32>
    %cst_180 = arith.constant 5.000000e-01 : f32
    %697 = vector.broadcast %cst_180 : f32 to vector<2x32xf32>
    %698 = arith.mulf %697, %696 : vector<2x32xf32>
    %cst_181 = arith.constant 5.000000e-01 : f32
    %699 = vector.broadcast %cst_181 : f32 to vector<2x32xf32>
    %700 = arith.addf %698, %699 : vector<2x32xf32>
    %701 = vector.extract_strided_slice %678 {offsets = [0, 64], sizes = [2, 32], strides = [1, 1]} : vector<2x96xf32> to vector<2x32xf32>
    %702 = vector.extract_strided_slice %680 {offsets = [0, 64], sizes = [2, 32], strides = [1, 1]} : vector<2x96xf32> to vector<2x32xf32>
    %703 = arith.mulf %690, %702 : vector<2x32xf32>
    %704 = arith.addf %701, %703 : vector<2x32xf32>
    %705 = math.tanh %704 : vector<2x32xf32>
    %cst_182 = arith.constant 1.000000e+00 : f32
    %706 = vector.broadcast %cst_182 : f32 to vector<2x32xf32>
    %707 = arith.subf %706, %700 : vector<2x32xf32>
    %708 = arith.mulf %707, %705 : vector<2x32xf32>
    %709 = arith.mulf %700, %677 : vector<2x32xf32>
    %710 = arith.addf %708, %709 : vector<2x32xf32>
    %711 = vector.extract_strided_slice %549 {offsets = [10, 0], sizes = [2, 96], strides = [1, 1]} : vector<12x96xf32> to vector<2x96xf32>
    %cst_183 = arith.constant dense<0.000000e+00> : vector<2x96xf32>
    %712 = tpu.matmul %710, %542, %cst_183 {dimension_numbers = #tpu.dot_dimension_numbers<[1], [0], [0], [1], [0, 0, 1, 1], [], []>} : vector<2x32xf32>, vector<32x96xf32>, vector<2x96xf32> -> vector<2x96xf32>
    %713 = arith.addf %712, %546 : vector<2x96xf32>
    %714 = vector.extract_strided_slice %711 {offsets = [0, 0], sizes = [2, 32], strides = [1, 1]} : vector<2x96xf32> to vector<2x32xf32>
    %715 = vector.extract_strided_slice %713 {offsets = [0, 0], sizes = [2, 32], strides = [1, 1]} : vector<2x96xf32> to vector<2x32xf32>
    %716 = arith.addf %714, %715 : vector<2x32xf32>
    %cst_184 = arith.constant 5.000000e-01 : f32
    %717 = vector.broadcast %cst_184 : f32 to vector<2x32xf32>
    %718 = arith.mulf %717, %716 : vector<2x32xf32>
    %719 = math.tanh %718 : vector<2x32xf32>
    %cst_185 = arith.constant 5.000000e-01 : f32
    %720 = vector.broadcast %cst_185 : f32 to vector<2x32xf32>
    %721 = arith.mulf %720, %719 : vector<2x32xf32>
    %cst_186 = arith.constant 5.000000e-01 : f32
    %722 = vector.broadcast %cst_186 : f32 to vector<2x32xf32>
    %723 = arith.addf %721, %722 : vector<2x32xf32>
    %724 = vector.extract_strided_slice %711 {offsets = [0, 32], sizes = [2, 32], strides = [1, 1]} : vector<2x96xf32> to vector<2x32xf32>
    %725 = vector.extract_strided_slice %713 {offsets = [0, 32], sizes = [2, 32], strides = [1, 1]} : vector<2x96xf32> to vector<2x32xf32>
    %726 = arith.addf %724, %725 : vector<2x32xf32>
    %cst_187 = arith.constant 5.000000e-01 : f32
    %727 = vector.broadcast %cst_187 : f32 to vector<2x32xf32>
    %728 = arith.mulf %727, %726 : vector<2x32xf32>
    %729 = math.tanh %728 : vector<2x32xf32>
    %cst_188 = arith.constant 5.000000e-01 : f32
    %730 = vector.broadcast %cst_188 : f32 to vector<2x32xf32>
    %731 = arith.mulf %730, %729 : vector<2x32xf32>
    %cst_189 = arith.constant 5.000000e-01 : f32
    %732 = vector.broadcast %cst_189 : f32 to vector<2x32xf32>
    %733 = arith.addf %731, %732 : vector<2x32xf32>
    %734 = vector.extract_strided_slice %711 {offsets = [0, 64], sizes = [2, 32], strides = [1, 1]} : vector<2x96xf32> to vector<2x32xf32>
    %735 = vector.extract_strided_slice %713 {offsets = [0, 64], sizes = [2, 32], strides = [1, 1]} : vector<2x96xf32> to vector<2x32xf32>
    %736 = arith.mulf %723, %735 : vector<2x32xf32>
    %737 = arith.addf %734, %736 : vector<2x32xf32>
    %738 = math.tanh %737 : vector<2x32xf32>
    %cst_190 = arith.constant 1.000000e+00 : f32
    %739 = vector.broadcast %cst_190 : f32 to vector<2x32xf32>
    %740 = arith.subf %739, %733 : vector<2x32xf32>
    %741 = arith.mulf %740, %738 : vector<2x32xf32>
    %742 = arith.mulf %733, %710 : vector<2x32xf32>
    %743 = arith.addf %741, %742 : vector<2x32xf32>
    %c168 = arith.constant 168 : index
    %c0_191 = arith.constant 0 : index
    %744 = vector.load %arg2[%c168, %c0_191] : memref<712x128xf32, #tpu.memory_space<vmem>>, vector<4x96xf32>
    %c176 = arith.constant 176 : index
    %c0_192 = arith.constant 0 : index
    %745 = vector.load %arg2[%c176, %c0_192] : memref<712x128xf32, #tpu.memory_space<vmem>>, vector<32x96xf32>
    %c208 = arith.constant 208 : index
    %c0_193 = arith.constant 0 : index
    %746 = vector.load %arg2[%c208, %c0_193] : memref<712x128xf32, #tpu.memory_space<vmem>>, vector<1x96xf32>
    %c216 = arith.constant 216 : index
    %c0_194 = arith.constant 0 : index
    %747 = vector.load %arg2[%c216, %c0_194] : memref<712x128xf32, #tpu.memory_space<vmem>>, vector<1x96xf32>
    %748 = vector.shape_cast %747 : vector<1x96xf32> to vector<1x96xf32>
    %749 = vector.broadcast %748 : vector<1x96xf32> to vector<2x96xf32>
    %cst_195 = arith.constant dense<0.000000e+00> : vector<12x96xf32>
    %750 = tpu.matmul %1, %744, %cst_195 {dimension_numbers = #tpu.dot_dimension_numbers<[1], [0], [0], [1], [0, 0, 1, 1], [], []>} : vector<12x4xf32>, vector<4x96xf32>, vector<12x96xf32> -> vector<12x96xf32>
    %751 = vector.broadcast %746 : vector<1x96xf32> to vector<12x96xf32>
    %752 = arith.addf %750, %751 : vector<12x96xf32>
    %753 = vector.extract_strided_slice %752 {offsets = [10, 0], sizes = [2, 96], strides = [1, 1]} : vector<12x96xf32> to vector<2x96xf32>
    %754 = vector.extract_strided_slice %753 {offsets = [0, 0], sizes = [2, 32], strides = [1, 1]} : vector<2x96xf32> to vector<2x32xf32>
    %755 = vector.extract_strided_slice %749 {offsets = [0, 0], sizes = [2, 32], strides = [1, 1]} : vector<2x96xf32> to vector<2x32xf32>
    %756 = arith.addf %754, %755 : vector<2x32xf32>
    %cst_196 = arith.constant 5.000000e-01 : f32
    %757 = vector.broadcast %cst_196 : f32 to vector<2x32xf32>
    %758 = arith.mulf %757, %756 : vector<2x32xf32>
    %759 = math.tanh %758 : vector<2x32xf32>
    %cst_197 = arith.constant 5.000000e-01 : f32
    %760 = vector.broadcast %cst_197 : f32 to vector<2x32xf32>
    %761 = arith.mulf %760, %759 : vector<2x32xf32>
    %cst_198 = arith.constant 5.000000e-01 : f32
    %762 = vector.broadcast %cst_198 : f32 to vector<2x32xf32>
    %763 = arith.addf %761, %762 : vector<2x32xf32>
    %764 = vector.extract_strided_slice %753 {offsets = [0, 32], sizes = [2, 32], strides = [1, 1]} : vector<2x96xf32> to vector<2x32xf32>
    %765 = vector.extract_strided_slice %749 {offsets = [0, 32], sizes = [2, 32], strides = [1, 1]} : vector<2x96xf32> to vector<2x32xf32>
    %766 = arith.addf %764, %765 : vector<2x32xf32>
    %cst_199 = arith.constant 5.000000e-01 : f32
    %767 = vector.broadcast %cst_199 : f32 to vector<2x32xf32>
    %768 = arith.mulf %767, %766 : vector<2x32xf32>
    %769 = math.tanh %768 : vector<2x32xf32>
    %cst_200 = arith.constant 5.000000e-01 : f32
    %770 = vector.broadcast %cst_200 : f32 to vector<2x32xf32>
    %771 = arith.mulf %770, %769 : vector<2x32xf32>
    %cst_201 = arith.constant 5.000000e-01 : f32
    %772 = vector.broadcast %cst_201 : f32 to vector<2x32xf32>
    %773 = arith.addf %771, %772 : vector<2x32xf32>
    %774 = vector.extract_strided_slice %753 {offsets = [0, 64], sizes = [2, 32], strides = [1, 1]} : vector<2x96xf32> to vector<2x32xf32>
    %775 = vector.extract_strided_slice %749 {offsets = [0, 64], sizes = [2, 32], strides = [1, 1]} : vector<2x96xf32> to vector<2x32xf32>
    %776 = arith.mulf %763, %775 : vector<2x32xf32>
    %777 = arith.addf %774, %776 : vector<2x32xf32>
    %778 = math.tanh %777 : vector<2x32xf32>
    %cst_202 = arith.constant 1.000000e+00 : f32
    %779 = vector.broadcast %cst_202 : f32 to vector<2x32xf32>
    %780 = arith.subf %779, %773 : vector<2x32xf32>
    %781 = arith.mulf %780, %778 : vector<2x32xf32>
    %782 = vector.extract_strided_slice %752 {offsets = [8, 0], sizes = [2, 96], strides = [1, 1]} : vector<12x96xf32> to vector<2x96xf32>
    %cst_203 = arith.constant dense<0.000000e+00> : vector<2x96xf32>
    %783 = tpu.matmul %781, %745, %cst_203 {dimension_numbers = #tpu.dot_dimension_numbers<[1], [0], [0], [1], [0, 0, 1, 1], [], []>} : vector<2x32xf32>, vector<32x96xf32>, vector<2x96xf32> -> vector<2x96xf32>
    %784 = arith.addf %783, %749 : vector<2x96xf32>
    %785 = vector.extract_strided_slice %782 {offsets = [0, 0], sizes = [2, 32], strides = [1, 1]} : vector<2x96xf32> to vector<2x32xf32>
    %786 = vector.extract_strided_slice %784 {offsets = [0, 0], sizes = [2, 32], strides = [1, 1]} : vector<2x96xf32> to vector<2x32xf32>
    %787 = arith.addf %785, %786 : vector<2x32xf32>
    %cst_204 = arith.constant 5.000000e-01 : f32
    %788 = vector.broadcast %cst_204 : f32 to vector<2x32xf32>
    %789 = arith.mulf %788, %787 : vector<2x32xf32>
    %790 = math.tanh %789 : vector<2x32xf32>
    %cst_205 = arith.constant 5.000000e-01 : f32
    %791 = vector.broadcast %cst_205 : f32 to vector<2x32xf32>
    %792 = arith.mulf %791, %790 : vector<2x32xf32>
    %cst_206 = arith.constant 5.000000e-01 : f32
    %793 = vector.broadcast %cst_206 : f32 to vector<2x32xf32>
    %794 = arith.addf %792, %793 : vector<2x32xf32>
    %795 = vector.extract_strided_slice %782 {offsets = [0, 32], sizes = [2, 32], strides = [1, 1]} : vector<2x96xf32> to vector<2x32xf32>
    %796 = vector.extract_strided_slice %784 {offsets = [0, 32], sizes = [2, 32], strides = [1, 1]} : vector<2x96xf32> to vector<2x32xf32>
    %797 = arith.addf %795, %796 : vector<2x32xf32>
    %cst_207 = arith.constant 5.000000e-01 : f32
    %798 = vector.broadcast %cst_207 : f32 to vector<2x32xf32>
    %799 = arith.mulf %798, %797 : vector<2x32xf32>
    %800 = math.tanh %799 : vector<2x32xf32>
    %cst_208 = arith.constant 5.000000e-01 : f32
    %801 = vector.broadcast %cst_208 : f32 to vector<2x32xf32>
    %802 = arith.mulf %801, %800 : vector<2x32xf32>
    %cst_209 = arith.constant 5.000000e-01 : f32
    %803 = vector.broadcast %cst_209 : f32 to vector<2x32xf32>
    %804 = arith.addf %802, %803 : vector<2x32xf32>
    %805 = vector.extract_strided_slice %782 {offsets = [0, 64], sizes = [2, 32], strides = [1, 1]} : vector<2x96xf32> to vector<2x32xf32>
    %806 = vector.extract_strided_slice %784 {offsets = [0, 64], sizes = [2, 32], strides = [1, 1]} : vector<2x96xf32> to vector<2x32xf32>
    %807 = arith.mulf %794, %806 : vector<2x32xf32>
    %808 = arith.addf %805, %807 : vector<2x32xf32>
    %809 = math.tanh %808 : vector<2x32xf32>
    %cst_210 = arith.constant 1.000000e+00 : f32
    %810 = vector.broadcast %cst_210 : f32 to vector<2x32xf32>
    %811 = arith.subf %810, %804 : vector<2x32xf32>
    %812 = arith.mulf %811, %809 : vector<2x32xf32>
    %813 = arith.mulf %804, %781 : vector<2x32xf32>
    %814 = arith.addf %812, %813 : vector<2x32xf32>
    %815 = vector.extract_strided_slice %752 {offsets = [6, 0], sizes = [2, 96], strides = [1, 1]} : vector<12x96xf32> to vector<2x96xf32>
    %cst_211 = arith.constant dense<0.000000e+00> : vector<2x96xf32>
    %816 = tpu.matmul %814, %745, %cst_211 {dimension_numbers = #tpu.dot_dimension_numbers<[1], [0], [0], [1], [0, 0, 1, 1], [], []>} : vector<2x32xf32>, vector<32x96xf32>, vector<2x96xf32> -> vector<2x96xf32>
    %817 = arith.addf %816, %749 : vector<2x96xf32>
    %818 = vector.extract_strided_slice %815 {offsets = [0, 0], sizes = [2, 32], strides = [1, 1]} : vector<2x96xf32> to vector<2x32xf32>
    %819 = vector.extract_strided_slice %817 {offsets = [0, 0], sizes = [2, 32], strides = [1, 1]} : vector<2x96xf32> to vector<2x32xf32>
    %820 = arith.addf %818, %819 : vector<2x32xf32>
    %cst_212 = arith.constant 5.000000e-01 : f32
    %821 = vector.broadcast %cst_212 : f32 to vector<2x32xf32>
    %822 = arith.mulf %821, %820 : vector<2x32xf32>
    %823 = math.tanh %822 : vector<2x32xf32>
    %cst_213 = arith.constant 5.000000e-01 : f32
    %824 = vector.broadcast %cst_213 : f32 to vector<2x32xf32>
    %825 = arith.mulf %824, %823 : vector<2x32xf32>
    %cst_214 = arith.constant 5.000000e-01 : f32
    %826 = vector.broadcast %cst_214 : f32 to vector<2x32xf32>
    %827 = arith.addf %825, %826 : vector<2x32xf32>
    %828 = vector.extract_strided_slice %815 {offsets = [0, 32], sizes = [2, 32], strides = [1, 1]} : vector<2x96xf32> to vector<2x32xf32>
    %829 = vector.extract_strided_slice %817 {offsets = [0, 32], sizes = [2, 32], strides = [1, 1]} : vector<2x96xf32> to vector<2x32xf32>
    %830 = arith.addf %828, %829 : vector<2x32xf32>
    %cst_215 = arith.constant 5.000000e-01 : f32
    %831 = vector.broadcast %cst_215 : f32 to vector<2x32xf32>
    %832 = arith.mulf %831, %830 : vector<2x32xf32>
    %833 = math.tanh %832 : vector<2x32xf32>
    %cst_216 = arith.constant 5.000000e-01 : f32
    %834 = vector.broadcast %cst_216 : f32 to vector<2x32xf32>
    %835 = arith.mulf %834, %833 : vector<2x32xf32>
    %cst_217 = arith.constant 5.000000e-01 : f32
    %836 = vector.broadcast %cst_217 : f32 to vector<2x32xf32>
    %837 = arith.addf %835, %836 : vector<2x32xf32>
    %838 = vector.extract_strided_slice %815 {offsets = [0, 64], sizes = [2, 32], strides = [1, 1]} : vector<2x96xf32> to vector<2x32xf32>
    %839 = vector.extract_strided_slice %817 {offsets = [0, 64], sizes = [2, 32], strides = [1, 1]} : vector<2x96xf32> to vector<2x32xf32>
    %840 = arith.mulf %827, %839 : vector<2x32xf32>
    %841 = arith.addf %838, %840 : vector<2x32xf32>
    %842 = math.tanh %841 : vector<2x32xf32>
    %cst_218 = arith.constant 1.000000e+00 : f32
    %843 = vector.broadcast %cst_218 : f32 to vector<2x32xf32>
    %844 = arith.subf %843, %837 : vector<2x32xf32>
    %845 = arith.mulf %844, %842 : vector<2x32xf32>
    %846 = arith.mulf %837, %814 : vector<2x32xf32>
    %847 = arith.addf %845, %846 : vector<2x32xf32>
    %848 = vector.extract_strided_slice %752 {offsets = [4, 0], sizes = [2, 96], strides = [1, 1]} : vector<12x96xf32> to vector<2x96xf32>
    %cst_219 = arith.constant dense<0.000000e+00> : vector<2x96xf32>
    %849 = tpu.matmul %847, %745, %cst_219 {dimension_numbers = #tpu.dot_dimension_numbers<[1], [0], [0], [1], [0, 0, 1, 1], [], []>} : vector<2x32xf32>, vector<32x96xf32>, vector<2x96xf32> -> vector<2x96xf32>
    %850 = arith.addf %849, %749 : vector<2x96xf32>
    %851 = vector.extract_strided_slice %848 {offsets = [0, 0], sizes = [2, 32], strides = [1, 1]} : vector<2x96xf32> to vector<2x32xf32>
    %852 = vector.extract_strided_slice %850 {offsets = [0, 0], sizes = [2, 32], strides = [1, 1]} : vector<2x96xf32> to vector<2x32xf32>
    %853 = arith.addf %851, %852 : vector<2x32xf32>
    %cst_220 = arith.constant 5.000000e-01 : f32
    %854 = vector.broadcast %cst_220 : f32 to vector<2x32xf32>
    %855 = arith.mulf %854, %853 : vector<2x32xf32>
    %856 = math.tanh %855 : vector<2x32xf32>
    %cst_221 = arith.constant 5.000000e-01 : f32
    %857 = vector.broadcast %cst_221 : f32 to vector<2x32xf32>
    %858 = arith.mulf %857, %856 : vector<2x32xf32>
    %cst_222 = arith.constant 5.000000e-01 : f32
    %859 = vector.broadcast %cst_222 : f32 to vector<2x32xf32>
    %860 = arith.addf %858, %859 : vector<2x32xf32>
    %861 = vector.extract_strided_slice %848 {offsets = [0, 32], sizes = [2, 32], strides = [1, 1]} : vector<2x96xf32> to vector<2x32xf32>
    %862 = vector.extract_strided_slice %850 {offsets = [0, 32], sizes = [2, 32], strides = [1, 1]} : vector<2x96xf32> to vector<2x32xf32>
    %863 = arith.addf %861, %862 : vector<2x32xf32>
    %cst_223 = arith.constant 5.000000e-01 : f32
    %864 = vector.broadcast %cst_223 : f32 to vector<2x32xf32>
    %865 = arith.mulf %864, %863 : vector<2x32xf32>
    %866 = math.tanh %865 : vector<2x32xf32>
    %cst_224 = arith.constant 5.000000e-01 : f32
    %867 = vector.broadcast %cst_224 : f32 to vector<2x32xf32>
    %868 = arith.mulf %867, %866 : vector<2x32xf32>
    %cst_225 = arith.constant 5.000000e-01 : f32
    %869 = vector.broadcast %cst_225 : f32 to vector<2x32xf32>
    %870 = arith.addf %868, %869 : vector<2x32xf32>
    %871 = vector.extract_strided_slice %848 {offsets = [0, 64], sizes = [2, 32], strides = [1, 1]} : vector<2x96xf32> to vector<2x32xf32>
    %872 = vector.extract_strided_slice %850 {offsets = [0, 64], sizes = [2, 32], strides = [1, 1]} : vector<2x96xf32> to vector<2x32xf32>
    %873 = arith.mulf %860, %872 : vector<2x32xf32>
    %874 = arith.addf %871, %873 : vector<2x32xf32>
    %875 = math.tanh %874 : vector<2x32xf32>
    %cst_226 = arith.constant 1.000000e+00 : f32
    %876 = vector.broadcast %cst_226 : f32 to vector<2x32xf32>
    %877 = arith.subf %876, %870 : vector<2x32xf32>
    %878 = arith.mulf %877, %875 : vector<2x32xf32>
    %879 = arith.mulf %870, %847 : vector<2x32xf32>
    %880 = arith.addf %878, %879 : vector<2x32xf32>
    %881 = vector.extract_strided_slice %752 {offsets = [2, 0], sizes = [2, 96], strides = [1, 1]} : vector<12x96xf32> to vector<2x96xf32>
    %cst_227 = arith.constant dense<0.000000e+00> : vector<2x96xf32>
    %882 = tpu.matmul %880, %745, %cst_227 {dimension_numbers = #tpu.dot_dimension_numbers<[1], [0], [0], [1], [0, 0, 1, 1], [], []>} : vector<2x32xf32>, vector<32x96xf32>, vector<2x96xf32> -> vector<2x96xf32>
    %883 = arith.addf %882, %749 : vector<2x96xf32>
    %884 = vector.extract_strided_slice %881 {offsets = [0, 0], sizes = [2, 32], strides = [1, 1]} : vector<2x96xf32> to vector<2x32xf32>
    %885 = vector.extract_strided_slice %883 {offsets = [0, 0], sizes = [2, 32], strides = [1, 1]} : vector<2x96xf32> to vector<2x32xf32>
    %886 = arith.addf %884, %885 : vector<2x32xf32>
    %cst_228 = arith.constant 5.000000e-01 : f32
    %887 = vector.broadcast %cst_228 : f32 to vector<2x32xf32>
    %888 = arith.mulf %887, %886 : vector<2x32xf32>
    %889 = math.tanh %888 : vector<2x32xf32>
    %cst_229 = arith.constant 5.000000e-01 : f32
    %890 = vector.broadcast %cst_229 : f32 to vector<2x32xf32>
    %891 = arith.mulf %890, %889 : vector<2x32xf32>
    %cst_230 = arith.constant 5.000000e-01 : f32
    %892 = vector.broadcast %cst_230 : f32 to vector<2x32xf32>
    %893 = arith.addf %891, %892 : vector<2x32xf32>
    %894 = vector.extract_strided_slice %881 {offsets = [0, 32], sizes = [2, 32], strides = [1, 1]} : vector<2x96xf32> to vector<2x32xf32>
    %895 = vector.extract_strided_slice %883 {offsets = [0, 32], sizes = [2, 32], strides = [1, 1]} : vector<2x96xf32> to vector<2x32xf32>
    %896 = arith.addf %894, %895 : vector<2x32xf32>
    %cst_231 = arith.constant 5.000000e-01 : f32
    %897 = vector.broadcast %cst_231 : f32 to vector<2x32xf32>
    %898 = arith.mulf %897, %896 : vector<2x32xf32>
    %899 = math.tanh %898 : vector<2x32xf32>
    %cst_232 = arith.constant 5.000000e-01 : f32
    %900 = vector.broadcast %cst_232 : f32 to vector<2x32xf32>
    %901 = arith.mulf %900, %899 : vector<2x32xf32>
    %cst_233 = arith.constant 5.000000e-01 : f32
    %902 = vector.broadcast %cst_233 : f32 to vector<2x32xf32>
    %903 = arith.addf %901, %902 : vector<2x32xf32>
    %904 = vector.extract_strided_slice %881 {offsets = [0, 64], sizes = [2, 32], strides = [1, 1]} : vector<2x96xf32> to vector<2x32xf32>
    %905 = vector.extract_strided_slice %883 {offsets = [0, 64], sizes = [2, 32], strides = [1, 1]} : vector<2x96xf32> to vector<2x32xf32>
    %906 = arith.mulf %893, %905 : vector<2x32xf32>
    %907 = arith.addf %904, %906 : vector<2x32xf32>
    %908 = math.tanh %907 : vector<2x32xf32>
    %cst_234 = arith.constant 1.000000e+00 : f32
    %909 = vector.broadcast %cst_234 : f32 to vector<2x32xf32>
    %910 = arith.subf %909, %903 : vector<2x32xf32>
    %911 = arith.mulf %910, %908 : vector<2x32xf32>
    %912 = arith.mulf %903, %880 : vector<2x32xf32>
    %913 = arith.addf %911, %912 : vector<2x32xf32>
    %914 = vector.extract_strided_slice %752 {offsets = [0, 0], sizes = [2, 96], strides = [1, 1]} : vector<12x96xf32> to vector<2x96xf32>
    %cst_235 = arith.constant dense<0.000000e+00> : vector<2x96xf32>
    %915 = tpu.matmul %913, %745, %cst_235 {dimension_numbers = #tpu.dot_dimension_numbers<[1], [0], [0], [1], [0, 0, 1, 1], [], []>} : vector<2x32xf32>, vector<32x96xf32>, vector<2x96xf32> -> vector<2x96xf32>
    %916 = arith.addf %915, %749 : vector<2x96xf32>
    %917 = vector.extract_strided_slice %914 {offsets = [0, 0], sizes = [2, 32], strides = [1, 1]} : vector<2x96xf32> to vector<2x32xf32>
    %918 = vector.extract_strided_slice %916 {offsets = [0, 0], sizes = [2, 32], strides = [1, 1]} : vector<2x96xf32> to vector<2x32xf32>
    %919 = arith.addf %917, %918 : vector<2x32xf32>
    %cst_236 = arith.constant 5.000000e-01 : f32
    %920 = vector.broadcast %cst_236 : f32 to vector<2x32xf32>
    %921 = arith.mulf %920, %919 : vector<2x32xf32>
    %922 = math.tanh %921 : vector<2x32xf32>
    %cst_237 = arith.constant 5.000000e-01 : f32
    %923 = vector.broadcast %cst_237 : f32 to vector<2x32xf32>
    %924 = arith.mulf %923, %922 : vector<2x32xf32>
    %cst_238 = arith.constant 5.000000e-01 : f32
    %925 = vector.broadcast %cst_238 : f32 to vector<2x32xf32>
    %926 = arith.addf %924, %925 : vector<2x32xf32>
    %927 = vector.extract_strided_slice %914 {offsets = [0, 32], sizes = [2, 32], strides = [1, 1]} : vector<2x96xf32> to vector<2x32xf32>
    %928 = vector.extract_strided_slice %916 {offsets = [0, 32], sizes = [2, 32], strides = [1, 1]} : vector<2x96xf32> to vector<2x32xf32>
    %929 = arith.addf %927, %928 : vector<2x32xf32>
    %cst_239 = arith.constant 5.000000e-01 : f32
    %930 = vector.broadcast %cst_239 : f32 to vector<2x32xf32>
    %931 = arith.mulf %930, %929 : vector<2x32xf32>
    %932 = math.tanh %931 : vector<2x32xf32>
    %cst_240 = arith.constant 5.000000e-01 : f32
    %933 = vector.broadcast %cst_240 : f32 to vector<2x32xf32>
    %934 = arith.mulf %933, %932 : vector<2x32xf32>
    %cst_241 = arith.constant 5.000000e-01 : f32
    %935 = vector.broadcast %cst_241 : f32 to vector<2x32xf32>
    %936 = arith.addf %934, %935 : vector<2x32xf32>
    %937 = vector.extract_strided_slice %914 {offsets = [0, 64], sizes = [2, 32], strides = [1, 1]} : vector<2x96xf32> to vector<2x32xf32>
    %938 = vector.extract_strided_slice %916 {offsets = [0, 64], sizes = [2, 32], strides = [1, 1]} : vector<2x96xf32> to vector<2x32xf32>
    %939 = arith.mulf %926, %938 : vector<2x32xf32>
    %940 = arith.addf %937, %939 : vector<2x32xf32>
    %941 = math.tanh %940 : vector<2x32xf32>
    %cst_242 = arith.constant 1.000000e+00 : f32
    %942 = vector.broadcast %cst_242 : f32 to vector<2x32xf32>
    %943 = arith.subf %942, %936 : vector<2x32xf32>
    %944 = arith.mulf %943, %941 : vector<2x32xf32>
    %945 = arith.mulf %936, %913 : vector<2x32xf32>
    %946 = arith.addf %944, %945 : vector<2x32xf32>
    %947 = arith.addf %743, %946 : vector<2x32xf32>
    %c224 = arith.constant 224 : index
    %c0_243 = arith.constant 0 : index
    %948 = vector.load %arg2[%c224, %c0_243] : memref<712x128xf32, #tpu.memory_space<vmem>>, vector<32x64xf32>
    %cst_244 = arith.constant dense<0.000000e+00> : vector<2x64xf32>
    %949 = tpu.matmul %540, %948, %cst_244 {dimension_numbers = #tpu.dot_dimension_numbers<[1], [0], [0], [1], [0, 0, 1, 1], [], []>} : vector<2x32xf32>, vector<32x64xf32>, vector<2x64xf32> -> vector<2x64xf32>
    %c256 = arith.constant 256 : index
    %c0_245 = arith.constant 0 : index
    %950 = vector.load %arg2[%c256, %c0_245] : memref<712x128xf32, #tpu.memory_space<vmem>>, vector<32x64xf32>
    %cst_246 = arith.constant dense<0.000000e+00> : vector<2x64xf32>
    %951 = tpu.matmul %947, %950, %cst_246 {dimension_numbers = #tpu.dot_dimension_numbers<[1], [0], [0], [1], [0, 0, 1, 1], [], []>} : vector<2x32xf32>, vector<32x64xf32>, vector<2x64xf32> -> vector<2x64xf32>
    %952 = arith.addf %949, %951 : vector<2x64xf32>
    %c288 = arith.constant 288 : index
    %c0_247 = arith.constant 0 : index
    %953 = vector.load %arg2[%c288, %c0_247] : memref<712x128xf32, #tpu.memory_space<vmem>>, vector<1x64xf32>
    %954 = vector.broadcast %953 : vector<1x64xf32> to vector<2x64xf32>
    %955 = arith.addf %952, %954 : vector<2x64xf32>
    %cst_248 = arith.constant 0.000000e+00 : f32
    %956 = vector.broadcast %cst_248 : f32 to vector<2x64xf32>
    %957 = arith.maximumf %955, %956 : vector<2x64xf32>
    %c296 = arith.constant 296 : index
    %c0_249 = arith.constant 0 : index
    %958 = vector.load %arg2[%c296, %c0_249] : memref<712x128xf32, #tpu.memory_space<vmem>>, vector<64x48xf32>
    %cst_250 = arith.constant dense<0.000000e+00> : vector<2x48xf32>
    %959 = tpu.matmul %957, %958, %cst_250 {dimension_numbers = #tpu.dot_dimension_numbers<[1], [0], [0], [1], [0, 0, 1, 1], [], []>} : vector<2x64xf32>, vector<64x48xf32>, vector<2x48xf32> -> vector<2x48xf32>
    %c360 = arith.constant 360 : index
    %c0_251 = arith.constant 0 : index
    %960 = vector.load %arg2[%c360, %c0_251] : memref<712x128xf32, #tpu.memory_space<vmem>>, vector<1x48xf32>
    %961 = vector.broadcast %960 : vector<1x48xf32> to vector<2x48xf32>
    %962 = arith.addf %959, %961 : vector<2x48xf32>
    %cst_252 = arith.constant 0.000000e+00 : f32
    %963 = vector.broadcast %cst_252 : f32 to vector<2x48xf32>
    %964 = arith.maximumf %962, %963 : vector<2x48xf32>
    %c368 = arith.constant 368 : index
    %c0_253 = arith.constant 0 : index
    %965 = vector.load %arg2[%c368, %c0_253] : memref<712x128xf32, #tpu.memory_space<vmem>>, vector<48x32xf32>
    %cst_254 = arith.constant dense<0.000000e+00> : vector<2x32xf32>
    %966 = tpu.matmul %964, %965, %cst_254 {dimension_numbers = #tpu.dot_dimension_numbers<[1], [0], [0], [1], [0, 0, 1, 1], [], []>} : vector<2x48xf32>, vector<48x32xf32>, vector<2x32xf32> -> vector<2x32xf32>
    %c416 = arith.constant 416 : index
    %c0_255 = arith.constant 0 : index
    %967 = vector.load %arg2[%c416, %c0_255] : memref<712x128xf32, #tpu.memory_space<vmem>>, vector<1x32xf32>
    %968 = vector.broadcast %967 : vector<1x32xf32> to vector<2x32xf32>
    %969 = arith.addf %966, %968 : vector<2x32xf32>
    %c488 = arith.constant 488 : index
    %c0_256 = arith.constant 0 : index
    %970 = vector.load %arg2[%c488, %c0_256] : memref<712x128xf32, #tpu.memory_space<vmem>>, vector<4x96xf32>
    %c496 = arith.constant 496 : index
    %c0_257 = arith.constant 0 : index
    %971 = vector.load %arg2[%c496, %c0_257] : memref<712x128xf32, #tpu.memory_space<vmem>>, vector<32x96xf32>
    %c536 = arith.constant 536 : index
    %c0_258 = arith.constant 0 : index
    %972 = vector.load %arg2[%c536, %c0_258] : memref<712x128xf32, #tpu.memory_space<vmem>>, vector<1x96xf32>
    %973 = vector.shape_cast %972 : vector<1x96xf32> to vector<1x96xf32>
    %974 = vector.broadcast %973 : vector<1x96xf32> to vector<2x96xf32>
    %c424 = arith.constant 424 : index
    %c0_259 = arith.constant 0 : index
    %975 = vector.load %arg2[%c424, %c0_259] : memref<712x128xf32, #tpu.memory_space<vmem>>, vector<32x96xf32>
    %cst_260 = arith.constant dense<0.000000e+00> : vector<2x96xf32>
    %976 = tpu.matmul %540, %975, %cst_260 {dimension_numbers = #tpu.dot_dimension_numbers<[1], [0], [0], [1], [0, 0, 1, 1], [], []>} : vector<2x32xf32>, vector<32x96xf32>, vector<2x96xf32> -> vector<2x96xf32>
    %c456 = arith.constant 456 : index
    %c0_261 = arith.constant 0 : index
    %977 = vector.load %arg2[%c456, %c0_261] : memref<712x128xf32, #tpu.memory_space<vmem>>, vector<32x96xf32>
    %cst_262 = arith.constant dense<0.000000e+00> : vector<2x96xf32>
    %978 = tpu.matmul %969, %977, %cst_262 {dimension_numbers = #tpu.dot_dimension_numbers<[1], [0], [0], [1], [0, 0, 1, 1], [], []>} : vector<2x32xf32>, vector<32x96xf32>, vector<2x96xf32> -> vector<2x96xf32>
    %979 = arith.addf %976, %978 : vector<2x96xf32>
    %c528 = arith.constant 528 : index
    %c0_263 = arith.constant 0 : index
    %980 = vector.load %arg2[%c528, %c0_263] : memref<712x128xf32, #tpu.memory_space<vmem>>, vector<1x96xf32>
    %981 = vector.broadcast %980 : vector<1x96xf32> to vector<2x96xf32>
    %982 = arith.addf %979, %981 : vector<2x96xf32>
    %c544 = arith.constant 544 : index
    %c0_264 = arith.constant 0 : index
    %983 = vector.load %arg2[%c544, %c0_264] : memref<712x128xf32, #tpu.memory_space<vmem>>, vector<32x64xf32>
    %c584 = arith.constant 584 : index
    %c0_265 = arith.constant 0 : index
    %984 = vector.load %arg2[%c584, %c0_265] : memref<712x128xf32, #tpu.memory_space<vmem>>, vector<64x48xf32>
    %c576 = arith.constant 576 : index
    %c0_266 = arith.constant 0 : index
    %985 = vector.load %arg2[%c576, %c0_266] : memref<712x128xf32, #tpu.memory_space<vmem>>, vector<1x64xf32>
    %986 = vector.shape_cast %985 : vector<1x64xf32> to vector<1x64xf32>
    %987 = vector.broadcast %986 : vector<1x64xf32> to vector<2x64xf32>
    %c648 = arith.constant 648 : index
    %c0_267 = arith.constant 0 : index
    %988 = vector.load %arg2[%c648, %c0_267] : memref<712x128xf32, #tpu.memory_space<vmem>>, vector<1x48xf32>
    %989 = vector.shape_cast %988 : vector<1x48xf32> to vector<1x48xf32>
    %990 = vector.broadcast %989 : vector<1x48xf32> to vector<2x48xf32>
    %c656 = arith.constant 656 : index
    %c0_268 = arith.constant 0 : index
    %991 = vector.load %arg2[%c656, %c0_268] : memref<712x128xf32, #tpu.memory_space<vmem>>, vector<48x4xf32>
    %c704 = arith.constant 704 : index
    %c0_269 = arith.constant 0 : index
    %992 = vector.load %arg2[%c704, %c0_269] : memref<712x128xf32, #tpu.memory_space<vmem>>, vector<1x4xf32>
    %993 = vector.shape_cast %992 : vector<1x4xf32> to vector<1x4xf32>
    %994 = vector.broadcast %993 : vector<1x4xf32> to vector<2x4xf32>
    %995 = vector.extract_strided_slice %0 {offsets = [14, 0], sizes = [2, 4], strides = [1, 1]} : vector<16x4xf32> to vector<2x4xf32>
    %cst_270 = arith.constant dense<0.000000e+00> : vector<2x96xf32>
    %996 = tpu.matmul %995, %970, %cst_270 {dimension_numbers = #tpu.dot_dimension_numbers<[1], [0], [0], [1], [0, 0, 1, 1], [], []>} : vector<2x4xf32>, vector<4x96xf32>, vector<2x96xf32> -> vector<2x96xf32>
    %997 = arith.addf %982, %996 : vector<2x96xf32>
    %998 = vector.extract_strided_slice %997 {offsets = [0, 0], sizes = [2, 32], strides = [1, 1]} : vector<2x96xf32> to vector<2x32xf32>
    %999 = vector.extract_strided_slice %974 {offsets = [0, 0], sizes = [2, 32], strides = [1, 1]} : vector<2x96xf32> to vector<2x32xf32>
    %1000 = arith.addf %998, %999 : vector<2x32xf32>
    %cst_271 = arith.constant 5.000000e-01 : f32
    %1001 = vector.broadcast %cst_271 : f32 to vector<2x32xf32>
    %1002 = arith.mulf %1001, %1000 : vector<2x32xf32>
    %1003 = math.tanh %1002 : vector<2x32xf32>
    %cst_272 = arith.constant 5.000000e-01 : f32
    %1004 = vector.broadcast %cst_272 : f32 to vector<2x32xf32>
    %1005 = arith.mulf %1004, %1003 : vector<2x32xf32>
    %cst_273 = arith.constant 5.000000e-01 : f32
    %1006 = vector.broadcast %cst_273 : f32 to vector<2x32xf32>
    %1007 = arith.addf %1005, %1006 : vector<2x32xf32>
    %1008 = vector.extract_strided_slice %997 {offsets = [0, 32], sizes = [2, 32], strides = [1, 1]} : vector<2x96xf32> to vector<2x32xf32>
    %1009 = vector.extract_strided_slice %974 {offsets = [0, 32], sizes = [2, 32], strides = [1, 1]} : vector<2x96xf32> to vector<2x32xf32>
    %1010 = arith.addf %1008, %1009 : vector<2x32xf32>
    %cst_274 = arith.constant 5.000000e-01 : f32
    %1011 = vector.broadcast %cst_274 : f32 to vector<2x32xf32>
    %1012 = arith.mulf %1011, %1010 : vector<2x32xf32>
    %1013 = math.tanh %1012 : vector<2x32xf32>
    %cst_275 = arith.constant 5.000000e-01 : f32
    %1014 = vector.broadcast %cst_275 : f32 to vector<2x32xf32>
    %1015 = arith.mulf %1014, %1013 : vector<2x32xf32>
    %cst_276 = arith.constant 5.000000e-01 : f32
    %1016 = vector.broadcast %cst_276 : f32 to vector<2x32xf32>
    %1017 = arith.addf %1015, %1016 : vector<2x32xf32>
    %1018 = vector.extract_strided_slice %997 {offsets = [0, 64], sizes = [2, 32], strides = [1, 1]} : vector<2x96xf32> to vector<2x32xf32>
    %1019 = vector.extract_strided_slice %974 {offsets = [0, 64], sizes = [2, 32], strides = [1, 1]} : vector<2x96xf32> to vector<2x32xf32>
    %1020 = arith.mulf %1007, %1019 : vector<2x32xf32>
    %1021 = arith.addf %1018, %1020 : vector<2x32xf32>
    %1022 = math.tanh %1021 : vector<2x32xf32>
    %cst_277 = arith.constant 1.000000e+00 : f32
    %1023 = vector.broadcast %cst_277 : f32 to vector<2x32xf32>
    %1024 = arith.subf %1023, %1017 : vector<2x32xf32>
    %1025 = arith.mulf %1024, %1022 : vector<2x32xf32>
    %cst_278 = arith.constant dense<0.000000e+00> : vector<2x64xf32>
    %1026 = tpu.matmul %1025, %983, %cst_278 {dimension_numbers = #tpu.dot_dimension_numbers<[1], [0], [0], [1], [0, 0, 1, 1], [], []>} : vector<2x32xf32>, vector<32x64xf32>, vector<2x64xf32> -> vector<2x64xf32>
    %1027 = arith.addf %1026, %987 : vector<2x64xf32>
    %cst_279 = arith.constant 0.000000e+00 : f32
    %1028 = vector.broadcast %cst_279 : f32 to vector<2x64xf32>
    %1029 = arith.maximumf %1027, %1028 : vector<2x64xf32>
    %cst_280 = arith.constant dense<0.000000e+00> : vector<2x48xf32>
    %1030 = tpu.matmul %1029, %984, %cst_280 {dimension_numbers = #tpu.dot_dimension_numbers<[1], [0], [0], [1], [0, 0, 1, 1], [], []>} : vector<2x64xf32>, vector<64x48xf32>, vector<2x48xf32> -> vector<2x48xf32>
    %1031 = arith.addf %1030, %990 : vector<2x48xf32>
    %cst_281 = arith.constant 0.000000e+00 : f32
    %1032 = vector.broadcast %cst_281 : f32 to vector<2x48xf32>
    %1033 = arith.maximumf %1031, %1032 : vector<2x48xf32>
    %cst_282 = arith.constant dense<0.000000e+00> : vector<2x4xf32>
    %1034 = tpu.matmul %1033, %991, %cst_282 {dimension_numbers = #tpu.dot_dimension_numbers<[1], [0], [0], [1], [0, 0, 1, 1], [], []>} : vector<2x48xf32>, vector<48x4xf32>, vector<2x4xf32> -> vector<2x4xf32>
    %1035 = arith.addf %1034, %994 : vector<2x4xf32>
    %c0_283 = arith.constant 0 : index
    %c0_284 = arith.constant 0 : index
    %c0_285 = arith.constant 0 : index
    %1036 = vector.load %arg3[%c0_283, %c0_284, %c0_285] : memref<6x2x4xf32, #tpu.memory_space<vmem>>, vector<1x2x4xf32>
    %1037 = vector.shape_cast %1036 : vector<1x2x4xf32> to vector<2x4xf32>
    %1038 = vector.shape_cast %1035 : vector<2x4xf32> to vector<1x2x4xf32>
    tpu.vector_store %arg3[%c0_283, %c0_284, %c0_285], %1038 {strides = array<i32>} : memref<6x2x4xf32, #tpu.memory_space<vmem>>, vector<1x2x4xf32>,
    %cst_286 = arith.constant dense<0.000000e+00> : vector<2x96xf32>
    %1039 = tpu.matmul %1035, %970, %cst_286 {dimension_numbers = #tpu.dot_dimension_numbers<[1], [0], [0], [1], [0, 0, 1, 1], [], []>} : vector<2x4xf32>, vector<4x96xf32>, vector<2x96xf32> -> vector<2x96xf32>
    %1040 = arith.addf %982, %1039 : vector<2x96xf32>
    %cst_287 = arith.constant dense<0.000000e+00> : vector<2x96xf32>
    %1041 = tpu.matmul %1025, %971, %cst_287 {dimension_numbers = #tpu.dot_dimension_numbers<[1], [0], [0], [1], [0, 0, 1, 1], [], []>} : vector<2x32xf32>, vector<32x96xf32>, vector<2x96xf32> -> vector<2x96xf32>
    %1042 = arith.addf %1041, %974 : vector<2x96xf32>
    %1043 = vector.extract_strided_slice %1040 {offsets = [0, 0], sizes = [2, 32], strides = [1, 1]} : vector<2x96xf32> to vector<2x32xf32>
    %1044 = vector.extract_strided_slice %1042 {offsets = [0, 0], sizes = [2, 32], strides = [1, 1]} : vector<2x96xf32> to vector<2x32xf32>
    %1045 = arith.addf %1043, %1044 : vector<2x32xf32>
    %cst_288 = arith.constant 5.000000e-01 : f32
    %1046 = vector.broadcast %cst_288 : f32 to vector<2x32xf32>
    %1047 = arith.mulf %1046, %1045 : vector<2x32xf32>
    %1048 = math.tanh %1047 : vector<2x32xf32>
    %cst_289 = arith.constant 5.000000e-01 : f32
    %1049 = vector.broadcast %cst_289 : f32 to vector<2x32xf32>
    %1050 = arith.mulf %1049, %1048 : vector<2x32xf32>
    %cst_290 = arith.constant 5.000000e-01 : f32
    %1051 = vector.broadcast %cst_290 : f32 to vector<2x32xf32>
    %1052 = arith.addf %1050, %1051 : vector<2x32xf32>
    %1053 = vector.extract_strided_slice %1040 {offsets = [0, 32], sizes = [2, 32], strides = [1, 1]} : vector<2x96xf32> to vector<2x32xf32>
    %1054 = vector.extract_strided_slice %1042 {offsets = [0, 32], sizes = [2, 32], strides = [1, 1]} : vector<2x96xf32> to vector<2x32xf32>
    %1055 = arith.addf %1053, %1054 : vector<2x32xf32>
    %cst_291 = arith.constant 5.000000e-01 : f32
    %1056 = vector.broadcast %cst_291 : f32 to vector<2x32xf32>
    %1057 = arith.mulf %1056, %1055 : vector<2x32xf32>
    %1058 = math.tanh %1057 : vector<2x32xf32>
    %cst_292 = arith.constant 5.000000e-01 : f32
    %1059 = vector.broadcast %cst_292 : f32 to vector<2x32xf32>
    %1060 = arith.mulf %1059, %1058 : vector<2x32xf32>
    %cst_293 = arith.constant 5.000000e-01 : f32
    %1061 = vector.broadcast %cst_293 : f32 to vector<2x32xf32>
    %1062 = arith.addf %1060, %1061 : vector<2x32xf32>
    %1063 = vector.extract_strided_slice %1040 {offsets = [0, 64], sizes = [2, 32], strides = [1, 1]} : vector<2x96xf32> to vector<2x32xf32>
    %1064 = vector.extract_strided_slice %1042 {offsets = [0, 64], sizes = [2, 32], strides = [1, 1]} : vector<2x96xf32> to vector<2x32xf32>
    %1065 = arith.mulf %1052, %1064 : vector<2x32xf32>
    %1066 = arith.addf %1063, %1065 : vector<2x32xf32>
    %1067 = math.tanh %1066 : vector<2x32xf32>
    %cst_294 = arith.constant 1.000000e+00 : f32
    %1068 = vector.broadcast %cst_294 : f32 to vector<2x32xf32>
    %1069 = arith.subf %1068, %1062 : vector<2x32xf32>
    %1070 = arith.mulf %1069, %1067 : vector<2x32xf32>
    %1071 = arith.mulf %1062, %1025 : vector<2x32xf32>
    %1072 = arith.addf %1070, %1071 : vector<2x32xf32>
    %cst_295 = arith.constant dense<0.000000e+00> : vector<2x64xf32>
    %1073 = tpu.matmul %1072, %983, %cst_295 {dimension_numbers = #tpu.dot_dimension_numbers<[1], [0], [0], [1], [0, 0, 1, 1], [], []>} : vector<2x32xf32>, vector<32x64xf32>, vector<2x64xf32> -> vector<2x64xf32>
    %1074 = arith.addf %1073, %987 : vector<2x64xf32>
    %cst_296 = arith.constant 0.000000e+00 : f32
    %1075 = vector.broadcast %cst_296 : f32 to vector<2x64xf32>
    %1076 = arith.maximumf %1074, %1075 : vector<2x64xf32>
    %cst_297 = arith.constant dense<0.000000e+00> : vector<2x48xf32>
    %1077 = tpu.matmul %1076, %984, %cst_297 {dimension_numbers = #tpu.dot_dimension_numbers<[1], [0], [0], [1], [0, 0, 1, 1], [], []>} : vector<2x64xf32>, vector<64x48xf32>, vector<2x48xf32> -> vector<2x48xf32>
    %1078 = arith.addf %1077, %990 : vector<2x48xf32>
    %cst_298 = arith.constant 0.000000e+00 : f32
    %1079 = vector.broadcast %cst_298 : f32 to vector<2x48xf32>
    %1080 = arith.maximumf %1078, %1079 : vector<2x48xf32>
    %cst_299 = arith.constant dense<0.000000e+00> : vector<2x4xf32>
    %1081 = tpu.matmul %1080, %991, %cst_299 {dimension_numbers = #tpu.dot_dimension_numbers<[1], [0], [0], [1], [0, 0, 1, 1], [], []>} : vector<2x48xf32>, vector<48x4xf32>, vector<2x4xf32> -> vector<2x4xf32>
    %1082 = arith.addf %1081, %994 : vector<2x4xf32>
    %c1 = arith.constant 1 : index
    %c0_300 = arith.constant 0 : index
    %c0_301 = arith.constant 0 : index
    %1083 = vector.load %arg3[%c1, %c0_300, %c0_301] : memref<6x2x4xf32, #tpu.memory_space<vmem>>, vector<1x2x4xf32>
    %1084 = vector.shape_cast %1083 : vector<1x2x4xf32> to vector<2x4xf32>
    %1085 = vector.shape_cast %1082 : vector<2x4xf32> to vector<1x2x4xf32>
    tpu.vector_store %arg3[%c1, %c0_300, %c0_301], %1085 {strides = array<i32>} : memref<6x2x4xf32, #tpu.memory_space<vmem>>, vector<1x2x4xf32>,
    %cst_302 = arith.constant dense<0.000000e+00> : vector<2x96xf32>
    %1086 = tpu.matmul %1082, %970, %cst_302 {dimension_numbers = #tpu.dot_dimension_numbers<[1], [0], [0], [1], [0, 0, 1, 1], [], []>} : vector<2x4xf32>, vector<4x96xf32>, vector<2x96xf32> -> vector<2x96xf32>
    %1087 = arith.addf %982, %1086 : vector<2x96xf32>
    %cst_303 = arith.constant dense<0.000000e+00> : vector<2x96xf32>
    %1088 = tpu.matmul %1072, %971, %cst_303 {dimension_numbers = #tpu.dot_dimension_numbers<[1], [0], [0], [1], [0, 0, 1, 1], [], []>} : vector<2x32xf32>, vector<32x96xf32>, vector<2x96xf32> -> vector<2x96xf32>
    %1089 = arith.addf %1088, %974 : vector<2x96xf32>
    %1090 = vector.extract_strided_slice %1087 {offsets = [0, 0], sizes = [2, 32], strides = [1, 1]} : vector<2x96xf32> to vector<2x32xf32>
    %1091 = vector.extract_strided_slice %1089 {offsets = [0, 0], sizes = [2, 32], strides = [1, 1]} : vector<2x96xf32> to vector<2x32xf32>
    %1092 = arith.addf %1090, %1091 : vector<2x32xf32>
    %cst_304 = arith.constant 5.000000e-01 : f32
    %1093 = vector.broadcast %cst_304 : f32 to vector<2x32xf32>
    %1094 = arith.mulf %1093, %1092 : vector<2x32xf32>
    %1095 = math.tanh %1094 : vector<2x32xf32>
    %cst_305 = arith.constant 5.000000e-01 : f32
    %1096 = vector.broadcast %cst_305 : f32 to vector<2x32xf32>
    %1097 = arith.mulf %1096, %1095 : vector<2x32xf32>
    %cst_306 = arith.constant 5.000000e-01 : f32
    %1098 = vector.broadcast %cst_306 : f32 to vector<2x32xf32>
    %1099 = arith.addf %1097, %1098 : vector<2x32xf32>
    %1100 = vector.extract_strided_slice %1087 {offsets = [0, 32], sizes = [2, 32], strides = [1, 1]} : vector<2x96xf32> to vector<2x32xf32>
    %1101 = vector.extract_strided_slice %1089 {offsets = [0, 32], sizes = [2, 32], strides = [1, 1]} : vector<2x96xf32> to vector<2x32xf32>
    %1102 = arith.addf %1100, %1101 : vector<2x32xf32>
    %cst_307 = arith.constant 5.000000e-01 : f32
    %1103 = vector.broadcast %cst_307 : f32 to vector<2x32xf32>
    %1104 = arith.mulf %1103, %1102 : vector<2x32xf32>
    %1105 = math.tanh %1104 : vector<2x32xf32>
    %cst_308 = arith.constant 5.000000e-01 : f32
    %1106 = vector.broadcast %cst_308 : f32 to vector<2x32xf32>
    %1107 = arith.mulf %1106, %1105 : vector<2x32xf32>
    %cst_309 = arith.constant 5.000000e-01 : f32
    %1108 = vector.broadcast %cst_309 : f32 to vector<2x32xf32>
    %1109 = arith.addf %1107, %1108 : vector<2x32xf32>
    %1110 = vector.extract_strided_slice %1087 {offsets = [0, 64], sizes = [2, 32], strides = [1, 1]} : vector<2x96xf32> to vector<2x32xf32>
    %1111 = vector.extract_strided_slice %1089 {offsets = [0, 64], sizes = [2, 32], strides = [1, 1]} : vector<2x96xf32> to vector<2x32xf32>
    %1112 = arith.mulf %1099, %1111 : vector<2x32xf32>
    %1113 = arith.addf %1110, %1112 : vector<2x32xf32>
    %1114 = math.tanh %1113 : vector<2x32xf32>
    %cst_310 = arith.constant 1.000000e+00 : f32
    %1115 = vector.broadcast %cst_310 : f32 to vector<2x32xf32>
    %1116 = arith.subf %1115, %1109 : vector<2x32xf32>
    %1117 = arith.mulf %1116, %1114 : vector<2x32xf32>
    %1118 = arith.mulf %1109, %1072 : vector<2x32xf32>
    %1119 = arith.addf %1117, %1118 : vector<2x32xf32>
    %cst_311 = arith.constant dense<0.000000e+00> : vector<2x64xf32>
    %1120 = tpu.matmul %1119, %983, %cst_311 {dimension_numbers = #tpu.dot_dimension_numbers<[1], [0], [0], [1], [0, 0, 1, 1], [], []>} : vector<2x32xf32>, vector<32x64xf32>, vector<2x64xf32> -> vector<2x64xf32>
    %1121 = arith.addf %1120, %987 : vector<2x64xf32>
    %cst_312 = arith.constant 0.000000e+00 : f32
    %1122 = vector.broadcast %cst_312 : f32 to vector<2x64xf32>
    %1123 = arith.maximumf %1121, %1122 : vector<2x64xf32>
    %cst_313 = arith.constant dense<0.000000e+00> : vector<2x48xf32>
    %1124 = tpu.matmul %1123, %984, %cst_313 {dimension_numbers = #tpu.dot_dimension_numbers<[1], [0], [0], [1], [0, 0, 1, 1], [], []>} : vector<2x64xf32>, vector<64x48xf32>, vector<2x48xf32> -> vector<2x48xf32>
    %1125 = arith.addf %1124, %990 : vector<2x48xf32>
    %cst_314 = arith.constant 0.000000e+00 : f32
    %1126 = vector.broadcast %cst_314 : f32 to vector<2x48xf32>
    %1127 = arith.maximumf %1125, %1126 : vector<2x48xf32>
    %cst_315 = arith.constant dense<0.000000e+00> : vector<2x4xf32>
    %1128 = tpu.matmul %1127, %991, %cst_315 {dimension_numbers = #tpu.dot_dimension_numbers<[1], [0], [0], [1], [0, 0, 1, 1], [], []>} : vector<2x48xf32>, vector<48x4xf32>, vector<2x4xf32> -> vector<2x4xf32>
    %1129 = arith.addf %1128, %994 : vector<2x4xf32>
    %c2 = arith.constant 2 : index
    %c0_316 = arith.constant 0 : index
    %c0_317 = arith.constant 0 : index
    %1130 = vector.load %arg3[%c2, %c0_316, %c0_317] : memref<6x2x4xf32, #tpu.memory_space<vmem>>, vector<1x2x4xf32>
    %1131 = vector.shape_cast %1130 : vector<1x2x4xf32> to vector<2x4xf32>
    %1132 = vector.shape_cast %1129 : vector<2x4xf32> to vector<1x2x4xf32>
    tpu.vector_store %arg3[%c2, %c0_316, %c0_317], %1132 {strides = array<i32>} : memref<6x2x4xf32, #tpu.memory_space<vmem>>, vector<1x2x4xf32>,
    %cst_318 = arith.constant dense<0.000000e+00> : vector<2x96xf32>
    %1133 = tpu.matmul %1129, %970, %cst_318 {dimension_numbers = #tpu.dot_dimension_numbers<[1], [0], [0], [1], [0, 0, 1, 1], [], []>} : vector<2x4xf32>, vector<4x96xf32>, vector<2x96xf32> -> vector<2x96xf32>
    %1134 = arith.addf %982, %1133 : vector<2x96xf32>
    %cst_319 = arith.constant dense<0.000000e+00> : vector<2x96xf32>
    %1135 = tpu.matmul %1119, %971, %cst_319 {dimension_numbers = #tpu.dot_dimension_numbers<[1], [0], [0], [1], [0, 0, 1, 1], [], []>} : vector<2x32xf32>, vector<32x96xf32>, vector<2x96xf32> -> vector<2x96xf32>
    %1136 = arith.addf %1135, %974 : vector<2x96xf32>
    %1137 = vector.extract_strided_slice %1134 {offsets = [0, 0], sizes = [2, 32], strides = [1, 1]} : vector<2x96xf32> to vector<2x32xf32>
    %1138 = vector.extract_strided_slice %1136 {offsets = [0, 0], sizes = [2, 32], strides = [1, 1]} : vector<2x96xf32> to vector<2x32xf32>
    %1139 = arith.addf %1137, %1138 : vector<2x32xf32>
    %cst_320 = arith.constant 5.000000e-01 : f32
    %1140 = vector.broadcast %cst_320 : f32 to vector<2x32xf32>
    %1141 = arith.mulf %1140, %1139 : vector<2x32xf32>
    %1142 = math.tanh %1141 : vector<2x32xf32>
    %cst_321 = arith.constant 5.000000e-01 : f32
    %1143 = vector.broadcast %cst_321 : f32 to vector<2x32xf32>
    %1144 = arith.mulf %1143, %1142 : vector<2x32xf32>
    %cst_322 = arith.constant 5.000000e-01 : f32
    %1145 = vector.broadcast %cst_322 : f32 to vector<2x32xf32>
    %1146 = arith.addf %1144, %1145 : vector<2x32xf32>
    %1147 = vector.extract_strided_slice %1134 {offsets = [0, 32], sizes = [2, 32], strides = [1, 1]} : vector<2x96xf32> to vector<2x32xf32>
    %1148 = vector.extract_strided_slice %1136 {offsets = [0, 32], sizes = [2, 32], strides = [1, 1]} : vector<2x96xf32> to vector<2x32xf32>
    %1149 = arith.addf %1147, %1148 : vector<2x32xf32>
    %cst_323 = arith.constant 5.000000e-01 : f32
    %1150 = vector.broadcast %cst_323 : f32 to vector<2x32xf32>
    %1151 = arith.mulf %1150, %1149 : vector<2x32xf32>
    %1152 = math.tanh %1151 : vector<2x32xf32>
    %cst_324 = arith.constant 5.000000e-01 : f32
    %1153 = vector.broadcast %cst_324 : f32 to vector<2x32xf32>
    %1154 = arith.mulf %1153, %1152 : vector<2x32xf32>
    %cst_325 = arith.constant 5.000000e-01 : f32
    %1155 = vector.broadcast %cst_325 : f32 to vector<2x32xf32>
    %1156 = arith.addf %1154, %1155 : vector<2x32xf32>
    %1157 = vector.extract_strided_slice %1134 {offsets = [0, 64], sizes = [2, 32], strides = [1, 1]} : vector<2x96xf32> to vector<2x32xf32>
    %1158 = vector.extract_strided_slice %1136 {offsets = [0, 64], sizes = [2, 32], strides = [1, 1]} : vector<2x96xf32> to vector<2x32xf32>
    %1159 = arith.mulf %1146, %1158 : vector<2x32xf32>
    %1160 = arith.addf %1157, %1159 : vector<2x32xf32>
    %1161 = math.tanh %1160 : vector<2x32xf32>
    %cst_326 = arith.constant 1.000000e+00 : f32
    %1162 = vector.broadcast %cst_326 : f32 to vector<2x32xf32>
    %1163 = arith.subf %1162, %1156 : vector<2x32xf32>
    %1164 = arith.mulf %1163, %1161 : vector<2x32xf32>
    %1165 = arith.mulf %1156, %1119 : vector<2x32xf32>
    %1166 = arith.addf %1164, %1165 : vector<2x32xf32>
    %cst_327 = arith.constant dense<0.000000e+00> : vector<2x64xf32>
    %1167 = tpu.matmul %1166, %983, %cst_327 {dimension_numbers = #tpu.dot_dimension_numbers<[1], [0], [0], [1], [0, 0, 1, 1], [], []>} : vector<2x32xf32>, vector<32x64xf32>, vector<2x64xf32> -> vector<2x64xf32>
    %1168 = arith.addf %1167, %987 : vector<2x64xf32>
    %cst_328 = arith.constant 0.000000e+00 : f32
    %1169 = vector.broadcast %cst_328 : f32 to vector<2x64xf32>
    %1170 = arith.maximumf %1168, %1169 : vector<2x64xf32>
    %cst_329 = arith.constant dense<0.000000e+00> : vector<2x48xf32>
    %1171 = tpu.matmul %1170, %984, %cst_329 {dimension_numbers = #tpu.dot_dimension_numbers<[1], [0], [0], [1], [0, 0, 1, 1], [], []>} : vector<2x64xf32>, vector<64x48xf32>, vector<2x48xf32> -> vector<2x48xf32>
    %1172 = arith.addf %1171, %990 : vector<2x48xf32>
    %cst_330 = arith.constant 0.000000e+00 : f32
    %1173 = vector.broadcast %cst_330 : f32 to vector<2x48xf32>
    %1174 = arith.maximumf %1172, %1173 : vector<2x48xf32>
    %cst_331 = arith.constant dense<0.000000e+00> : vector<2x4xf32>
    %1175 = tpu.matmul %1174, %991, %cst_331 {dimension_numbers = #tpu.dot_dimension_numbers<[1], [0], [0], [1], [0, 0, 1, 1], [], []>} : vector<2x48xf32>, vector<48x4xf32>, vector<2x4xf32> -> vector<2x4xf32>
    %1176 = arith.addf %1175, %994 : vector<2x4xf32>
    %c3 = arith.constant 3 : index
    %c0_332 = arith.constant 0 : index
    %c0_333 = arith.constant 0 : index
    %1177 = vector.load %arg3[%c3, %c0_332, %c0_333] : memref<6x2x4xf32, #tpu.memory_space<vmem>>, vector<1x2x4xf32>
    %1178 = vector.shape_cast %1177 : vector<1x2x4xf32> to vector<2x4xf32>
    %1179 = vector.shape_cast %1176 : vector<2x4xf32> to vector<1x2x4xf32>
    tpu.vector_store %arg3[%c3, %c0_332, %c0_333], %1179 {strides = array<i32>} : memref<6x2x4xf32, #tpu.memory_space<vmem>>, vector<1x2x4xf32>,
    %cst_334 = arith.constant dense<0.000000e+00> : vector<2x96xf32>
    %1180 = tpu.matmul %1176, %970, %cst_334 {dimension_numbers = #tpu.dot_dimension_numbers<[1], [0], [0], [1], [0, 0, 1, 1], [], []>} : vector<2x4xf32>, vector<4x96xf32>, vector<2x96xf32> -> vector<2x96xf32>
    %1181 = arith.addf %982, %1180 : vector<2x96xf32>
    %cst_335 = arith.constant dense<0.000000e+00> : vector<2x96xf32>
    %1182 = tpu.matmul %1166, %971, %cst_335 {dimension_numbers = #tpu.dot_dimension_numbers<[1], [0], [0], [1], [0, 0, 1, 1], [], []>} : vector<2x32xf32>, vector<32x96xf32>, vector<2x96xf32> -> vector<2x96xf32>
    %1183 = arith.addf %1182, %974 : vector<2x96xf32>
    %1184 = vector.extract_strided_slice %1181 {offsets = [0, 0], sizes = [2, 32], strides = [1, 1]} : vector<2x96xf32> to vector<2x32xf32>
    %1185 = vector.extract_strided_slice %1183 {offsets = [0, 0], sizes = [2, 32], strides = [1, 1]} : vector<2x96xf32> to vector<2x32xf32>
    %1186 = arith.addf %1184, %1185 : vector<2x32xf32>
    %cst_336 = arith.constant 5.000000e-01 : f32
    %1187 = vector.broadcast %cst_336 : f32 to vector<2x32xf32>
    %1188 = arith.mulf %1187, %1186 : vector<2x32xf32>
    %1189 = math.tanh %1188 : vector<2x32xf32>
    %cst_337 = arith.constant 5.000000e-01 : f32
    %1190 = vector.broadcast %cst_337 : f32 to vector<2x32xf32>
    %1191 = arith.mulf %1190, %1189 : vector<2x32xf32>
    %cst_338 = arith.constant 5.000000e-01 : f32
    %1192 = vector.broadcast %cst_338 : f32 to vector<2x32xf32>
    %1193 = arith.addf %1191, %1192 : vector<2x32xf32>
    %1194 = vector.extract_strided_slice %1181 {offsets = [0, 32], sizes = [2, 32], strides = [1, 1]} : vector<2x96xf32> to vector<2x32xf32>
    %1195 = vector.extract_strided_slice %1183 {offsets = [0, 32], sizes = [2, 32], strides = [1, 1]} : vector<2x96xf32> to vector<2x32xf32>
    %1196 = arith.addf %1194, %1195 : vector<2x32xf32>
    %cst_339 = arith.constant 5.000000e-01 : f32
    %1197 = vector.broadcast %cst_339 : f32 to vector<2x32xf32>
    %1198 = arith.mulf %1197, %1196 : vector<2x32xf32>
    %1199 = math.tanh %1198 : vector<2x32xf32>
    %cst_340 = arith.constant 5.000000e-01 : f32
    %1200 = vector.broadcast %cst_340 : f32 to vector<2x32xf32>
    %1201 = arith.mulf %1200, %1199 : vector<2x32xf32>
    %cst_341 = arith.constant 5.000000e-01 : f32
    %1202 = vector.broadcast %cst_341 : f32 to vector<2x32xf32>
    %1203 = arith.addf %1201, %1202 : vector<2x32xf32>
    %1204 = vector.extract_strided_slice %1181 {offsets = [0, 64], sizes = [2, 32], strides = [1, 1]} : vector<2x96xf32> to vector<2x32xf32>
    %1205 = vector.extract_strided_slice %1183 {offsets = [0, 64], sizes = [2, 32], strides = [1, 1]} : vector<2x96xf32> to vector<2x32xf32>
    %1206 = arith.mulf %1193, %1205 : vector<2x32xf32>
    %1207 = arith.addf %1204, %1206 : vector<2x32xf32>
    %1208 = math.tanh %1207 : vector<2x32xf32>
    %cst_342 = arith.constant 1.000000e+00 : f32
    %1209 = vector.broadcast %cst_342 : f32 to vector<2x32xf32>
    %1210 = arith.subf %1209, %1203 : vector<2x32xf32>
    %1211 = arith.mulf %1210, %1208 : vector<2x32xf32>
    %1212 = arith.mulf %1203, %1166 : vector<2x32xf32>
    %1213 = arith.addf %1211, %1212 : vector<2x32xf32>
    %cst_343 = arith.constant dense<0.000000e+00> : vector<2x64xf32>
    %1214 = tpu.matmul %1213, %983, %cst_343 {dimension_numbers = #tpu.dot_dimension_numbers<[1], [0], [0], [1], [0, 0, 1, 1], [], []>} : vector<2x32xf32>, vector<32x64xf32>, vector<2x64xf32> -> vector<2x64xf32>
    %1215 = arith.addf %1214, %987 : vector<2x64xf32>
    %cst_344 = arith.constant 0.000000e+00 : f32
    %1216 = vector.broadcast %cst_344 : f32 to vector<2x64xf32>
    %1217 = arith.maximumf %1215, %1216 : vector<2x64xf32>
    %cst_345 = arith.constant dense<0.000000e+00> : vector<2x48xf32>
    %1218 = tpu.matmul %1217, %984, %cst_345 {dimension_numbers = #tpu.dot_dimension_numbers<[1], [0], [0], [1], [0, 0, 1, 1], [], []>} : vector<2x64xf32>, vector<64x48xf32>, vector<2x48xf32> -> vector<2x48xf32>
    %1219 = arith.addf %1218, %990 : vector<2x48xf32>
    %cst_346 = arith.constant 0.000000e+00 : f32
    %1220 = vector.broadcast %cst_346 : f32 to vector<2x48xf32>
    %1221 = arith.maximumf %1219, %1220 : vector<2x48xf32>
    %cst_347 = arith.constant dense<0.000000e+00> : vector<2x4xf32>
    %1222 = tpu.matmul %1221, %991, %cst_347 {dimension_numbers = #tpu.dot_dimension_numbers<[1], [0], [0], [1], [0, 0, 1, 1], [], []>} : vector<2x48xf32>, vector<48x4xf32>, vector<2x4xf32> -> vector<2x4xf32>
    %1223 = arith.addf %1222, %994 : vector<2x4xf32>
    %c4 = arith.constant 4 : index
    %c0_348 = arith.constant 0 : index
    %c0_349 = arith.constant 0 : index
    %1224 = vector.load %arg3[%c4, %c0_348, %c0_349] : memref<6x2x4xf32, #tpu.memory_space<vmem>>, vector<1x2x4xf32>
    %1225 = vector.shape_cast %1224 : vector<1x2x4xf32> to vector<2x4xf32>
    %1226 = vector.shape_cast %1223 : vector<2x4xf32> to vector<1x2x4xf32>
    tpu.vector_store %arg3[%c4, %c0_348, %c0_349], %1226 {strides = array<i32>} : memref<6x2x4xf32, #tpu.memory_space<vmem>>, vector<1x2x4xf32>,
    %cst_350 = arith.constant dense<0.000000e+00> : vector<2x96xf32>
    %1227 = tpu.matmul %1223, %970, %cst_350 {dimension_numbers = #tpu.dot_dimension_numbers<[1], [0], [0], [1], [0, 0, 1, 1], [], []>} : vector<2x4xf32>, vector<4x96xf32>, vector<2x96xf32> -> vector<2x96xf32>
    %1228 = arith.addf %982, %1227 : vector<2x96xf32>
    %cst_351 = arith.constant dense<0.000000e+00> : vector<2x96xf32>
    %1229 = tpu.matmul %1213, %971, %cst_351 {dimension_numbers = #tpu.dot_dimension_numbers<[1], [0], [0], [1], [0, 0, 1, 1], [], []>} : vector<2x32xf32>, vector<32x96xf32>, vector<2x96xf32> -> vector<2x96xf32>
    %1230 = arith.addf %1229, %974 : vector<2x96xf32>
    %1231 = vector.extract_strided_slice %1228 {offsets = [0, 0], sizes = [2, 32], strides = [1, 1]} : vector<2x96xf32> to vector<2x32xf32>
    %1232 = vector.extract_strided_slice %1230 {offsets = [0, 0], sizes = [2, 32], strides = [1, 1]} : vector<2x96xf32> to vector<2x32xf32>
    %1233 = arith.addf %1231, %1232 : vector<2x32xf32>
    %cst_352 = arith.constant 5.000000e-01 : f32
    %1234 = vector.broadcast %cst_352 : f32 to vector<2x32xf32>
    %1235 = arith.mulf %1234, %1233 : vector<2x32xf32>
    %1236 = math.tanh %1235 : vector<2x32xf32>
    %cst_353 = arith.constant 5.000000e-01 : f32
    %1237 = vector.broadcast %cst_353 : f32 to vector<2x32xf32>
    %1238 = arith.mulf %1237, %1236 : vector<2x32xf32>
    %cst_354 = arith.constant 5.000000e-01 : f32
    %1239 = vector.broadcast %cst_354 : f32 to vector<2x32xf32>
    %1240 = arith.addf %1238, %1239 : vector<2x32xf32>
    %1241 = vector.extract_strided_slice %1228 {offsets = [0, 32], sizes = [2, 32], strides = [1, 1]} : vector<2x96xf32> to vector<2x32xf32>
    %1242 = vector.extract_strided_slice %1230 {offsets = [0, 32], sizes = [2, 32], strides = [1, 1]} : vector<2x96xf32> to vector<2x32xf32>
    %1243 = arith.addf %1241, %1242 : vector<2x32xf32>
    %cst_355 = arith.constant 5.000000e-01 : f32
    %1244 = vector.broadcast %cst_355 : f32 to vector<2x32xf32>
    %1245 = arith.mulf %1244, %1243 : vector<2x32xf32>
    %1246 = math.tanh %1245 : vector<2x32xf32>
    %cst_356 = arith.constant 5.000000e-01 : f32
    %1247 = vector.broadcast %cst_356 : f32 to vector<2x32xf32>
    %1248 = arith.mulf %1247, %1246 : vector<2x32xf32>
    %cst_357 = arith.constant 5.000000e-01 : f32
    %1249 = vector.broadcast %cst_357 : f32 to vector<2x32xf32>
    %1250 = arith.addf %1248, %1249 : vector<2x32xf32>
    %1251 = vector.extract_strided_slice %1228 {offsets = [0, 64], sizes = [2, 32], strides = [1, 1]} : vector<2x96xf32> to vector<2x32xf32>
    %1252 = vector.extract_strided_slice %1230 {offsets = [0, 64], sizes = [2, 32], strides = [1, 1]} : vector<2x96xf32> to vector<2x32xf32>
    %1253 = arith.mulf %1240, %1252 : vector<2x32xf32>
    %1254 = arith.addf %1251, %1253 : vector<2x32xf32>
    %1255 = math.tanh %1254 : vector<2x32xf32>
    %cst_358 = arith.constant 1.000000e+00 : f32
    %1256 = vector.broadcast %cst_358 : f32 to vector<2x32xf32>
    %1257 = arith.subf %1256, %1250 : vector<2x32xf32>
    %1258 = arith.mulf %1257, %1255 : vector<2x32xf32>
    %1259 = arith.mulf %1250, %1213 : vector<2x32xf32>
    %1260 = arith.addf %1258, %1259 : vector<2x32xf32>
    %cst_359 = arith.constant dense<0.000000e+00> : vector<2x64xf32>
    %1261 = tpu.matmul %1260, %983, %cst_359 {dimension_numbers = #tpu.dot_dimension_numbers<[1], [0], [0], [1], [0, 0, 1, 1], [], []>} : vector<2x32xf32>, vector<32x64xf32>, vector<2x64xf32> -> vector<2x64xf32>
    %1262 = arith.addf %1261, %987 : vector<2x64xf32>
    %cst_360 = arith.constant 0.000000e+00 : f32
    %1263 = vector.broadcast %cst_360 : f32 to vector<2x64xf32>
    %1264 = arith.maximumf %1262, %1263 : vector<2x64xf32>
    %cst_361 = arith.constant dense<0.000000e+00> : vector<2x48xf32>
    %1265 = tpu.matmul %1264, %984, %cst_361 {dimension_numbers = #tpu.dot_dimension_numbers<[1], [0], [0], [1], [0, 0, 1, 1], [], []>} : vector<2x64xf32>, vector<64x48xf32>, vector<2x48xf32> -> vector<2x48xf32>
    %1266 = arith.addf %1265, %990 : vector<2x48xf32>
    %cst_362 = arith.constant 0.000000e+00 : f32
    %1267 = vector.broadcast %cst_362 : f32 to vector<2x48xf32>
    %1268 = arith.maximumf %1266, %1267 : vector<2x48xf32>
    %cst_363 = arith.constant dense<0.000000e+00> : vector<2x4xf32>
    %1269 = tpu.matmul %1268, %991, %cst_363 {dimension_numbers = #tpu.dot_dimension_numbers<[1], [0], [0], [1], [0, 0, 1, 1], [], []>} : vector<2x48xf32>, vector<48x4xf32>, vector<2x4xf32> -> vector<2x4xf32>
    %1270 = arith.addf %1269, %994 : vector<2x4xf32>
    %c5 = arith.constant 5 : index
    %c0_364 = arith.constant 0 : index
    %c0_365 = arith.constant 0 : index
    %1271 = vector.load %arg3[%c5, %c0_364, %c0_365] : memref<6x2x4xf32, #tpu.memory_space<vmem>>, vector<1x2x4xf32>
    %1272 = vector.shape_cast %1271 : vector<1x2x4xf32> to vector<2x4xf32>
    %1273 = vector.shape_cast %1270 : vector<2x4xf32> to vector<1x2x4xf32>
    tpu.vector_store %arg3[%c5, %c0_364, %c0_365], %1273 {strides = array<i32>} : memref<6x2x4xf32, #tpu.memory_space<vmem>>, vector<1x2x4xf32>,
    return
  }
}

</mosaic_0001>

<bundles_post_ra>
// kernel: gru_autoencoder_forward.1
= control target key start
LH: loop header
LB: loop body
LE: loop exit
PB: predicated region body
PF: predicated region fallthrough
CT: control target
= control target key end

     0   :  { %8 = vsyncpa [#allocation3], 0  ;;  %s7519_s12 = smov [#allocation2]   ;;  %s8469_s0 = inlined_call_operand.vmem [shape: f32[16,4], index: 0, kind: input, shape index: {}]   ;;  %s8470_s1 = inlined_call_operand.vmem [shape: f32[12,4], index: 1, kind: input, shape index: {}]   ;;  %s8471_s2 = inlined_call_operand.hbm [shape: f32[712,128], index: 2, kind: input, shape index: {}]   ;;  %s8472_s3 = inlined_call_operand.vmem [shape: f32[6,2,4], index: 3, kind: output, shape index: {}]  }
   0x1   :  { %s18_s13 = sshll.u32 %s7519_s12, 4  ;;  %s7495_s16 = scalar_lea.hbm %s8471_s2, 11392  ;;  %s19_s13 = int_to_ptr.vmem [resolvable:$true] %s18_s13 }
   0x2   :  { %p7496_p0 = scmp.ne.s32.totalorder %s8471_s2, %s7495_s16  ;;  %p7499_p1 = scmp.lt.u32.totalorder %s7495_s16, %s8471_s2 }
   0x4   :  { %p7501_p2 = pnand %p7499_p1, %p7496_p0 }
   0x6   :  { %7504 = shalt.err (!%p7501_p2)
}
   0x7   :  { %s7505_s21 = scalar_lea.vmem %s19_s13, 11392  ;;  %p7510_p4 = scmp.lt.s32.totalorder %s19_s13, %s19_s13 }
   0x8   :  { %p7506_p3 = scmp.ne.s32.totalorder %s19_s13, %s7505_s21  ;;  %p7511_p5 = scmp.lt.s32.totalorder %s7505_s21, %s7505_s21 }
   0xa   :  { %p7512_p6 = por %p7511_p5, %p7510_p4 }
   0xc   :  { %p7513_p7 = pnand %p7512_p6, %p7506_p3 }
   0xe   :  { %7516 = shalt.err (!%p7513_p7)
}
   0xf   :  { %s7520_s22 = smov 128   ;;  %s7521_s23 = smov 8  }
  0x10   :  { %24 = dma.hbm_to_vmem [thread:$0]  %s8471_s2, 11392, %s19_s13, [#allocation3], %s7520_s22, %s7520_s22, %s7521_s23  }
  0x11   :  { %7517 = dma.done.wait [#allocation3], 11392  }
  0x12   :  { %7518 = vsyncadd [#allocation3], 4294955904  ;;  %vm54_vm0 = vcmask 1043456   ;;  %vm47_vm1 = vcmask 31744   ;;  %v32_v0 = vld [vmem:[#allocation2] sm:$0xf] }
  0x13   :  { %v7562_v1 = vld [vmem:[%s8469_s0] sm:$0xff]  ;;  %v7567_v2 = vld [vmem:[%s8469_s0 + $0x8] sm:$0xff]  ;;  %6250 = vmatprep.subr.msk.mxu0 %vm54_vm0, %v32_v0  ;;  %v7572_v3 = vld [vmem:[#allocation2 + $0x30] ss:$0 sm:$0xff]  ;;  %s7522_s2 = smov 64   ;;  %v7523_v21 = vmov 0.0|0.0  }
  0x14   :  { %6252 = vmatprep.mubr.msk.f32.mxu0 %vm47_vm1, %v7562_v1  ;;  %6251 = vmatpush3.msk.msra.mxu0 %vm54_vm0, %v32_v0  ;;  %v5822_v4 = vld [vmem:[#allocation2 + $0x28] ss:$0 sm:$0xff]  ;;  %v34_v19 = vld [vmem:[#allocation2 + $0x10] sm:$0xff]  ;;  %v35_v20 = vld [vmem:[#allocation2 + $0x18] sm:$0xff]  ;;  %vm7524_vm2 = vmmov 0   ;;  %v7525_v24 = vmov 0.0  }
  0x15   :  { %139 = vrot.lane.b32.xlu0 %v7572_v3, %s7522_s2  ;;  %6253 = vmatmul.mubr.msk.f32.vlgmr.msra.gmra.mrb[0].mxu0 %vm47_vm1, %v7567_v2  ;;  %v33_v18 = vld [vmem:[#allocation2 + $0x8] sm:$0xff]  ;;  %v36_v23 = vld [vmem:[#allocation2 + $0x20] sm:$0xff]  ;;  %s7526_s30 = smov 96   ;;  %vm158_vm3 = vcmask 261120   ;;  %vm3167_vm4 = vcmask 523264   ;;  %vm3253_vm5 = vcmask 392192  }
  0x16   :  { %6967 = vmatprep.subr.bf16.mxu1 %v7523_v21  ;;  %v7588_v22 = vpack.c.bf16 %v34_v19, %v33_v18  ;;  %6263 = vmatprep.mubr.msk.f32.mxu1 %vm7524_vm2, %v7525_v24  ;;  %v7596_v25 = vpack.c.bf16 %v36_v23, %v35_v20  ;;  %vm3849_vm6 = vcmask 25600  }
  0x17   :  { %6973 = vmatprep.subr.bf16.mxu0 %v7523_v21  ;;  %6274 = vmatprep.mubr.msk.f32.mxu0 %vm7524_vm2, %v7525_v24 }
  0x18   :  { %6969 = vmatpush3.bf16.msra.mxu1 %v7588_v22  ;;  %6975 = vmatpush3.bf16.msra.mxu0 %v7588_v22 }
  0x19   :  { %6970 = vmatprep.subr.bf16.mxu1 %v7523_v21  ;;  %6976 = vmatprep.subr.bf16.mxu0 %v7523_v21 }
  0x1c   :  { %6972 = vmatpush3.bf16.msra.mxu1 %v7596_v25  ;;  %6978 = vmatpush3.bf16.msra.mxu0 %v7596_v25 }
  0x1d   :  { %6979 = vmatprep.subr.bf16.mxu1 %v7523_v21  ;;  %6985 = vmatprep.subr.bf16.mxu0 %v7523_v21 }
  0x87   :  { %v140_v13 = vpop.permute.xlu0 %139 }
  0xe8   :  { %v6254_v5 = vpop.f32.mrb[0].mxu0 }
  0xe9   :  { %v7579_v6 = vadd.f32 %v6254_v5, %v5822_v4  ;;  %v124_v7 = vpop.f32.mrb[1].mxu0 }
  0xea   :  { %v7581_v8 = vadd.f32 %v5822_v4, %v124_v7 }
  0xec   :  { %v133_v9 = vadd.f32 %v7572_v3, %v7581_v8 }
  0xee   :  { %v134_v10 = vmul.f32 0.5, %v133_v9 }
  0xf0   :  { %7356 = vtanh.f32 %v134_v10 }
  0xfa   :  { %v7357_v11 = vpop.eup %7356 }
  0xfb   :  { %v136_v12 = vmul.f32 0.5, %v7357_v11 }
  0xfd   :  { %v137_v14 = vadd.f32 0.5, %v136_v12 }
  0xff   :  { %v142_v15 = vmul.f32 %v140_v13, %v137_v14  ;;  %v149_v27 = vsub.f32 1.0, %v137_v14 }
 0x101   :  { %144 = vrot.lane.b32.xlu0 %v142_v15, %s7522_s2 }
 0x173   :  { %v145_v16 = vpop.permute.xlu0 %144 }
 0x174   :  { %v147_v17 = vadd.f32 %v145_v16, %v7581_v8 }
 0x176   :  { %7358 = vtanh.f32 %v147_v17 }
 0x180   :  { %v7359_v26 = vpop.eup %7358 }
 0x181   :  { %151 = vrot.lane.b32.xlu1 %v7359_v26, %s7526_s30 }
 0x1f3   :  { %v152_v28 = vpop.permute.xlu1 %151 }
 0x1f4   :  { %v154_v29 = vmul.f32 %v152_v28, %v149_v27 }
 0x1f6   :  { %156 = vrot.lane.b32.xlu1 %v154_v29, %s7526_s30  ;;  %v255_v45 = vrot.slane %v154_v29, 6 }
 0x268   :  { %v157_v30 = vpop.permute.xlu1 %156 }
 0x269   :  { %6264 = vmatmul.mubr.msk.f32.vlgmr.msra.gmra.mrb[0].mxu1 %vm158_vm3, %v157_v30 }
 0x26a   :  { %6981 = vmatpush3.bf16.msra.mxu1 %v7588_v22  ;;  %6285 = vmatprep.mubr.msk.f32.mxu1 %vm7524_vm2, %v7525_v24 }
 0x26b   :  { %6982 = vmatprep.subr.bf16.mxu1 %v7523_v21 }
 0x26e   :  { %6984 = vmatpush3.bf16.msra.mxu1 %v7596_v25 }
 0x26f   :  { %6991 = vmatprep.subr.bf16.mxu1 %v7523_v21 }
 0x33c   :  { %v227_v31 = vpop.f32.mrb[0].mxu1 }
 0x33d   :  { %v228_v32 = vadd.f32 %v7572_v3, %v227_v31  ;;  %v6265_v33 = vpop.f32.mrb[1].mxu1 }
 0x33f   :  { %v232_v34 = vrot.slane %v228_v32, 6 }
 0x341   :  { %239 = vrot.lane.b32.xlu0 %v232_v34, %s7522_s2  ;;  %v234_v35 = vadd.f32 %v232_v34, %v7581_v8 }
 0x343   :  { %v235_v36 = vmul.f32 0.5, %v234_v35 }
 0x345   :  { %7360 = vtanh.f32 %v235_v36 }
 0x34f   :  { %v7361_v37 = vpop.eup %7360 }
 0x350   :  { %v237_v38 = vmul.f32 0.5, %v7361_v37 }
 0x352   :  { %v238_v39 = vadd.f32 0.5, %v237_v38 }
 0x354   :  { %v249_v46 = vsub.f32 1.0, %v238_v39  ;;  %v257_v49 = vmul.f32 %v255_v45, %v238_v39 }
 0x3b3   :  { %v240_v40 = vpop.permute.xlu0 %239 }
 0x3b4   :  { %v242_v41 = vmul.f32 %v240_v40, %v238_v39 }
 0x3b6   :  { %244 = vrot.lane.b32.xlu1 %v242_v41, %s7522_s2 }
 0x428   :  { %v245_v42 = vpop.permute.xlu1 %244 }
 0x429   :  { %v247_v43 = vadd.f32 %v245_v42, %v7581_v8 }
 0x42b   :  { %7362 = vtanh.f32 %v247_v43 }
 0x435   :  { %v7363_v44 = vpop.eup %7362 }
 0x436   :  { %251 = vrot.lane.b32.xlu0 %v7363_v44, %s7526_s30 }
 0x4a8   :  { %v252_v47 = vpop.permute.xlu0 %251 }
 0x4a9   :  { %v254_v48 = vmul.f32 %v252_v47, %v249_v46 }
 0x4ab   :  { %v258_v50 = vadd.f32 %v257_v49, %v254_v48 }
 0x4ad   :  { %v260_v51 = vrot.slane %v258_v50, 2  ;;  %v359_v7 = vrot.slane %v258_v50, 6 }
 0x4af   :  { %261 = vrot.lane.b32.xlu1 %v260_v51, %s7526_s30 }
 0x521   :  { %v262_v52 = vpop.permute.xlu1 %261 }
 0x522   :  { %6275 = vmatmul.mubr.msk.f32.vlgmr.msra.gmra.mrb[2].mxu0 %vm158_vm3, %v262_v52 }
 0x523   :  { %6987 = vmatpush3.bf16.msra.mxu0 %v7588_v22  ;;  %6296 = vmatprep.mubr.msk.f32.mxu0 %vm7524_vm2, %v7525_v24 }
 0x524   :  { %6988 = vmatprep.subr.bf16.mxu0 %v7523_v21 }
 0x527   :  { %6990 = vmatpush3.bf16.msra.mxu0 %v7596_v25 }
 0x528   :  { %6997 = vmatprep.subr.bf16.mxu0 %v7523_v21 }
 0x5f5   :  { %v331_v53 = vpop.f32.mrb[2].mxu0 }
 0x5f6   :  { %v332_v54 = vadd.f32 %v7572_v3, %v331_v53  ;;  %v6276_v55 = vpop.f32.mrb[3].mxu0 }
 0x5f8   :  { %v336_v56 = vrot.slane %v332_v54, 4 }
 0x5fa   :  { %343 = vrot.lane.b32.xlu0 %v336_v56, %s7522_s2  ;;  %v338_v57 = vadd.f32 %v336_v56, %v7581_v8 }
 0x5fc   :  { %v339_v58 = vmul.f32 0.5, %v338_v57 }
 0x5fe   :  { %7364 = vtanh.f32 %v339_v58 }
 0x608   :  { %v7365_v59 = vpop.eup %7364 }
 0x609   :  { %v341_v60 = vmul.f32 0.5, %v7365_v59 }
 0x60b   :  { %v342_v61 = vadd.f32 0.5, %v341_v60 }
 0x60d   :  { %v353_v9 = vsub.f32 1.0, %v342_v61  ;;  %v361_v11 = vmul.f32 %v359_v7, %v342_v61 }
 0x66c   :  { %v344_v62 = vpop.permute.xlu0 %343 }
 0x66d   :  { %v346_v63 = vmul.f32 %v344_v62, %v342_v61 }
 0x66f   :  { %348 = vrot.lane.b32.xlu1 %v346_v63, %s7522_s2 }
 0x6e1   :  { %v349_v0 = vpop.permute.xlu1 %348 }
 0x6e2   :  { %v351_v4 = vadd.f32 %v349_v0, %v7581_v8 }
 0x6e4   :  { %7366 = vtanh.f32 %v351_v4 }
 0x6ee   :  { %v7367_v5 = vpop.eup %7366 }
 0x6ef   :  { %355 = vrot.lane.b32.xlu0 %v7367_v5, %s7526_s30 }
 0x761   :  { %v356_v10 = vpop.permute.xlu0 %355 }
 0x762   :  { %v358_v12 = vmul.f32 %v356_v10, %v353_v9 }
 0x764   :  { %v362_v13 = vadd.f32 %v361_v11, %v358_v12  ;;  %v879_v12 = vld [vmem:[#allocation2 + $0x38] sm:$0xf] }
 0x766   :  { %v364_v14 = vrot.slane %v362_v13, 4  ;;  %v463_v34 = vrot.slane %v362_v13, 6 }
 0x768   :  { %365 = vrot.lane.b32.xlu1 %v364_v14, %s7526_s30  ;;  %v7676_v14 = vld [vmem:[#allocation2 + $0x68] ss:$0 sm:$0xff] }
 0x7da   :  { %v366_v15 = vpop.permute.xlu1 %365 }
 0x7db   :  { %6286 = vmatmul.mubr.msk.f32.vlgmr.msra.gmra.mrb[2].mxu1 %vm158_vm3, %v366_v15 }
 0x7dc   :  { %6993 = vmatpush3.bf16.msra.mxu1 %v7588_v22  ;;  %6307 = vmatprep.mubr.msk.f32.mxu1 %vm7524_vm2, %v7525_v24 }
 0x7dd   :  { %6994 = vmatprep.subr.bf16.mxu1 %v7523_v21 }
 0x7e0   :  { %6996 = vmatpush3.bf16.msra.mxu1 %v7596_v25 }
 0x7e1   :  { %7003 = vmatprep.subr.bf16.mxu1 %v7523_v21 }
 0x8ae   :  { %v435_v16 = vpop.f32.mrb[2].mxu1 }
 0x8af   :  { %v436_v17 = vadd.f32 %v7572_v3, %v435_v16  ;;  %v6287_v18 = vpop.f32.mrb[3].mxu1 }
 0x8b1   :  { %v440_v19 = vrot.slane %v436_v17, 2 }
 0x8b3   :  { %447 = vrot.lane.b32.xlu0 %v440_v19, %s7522_s2  ;;  %v442_v20 = vadd.f32 %v440_v19, %v7581_v8 }
 0x8b5   :  { %v443_v23 = vmul.f32 0.5, %v442_v20 }
 0x8b7   :  { %7368 = vtanh.f32 %v443_v23 }
 0x8c1   :  { %v7369_v26 = vpop.eup %7368 }
 0x8c2   :  { %v445_v27 = vmul.f32 0.5, %v7369_v26 }
 0x8c4   :  { %v446_v28 = vadd.f32 0.5, %v445_v27 }
 0x8c6   :  { %v457_v35 = vsub.f32 1.0, %v446_v28  ;;  %v465_v37 = vmul.f32 %v463_v34, %v446_v28 }
 0x925   :  { %v448_v29 = vpop.permute.xlu0 %447 }
 0x926   :  { %v450_v30 = vmul.f32 %v448_v29, %v446_v28  ;;  %v5834_v29 = vld [vmem:[#allocation2 + $0x60] ss:$0 sm:$0xff] }
 0x928   :  { %452 = vrot.lane.b32.xlu1 %v450_v30, %s7522_s2 }
 0x99a   :  { %v453_v31 = vpop.permute.xlu1 %452 }
 0x99b   :  { %v455_v32 = vadd.f32 %v453_v31, %v7581_v8 }
 0x99d   :  { %7370 = vtanh.f32 %v455_v32 }
 0x9a7   :  { %v7371_v33 = vpop.eup %7370 }
 0x9a8   :  { %459 = vrot.lane.b32.xlu0 %v7371_v33, %s7526_s30 }
 0xa1a   :  { %v460_v36 = vpop.permute.xlu0 %459 }
 0xa1b   :  { %v462_v38 = vmul.f32 %v460_v36, %v457_v35 }
 0xa1d   :  { %v466_v39 = vadd.f32 %v465_v37, %v462_v38 }
 0xa1f   :  { %v468_v40 = vrot.slane %v466_v39, 6 }
 0xa21   :  { %469 = vrot.lane.b32.xlu1 %v468_v40, %s7526_s30 }
 0xa93   :  { %v470_v41 = vpop.permute.xlu1 %469 }
 0xa94   :  { %6297 = vmatmul.mubr.msk.f32.vlgmr.msra.gmra.mrb[4].mxu0 %vm158_vm3, %v470_v41  ;;  %v880_v41 = vld [vmem:[#allocation2 + $0x40] sm:$0xff] }
 0xa95   :  { %6999 = vmatpush3.bf16.msra.mxu0 %v7588_v22  ;;  %6318 = vmatprep.mubr.msk.f32.mxu0 %vm7524_vm2, %v7525_v24 }
 0xa96   :  { %7000 = vmatprep.subr.bf16.mxu0 %v7523_v21 }
 0xa99   :  { %7002 = vmatpush3.bf16.msra.mxu0 %v7596_v25 }
 0xa9a   :  { %6332 = vmatprep.subr.msk.mxu0 %vm54_vm0, %v879_v12 }
 0xb67   :  { %v539_v8 = vpop.f32.mrb[4].mxu0 }
 0xb68   :  { %v540_v42 = vadd.f32 %v7572_v3, %v539_v8  ;;  %v6298_v43 = vpop.f32.mrb[5].mxu0  ;;  %v881_v8 = vld [vmem:[#allocation2 + $0x48] sm:$0xff] }
 0xb69   :  { %v7701_v43 = vpack.c.bf16 %v881_v8, %v880_v41 }
 0xb6a   :  { %549 = vrot.lane.b32.xlu0 %v540_v42, %s7522_s2  ;;  %v543_v44 = vadd.f32 %v540_v42, %v7579_v6  ;;  %v882_v42 = vld [vmem:[#allocation2 + $0x50] sm:$0xff] }
 0xb6c   :  { %v544_v45 = vmul.f32 0.5, %v543_v44  ;;  %v883_v44 = vld [vmem:[#allocation2 + $0x58] sm:$0xff] }
 0xb6e   :  { %7372 = vtanh.f32 %v544_v45  ;;  %v7704_v45 = vpack.c.bf16 %v883_v44, %v882_v42 }
 0xb78   :  { %v7373_v46 = vpop.eup %7372 }
 0xb79   :  { %v546_v47 = vmul.f32 0.5, %v7373_v46 }
 0xb7b   :  { %v547_v48 = vadd.f32 0.5, %v546_v47 }
 0xb7d   :  { %v559_v54 = vsub.f32 1.0, %v547_v48  ;;  %v566_v56 = vmul.f32 %v547_v48, %v468_v40 }
 0xbdc   :  { %v550_v49 = vpop.permute.xlu0 %549 }
 0xbdd   :  { %v552_v50 = vmul.f32 %v550_v49, %v547_v48 }
 0xbdf   :  { %554 = vrot.lane.b32.xlu1 %v552_v50, %s7522_s2 }
 0xc51   :  { %v555_v51 = vpop.permute.xlu1 %554 }
 0xc52   :  { %v557_v52 = vadd.f32 %v555_v51, %v7579_v6 }
 0xc54   :  { %7374 = vtanh.f32 %v557_v52 }
 0xc5e   :  { %v7375_v53 = vpop.eup %7374 }
 0xc5f   :  { %561 = vrot.lane.b32.xlu0 %v7375_v53, %s7526_s30 }
 0xcd1   :  { %v562_v55 = vpop.permute.xlu0 %561 }
 0xcd2   :  { %v564_v57 = vmul.f32 %v562_v55, %v559_v54 }
 0xcd4   :  { %v567_v58 = vadd.f32 %v566_v56, %v564_v57 }
 0xcd6   :  { %569 = vrot.lane.b32.xlu1 %v567_v58, %s7526_s30  ;;  %v667_v15 = vrot.slane %v567_v58, 6 }
 0xd48   :  { %v570_v59 = vpop.permute.xlu1 %569 }
 0xd49   :  { %6308 = vmatmul.mubr.msk.f32.vlgmr.msra.gmra.mrb[4].mxu1 %vm158_vm3, %v570_v59 }
 0xd4a   :  { %7005 = vmatpush3.bf16.msra.mxu1 %v7588_v22  ;;  %6329 = vmatprep.mubr.msk.f32.mxu1 %vm7524_vm2, %v7525_v24 }
 0xd4b   :  { %7006 = vmatprep.subr.bf16.mxu1 %v7523_v21 }
 0xd4e   :  { %7008 = vmatpush3.bf16.msra.mxu1 %v7596_v25 }
 0xd4f   :  { %7015 = vmatprep.subr.bf16.mxu1 %v7523_v21 }
 0xe1c   :  { %v639_v60 = vpop.f32.mrb[4].mxu1 }
 0xe1d   :  { %v640_v61 = vadd.f32 %v7572_v3, %v639_v60  ;;  %v6309_v62 = vpop.f32.mrb[5].mxu1 }
 0xe1f   :  { %v644_v63 = vrot.slane %v640_v61, 6 }
 0xe21   :  { %651 = vrot.lane.b32.xlu0 %v644_v63, %s7522_s2  ;;  %v646_v0 = vadd.f32 %v644_v63, %v7579_v6 }
 0xe23   :  { %v647_v4 = vmul.f32 0.5, %v646_v0 }
 0xe25   :  { %7376 = vtanh.f32 %v647_v4 }
 0xe2f   :  { %v7377_v22 = vpop.eup %7376 }
 0xe30   :  { %v649_v5 = vmul.f32 0.5, %v7377_v22 }
 0xe32   :  { %v650_v7 = vadd.f32 0.5, %v649_v5 }
 0xe34   :  { %v661_v16 = vsub.f32 1.0, %v650_v7  ;;  %v669_v19 = vmul.f32 %v667_v15, %v650_v7 }
 0xe93   :  { %v652_v9 = vpop.permute.xlu0 %651 }
 0xe94   :  { %v654_v10 = vmul.f32 %v652_v9, %v650_v7 }
 0xe96   :  { %656 = vrot.lane.b32.xlu1 %v654_v10, %s7522_s2 }
 0xf08   :  { %v657_v25 = vpop.permute.xlu1 %656 }
 0xf09   :  { %v659_v11 = vadd.f32 %v657_v25, %v7579_v6 }
 0xf0b   :  { %7378 = vtanh.f32 %v659_v11 }
 0xf15   :  { %v7379_v13 = vpop.eup %7378 }
 0xf16   :  { %663 = vrot.lane.b32.xlu0 %v7379_v13, %s7526_s30 }
 0xf1a   :  { %978 = vrot.lane.b32.xlu0 %v7676_v14, %s7522_s2 }
 0xf88   :  { %v664_v17 = vpop.permute.xlu0 %663 }
 0xf89   :  { %v666_v18 = vmul.f32 %v664_v17, %v661_v16 }
 0xf8b   :  { %v7680_v20 = vadd.f32 %v669_v19, %v666_v18 }
 0xf8d   :  { %v672_v23 = vrot.slane %v7680_v20, 2  ;;  %v771_v63 = vrot.slane %v7680_v20, 6 }
 0xf8f   :  { %673 = vrot.lane.b32.xlu1 %v672_v23, %s7526_s30 }
0x1001   :  { %v674_v26 = vpop.permute.xlu1 %673 }
0x1002   :  { %6319 = vmatmul.mubr.msk.f32.vlgmr.msra.gmra.mrb[6].mxu0 %vm158_vm3, %v674_v26 }
0x1003   :  { %6333 = vmatpush3.msk.msra.mxu0 %vm54_vm0, %v879_v12  ;;  %6334 = vmatprep.mubr.msk.f32.mxu0 %vm47_vm1, %v7562_v1 }
0x1004   :  { %7009 = vmatprep.subr.bf16.mxu0 %v7523_v21 }
0x1006   :  { %6335 = vmatmul.mubr.msk.f32.vlgmr.msra.gmra.mrb[8].mxu0 %vm47_vm1, %v7567_v2  ;;  %v979_v2 = vpop.permute.xlu0 %978 }
0x1007   :  { %6345 = vmatprep.mubr.msk.f32.mxu0 %vm7524_vm2, %v7525_v24  ;;  %7011 = vmatpush3.bf16.msra.mxu0 %v7701_v43 }
0x1008   :  { %7012 = vmatprep.subr.bf16.mxu0 %v7523_v21 }
0x100b   :  { %7014 = vmatpush3.bf16.msra.mxu0 %v7704_v45 }
0x100c   :  { %7021 = vmatprep.subr.bf16.mxu0 %v7523_v21 }
0x10d5   :  { %v743_v27 = vpop.f32.mrb[6].mxu0 }
0x10d6   :  { %v6320_v28 = vpop.f32.mrb[7].mxu0  ;;  %v744_v46 = vadd.f32 %v7572_v3, %v743_v27 }
0x10d8   :  { %v748_v48 = vrot.slane %v744_v46, 4 }
0x10d9   :  { %v6336_v30 = vpop.f32.mrb[8].mxu0 }
0x10da   :  { %v7693_v31 = vadd.f32 %v6336_v30, %v5834_v29  ;;  %v963_v32 = vpop.f32.mrb[9].mxu0  ;;  %v750_v49 = vadd.f32 %v748_v48, %v7579_v6 }
0x10db   :  { %v7695_v33 = vadd.f32 %v5834_v29, %v963_v32 }
0x10dc   :  { %v972_v1 = vadd.f32 %v7676_v14, %v7693_v31  ;;  %v751_v50 = vmul.f32 0.5, %v750_v49 }
0x10de   :  { %v973_v34 = vmul.f32 0.5, %v972_v1 }
0x10e0   :  { %7380 = vtanh.f32 %v973_v34 }
0x10ea   :  { %v7381_v35 = vpop.eup %7380 }
0x10eb   :  { %v975_v36 = vmul.f32 0.5, %v7381_v35 }
0x10ed   :  { %v976_v37 = vadd.f32 0.5, %v975_v36 }
0x10ef   :  { %v981_v38 = vmul.f32 %v979_v2, %v976_v37  ;;  %v988_v52 = vsub.f32 1.0, %v976_v37 }
0x10f1   :  { %983 = vrot.lane.b32.xlu1 %v981_v38, %s7522_s2 }
0x1163   :  { %v984_v39 = vpop.permute.xlu1 %983 }
0x1164   :  { %v986_v40 = vadd.f32 %v984_v39, %v7693_v31 }
0x1166   :  { %7382 = vtanh.f32 %v986_v40 }
0x1167   :  { %7384 = vtanh.f32 %v751_v50 }
0x1170   :  { %v7383_v47 = vpop.eup %7382 }
0x1171   :  { %990 = vrot.lane.b32.xlu0 %v7383_v47, %s7526_s30  ;;  %v7385_v51 = vpop.eup %7384 }
0x1172   :  { %v753_v53 = vmul.f32 0.5, %v7385_v51 }
0x1174   :  { %v754_v56 = vadd.f32 0.5, %v753_v53 }
0x1175   :  { %755 = vrot.lane.b32.xlu0 %v748_v48, %s7522_s2 }
0x1176   :  { %v765_v0 = vsub.f32 1.0, %v754_v56  ;;  %v773_v22 = vmul.f32 %v771_v63, %v754_v56 }
0x11e3   :  { %v991_v54 = vpop.permute.xlu0 %990 }
0x11e4   :  { %v993_v55 = vmul.f32 %v991_v54, %v988_v52 }
0x11e6   :  { %v995_v3 = vrot.slane %v993_v55, 6  ;;  %v1094_v32 = vrot.slane %v993_v55, 2 }
0x11e7   :  { %v756_v57 = vpop.permute.xlu0 %755 }
0x11e8   :  { %v758_v58 = vmul.f32 %v756_v57, %v754_v56  ;;  %996 = vrot.lane.b32.xlu1 %v995_v3, %s7526_s30 }
0x11ea   :  { %760 = vrot.lane.b32.xlu0 %v758_v58, %s7522_s2 }
0x125a   :  { %v997_v59 = vpop.permute.xlu1 %996 }
0x125b   :  { %6346 = vmatmul.mubr.msk.f32.vlgmr.msra.gmra.mrb[10].mxu0 %vm158_vm3, %v997_v59 }
0x125c   :  { %v761_v60 = vpop.permute.xlu0 %760  ;;  %7023 = vmatpush3.bf16.msra.mxu0 %v7701_v43  ;;  %6367 = vmatprep.mubr.msk.f32.mxu0 %vm7524_vm2, %v7525_v24 }
0x125d   :  { %v763_v61 = vadd.f32 %v761_v60, %v7579_v6  ;;  %7024 = vmatprep.subr.bf16.mxu0 %v7523_v21 }
0x125f   :  { %7386 = vtanh.f32 %v763_v61 }
0x1260   :  { %7026 = vmatpush3.bf16.msra.mxu0 %v7704_v45 }
0x1261   :  { %7033 = vmatprep.subr.bf16.mxu0 %v7523_v21 }
0x1269   :  { %v7387_v62 = vpop.eup %7386 }
0x126a   :  { %767 = vrot.lane.b32.xlu0 %v7387_v62, %s7526_s30 }
0x12dc   :  { %v768_v4 = vpop.permute.xlu0 %767 }
0x12dd   :  { %v770_v5 = vmul.f32 %v768_v4, %v765_v0 }
0x12df   :  { %v7725_v7 = vadd.f32 %v773_v22, %v770_v5 }
0x12e1   :  { %v776_v9 = vrot.slane %v7725_v7, 4 }
0x12e3   :  { %777 = vrot.lane.b32.xlu0 %v776_v9, %s7526_s30 }
0x132e   :  { %v1066_v10 = vpop.f32.mrb[10].mxu0 }
0x132f   :  { %v1067_v25 = vadd.f32 %v7676_v14, %v1066_v10  ;;  %v6347_v11 = vpop.f32.mrb[11].mxu0 }
0x1331   :  { %v1071_v12 = vrot.slane %v1067_v25, 4 }
0x1333   :  { %1078 = vrot.lane.b32.xlu1 %v1071_v12, %s7522_s2  ;;  %v1073_v15 = vadd.f32 %v1071_v12, %v7693_v31 }
0x1335   :  { %v1074_v16 = vmul.f32 0.5, %v1073_v15 }
0x1337   :  { %7388 = vtanh.f32 %v1074_v16 }
0x1341   :  { %v7389_v17 = vpop.eup %7388 }
0x1342   :  { %v1076_v18 = vmul.f32 0.5, %v7389_v17 }
0x1344   :  { %v1077_v19 = vadd.f32 0.5, %v1076_v18 }
0x1346   :  { %v1088_v1 = vsub.f32 1.0, %v1077_v19  ;;  %v1096_v35 = vmul.f32 %v1094_v32, %v1077_v19 }
0x1355   :  { %v778_v13 = vpop.permute.xlu0 %777 }
0x1356   :  { %6330 = vmatmul.mubr.msk.f32.vlgmr.msra.gmra.mrb[6].mxu1 %vm158_vm3, %v778_v13 }
0x1357   :  { %7017 = vmatpush3.bf16.msra.mxu1 %v7701_v43  ;;  %6356 = vmatprep.mubr.msk.f32.mxu1 %vm7524_vm2, %v7525_v24 }
0x1358   :  { %7018 = vmatprep.subr.bf16.mxu1 %v7523_v21 }
0x135b   :  { %7020 = vmatpush3.bf16.msra.mxu1 %v7704_v45 }
0x135c   :  { %7027 = vmatprep.subr.bf16.mxu1 %v7523_v21 }
0x13a5   :  { %v1079_v20 = vpop.permute.xlu1 %1078 }
0x13a6   :  { %v1081_v23 = vmul.f32 %v1079_v20, %v1077_v19 }
0x13a8   :  { %1083 = vrot.lane.b32.xlu1 %v1081_v23, %s7522_s2 }
0x141a   :  { %v1084_v26 = vpop.permute.xlu1 %1083 }
0x141b   :  { %v1086_v27 = vadd.f32 %v1084_v26, %v7693_v31 }
0x141d   :  { %7390 = vtanh.f32 %v1086_v27 }
0x1427   :  { %v7391_v28 = vpop.eup %7390 }
0x1428   :  { %1090 = vrot.lane.b32.xlu1 %v7391_v28, %s7526_s30 }
0x1429   :  { %v7742_v29 = vpop.f32.mrb[6].mxu1 }
0x142a   :  { %v6331_v30 = vpop.f32.mrb[7].mxu1 }
0x149a   :  { %v1091_v34 = vpop.permute.xlu1 %1090 }
0x149b   :  { %v1093_v36 = vmul.f32 %v1091_v34, %v1088_v1 }
0x149d   :  { %v1097_v2 = vadd.f32 %v1096_v35, %v1093_v36 }
0x149f   :  { %v1099_v37 = vrot.slane %v1097_v2, 4  ;;  %v1198_v54 = vrot.slane %v1097_v2, 2 }
0x14a1   :  { %1100 = vrot.lane.b32.xlu1 %v1099_v37, %s7526_s30 }
0x1513   :  { %v1101_v38 = vpop.permute.xlu1 %1100 }
0x1514   :  { %6357 = vmatmul.mubr.msk.f32.vlgmr.msra.gmra.mrb[8].mxu1 %vm158_vm3, %v1101_v38 }
0x1515   :  { %7029 = vmatpush3.bf16.msra.mxu1 %v7701_v43  ;;  %6378 = vmatprep.mubr.msk.f32.mxu1 %vm7524_vm2, %v7525_v24 }
0x1516   :  { %7030 = vmatprep.subr.bf16.mxu1 %v7523_v21 }
0x1519   :  { %7032 = vmatpush3.bf16.msra.mxu1 %v7704_v45 }
0x151a   :  { %7039 = vmatprep.subr.bf16.mxu1 %v7523_v21 }
0x15e7   :  { %v1170_v39 = vpop.f32.mrb[8].mxu1 }
0x15e8   :  { %v1171_v40 = vadd.f32 %v7676_v14, %v1170_v39  ;;  %v6358_v41 = vpop.f32.mrb[9].mxu1 }
0x15ea   :  { %v1175_v8 = vrot.slane %v1171_v40, 6 }
0x15ec   :  { %1182 = vrot.lane.b32.xlu0 %v1175_v8, %s7522_s2  ;;  %v1177_v42 = vadd.f32 %v1175_v8, %v7693_v31 }
0x15ee   :  { %v1178_v44 = vmul.f32 0.5, %v1177_v42 }
0x15f0   :  { %7392 = vtanh.f32 %v1178_v44 }
0x15fa   :  { %v7393_v46 = vpop.eup %7392 }
0x15fb   :  { %v1180_v47 = vmul.f32 0.5, %v7393_v46 }
0x15fd   :  { %v1181_v48 = vadd.f32 0.5, %v1180_v47 }
0x15ff   :  { %v1192_v55 = vsub.f32 1.0, %v1181_v48  ;;  %v1200_v56 = vmul.f32 %v1198_v54, %v1181_v48 }
0x165e   :  { %v1183_v49 = vpop.permute.xlu0 %1182 }
0x165f   :  { %v1185_v50 = vmul.f32 %v1183_v49, %v1181_v48 }
0x1661   :  { %1187 = vrot.lane.b32.xlu1 %v1185_v50, %s7522_s2 }
0x16d3   :  { %v1188_v51 = vpop.permute.xlu1 %1187 }
0x16d4   :  { %v1190_v52 = vadd.f32 %v1188_v51, %v7693_v31 }
0x16d6   :  { %7394 = vtanh.f32 %v1190_v52 }
0x16e0   :  { %v7395_v53 = vpop.eup %7394 }
0x16e1   :  { %1194 = vrot.lane.b32.xlu0 %v7395_v53, %s7526_s30 }
0x1753   :  { %v1195_v3 = vpop.permute.xlu0 %1194 }
0x1754   :  { %v1197_v57 = vmul.f32 %v1195_v3, %v1192_v55 }
0x1756   :  { %v1201_v58 = vadd.f32 %v1200_v56, %v1197_v57 }
0x1758   :  { %v1203_v59 = vrot.slane %v1201_v58, 2  ;;  %v1719_v58 = vld [vmem:[#allocation2 + $0x70] sm:$0xf] }
0x175a   :  { %1204 = vrot.lane.b32.xlu1 %v1203_v59, %s7526_s30 }
0x17cc   :  { %v1205_v60 = vpop.permute.xlu1 %1204 }
0x17cd   :  { %6368 = vmatmul.mubr.msk.f32.vlgmr.msra.gmra.mrb[12].mxu0 %vm158_vm3, %v1205_v60  ;;  %v7800_v60 = vld [vmem:[#allocation2 + $0xa0] ss:$0 sm:$0xff] }
0x17ce   :  { %7035 = vmatpush3.bf16.msra.mxu0 %v7701_v43  ;;  %6389 = vmatprep.mubr.msk.f32.mxu0 %vm7524_vm2, %v7525_v24 }
0x17cf   :  { %7036 = vmatprep.subr.bf16.mxu0 %v7523_v21 }
0x17d2   :  { %7038 = vmatpush3.bf16.msra.mxu0 %v7704_v45 }
0x17d3   :  { %7045 = vmatprep.subr.bf16.mxu0 %v7523_v21 }
0x18a0   :  { %v1274_v61 = vpop.f32.mrb[12].mxu0 }
0x18a1   :  { %v1275_v62 = vadd.f32 %v7676_v14, %v1274_v61  ;;  %v6369_v63 = vpop.f32.mrb[13].mxu0 }
0x18a3   :  { %1284 = vrot.lane.b32.xlu0 %v1275_v62, %s7522_s2  ;;  %v1278_v0 = vadd.f32 %v1275_v62, %v7693_v31 }
0x18a5   :  { %v1279_v4 = vmul.f32 0.5, %v1278_v0 }
0x18a7   :  { %7396 = vtanh.f32 %v1279_v4 }
0x18b1   :  { %v7397_v22 = vpop.eup %7396 }
0x18b2   :  { %v1281_v5 = vmul.f32 0.5, %v7397_v22 }
0x18b4   :  { %v1282_v9 = vadd.f32 0.5, %v1281_v5 }
0x18b6   :  { %v1294_v15 = vsub.f32 1.0, %v1282_v9  ;;  %v1301_v17 = vmul.f32 %v1282_v9, %v1203_v59 }
0x1915   :  { %v1285_v10 = vpop.permute.xlu0 %1284 }
0x1916   :  { %v1287_v25 = vmul.f32 %v1285_v10, %v1282_v9  ;;  %v7811_v9 = vld [vmem:[%s8470_s1] sm:$0xff] }
0x1918   :  { %1289 = vrot.lane.b32.xlu1 %v1287_v25, %s7522_s2  ;;  %v7820_v25 = vld [vmem:[%s8470_s1 + $0x8] sm:$0xf] }
0x198a   :  { %v1290_v11 = vpop.permute.xlu1 %1289 }
0x198b   :  { %v1292_v12 = vadd.f32 %v1290_v11, %v7693_v31 }
0x198d   :  { %7398 = vtanh.f32 %v1292_v12 }
0x1997   :  { %v7399_v13 = vpop.eup %7398 }
0x1998   :  { %1296 = vrot.lane.b32.xlu0 %v7399_v13, %s7526_s30  ;;  %v5846_v13 = vld [vmem:[#allocation2 + $0x98] ss:$0 sm:$0xff] }
0x1a0a   :  { %v1297_v16 = vpop.permute.xlu0 %1296 }
0x1a0b   :  { %v1299_v18 = vmul.f32 %v1297_v16, %v1294_v15 }
0x1a0d   :  { %v1302_v19 = vadd.f32 %v1301_v17, %v1299_v18 }
0x1a0f   :  { %1304 = vrot.lane.b32.xlu1 %v1302_v19, %s7526_s30  ;;  %v1402_v39 = vrot.slane %v1302_v19, 2 }
0x1a81   :  { %v1305_v20 = vpop.permute.xlu1 %1304 }
0x1a82   :  { %6379 = vmatmul.mubr.msk.f32.vlgmr.msra.gmra.mrb[10].mxu1 %vm158_vm3, %v1305_v20 }
0x1a83   :  { %7041 = vmatpush3.bf16.msra.mxu1 %v7701_v43  ;;  %6400 = vmatprep.mubr.msk.f32.mxu1 %vm7524_vm2, %v7525_v24 }
0x1a84   :  { %7042 = vmatprep.subr.bf16.mxu1 %v7523_v21 }
0x1a87   :  { %7044 = vmatpush3.bf16.msra.mxu1 %v7704_v45 }
0x1a88   :  { %6414 = vmatprep.subr.msk.mxu1 %vm54_vm0, %v1719_v58 }
0x1b55   :  { %v1374_v31 = vpop.f32.mrb[10].mxu1 }
0x1b56   :  { %v1375_v23 = vadd.f32 %v7676_v14, %v1374_v31  ;;  %v6380_v26 = vpop.f32.mrb[11].mxu1 }
0x1b58   :  { %v1379_v27 = vrot.slane %v1375_v23, 2 }
0x1b5a   :  { %1386 = vrot.lane.b32.xlu0 %v1379_v27, %s7522_s2  ;;  %v1381_v28 = vadd.f32 %v1379_v27, %v7695_v33 }
0x1b5c   :  { %v1382_v30 = vmul.f32 0.5, %v1381_v28 }
0x1b5e   :  { %7400 = vtanh.f32 %v1382_v30 }
0x1b68   :  { %v7401_v32 = vpop.eup %7400 }
0x1b69   :  { %v1384_v1 = vmul.f32 0.5, %v7401_v32 }
0x1b6b   :  { %v1385_v34 = vadd.f32 0.5, %v1384_v1  ;;  %v1720_v1 = vld [vmem:[#allocation2 + $0x78] sm:$0xff] }
0x1b6d   :  { %v1396_v40 = vsub.f32 1.0, %v1385_v34  ;;  %v1404_v8 = vmul.f32 %v1402_v39, %v1385_v34 }
0x1bcc   :  { %v1387_v35 = vpop.permute.xlu0 %1386 }
0x1bcd   :  { %v1389_v36 = vmul.f32 %v1387_v35, %v1385_v34  ;;  %v1721_v34 = vld [vmem:[#allocation2 + $0x80] sm:$0xff]  ;;  %v1722_v35 = vld [vmem:[#allocation2 + $0x88] sm:$0xff] }
0x1bcf   :  { %1391 = vrot.lane.b32.xlu1 %v1389_v36, %s7522_s2  ;;  %v7835_v36 = vpack.c.bf16 %v1721_v34, %v1720_v1 }
0x1c41   :  { %v1392_v2 = vpop.permute.xlu1 %1391 }
0x1c42   :  { %v1394_v37 = vadd.f32 %v1392_v2, %v7695_v33  ;;  %v1723_v2 = vld [vmem:[#allocation2 + $0x90] sm:$0xff] }
0x1c44   :  { %7402 = vtanh.f32 %v1394_v37  ;;  %v7838_v37 = vpack.c.bf16 %v1723_v2, %v1722_v35 }
0x1c4e   :  { %v7403_v38 = vpop.eup %7402 }
0x1c4f   :  { %1398 = vrot.lane.b32.xlu0 %v7403_v38, %s7526_s30 }
0x1cc1   :  { %v1399_v41 = vpop.permute.xlu0 %1398 }
0x1cc2   :  { %v1401_v42 = vmul.f32 %v1399_v41, %v1396_v40 }
0x1cc4   :  { %v1405_v44 = vadd.f32 %v1404_v8, %v1401_v42 }
0x1cc6   :  { %v1407_v46 = vrot.slane %v1405_v44, 6  ;;  %v1506_v61 = vrot.slane %v1405_v44, 2 }
0x1cc8   :  { %1408 = vrot.lane.b32.xlu1 %v1407_v46, %s7526_s30 }
0x1d3a   :  { %v1409_v47 = vpop.permute.xlu1 %1408 }
0x1d3b   :  { %6390 = vmatmul.mubr.msk.f32.vlgmr.msra.gmra.mrb[14].mxu0 %vm158_vm3, %v1409_v47 }
0x1d3c   :  { %7047 = vmatpush3.bf16.msra.mxu0 %v7701_v43  ;;  %6411 = vmatprep.mubr.msk.f32.mxu0 %vm7524_vm2, %v7525_v24 }
0x1d3d   :  { %7048 = vmatprep.subr.bf16.mxu0 %v7523_v21 }
0x1d40   :  { %7050 = vmatpush3.bf16.msra.mxu0 %v7704_v45 }
0x1d41   :  { %7057 = vmatprep.subr.bf16.mxu0 %v7523_v21 }
0x1e0e   :  { %v1478_v48 = vpop.f32.mrb[14].mxu0 }
0x1e0f   :  { %v1479_v49 = vadd.f32 %v7676_v14, %v1478_v48  ;;  %v6391_v50 = vpop.f32.mrb[15].mxu0 }
0x1e11   :  { %v1483_v51 = vrot.slane %v1479_v49, 4 }
0x1e13   :  { %1490 = vrot.lane.b32.xlu0 %v1483_v51, %s7522_s2  ;;  %v1485_v52 = vadd.f32 %v1483_v51, %v7695_v33 }
0x1e15   :  { %v1486_v53 = vmul.f32 0.5, %v1485_v52 }
0x1e17   :  { %7404 = vtanh.f32 %v1486_v53 }
0x1e21   :  { %v7405_v43 = vpop.eup %7404 }
0x1e22   :  { %v1488_v54 = vmul.f32 0.5, %v7405_v43 }
0x1e24   :  { %v1489_v55 = vadd.f32 0.5, %v1488_v54 }
0x1e26   :  { %v1500_v62 = vsub.f32 1.0, %v1489_v55  ;;  %v1508_v0 = vmul.f32 %v1506_v61, %v1489_v55 }
0x1e85   :  { %v1491_v3 = vpop.permute.xlu0 %1490 }
0x1e86   :  { %v1493_v56 = vmul.f32 %v1491_v3, %v1489_v55 }
0x1e88   :  { %1495 = vrot.lane.b32.xlu1 %v1493_v56, %s7522_s2 }
0x1efa   :  { %v1496_v45 = vpop.permute.xlu1 %1495 }
0x1efb   :  { %v1498_v57 = vadd.f32 %v1496_v45, %v7695_v33 }
0x1efd   :  { %7406 = vtanh.f32 %v1498_v57 }
0x1f07   :  { %v7407_v59 = vpop.eup %7406 }
0x1f08   :  { %1502 = vrot.lane.b32.xlu0 %v7407_v59, %s7526_s30 }
0x1f0c   :  { %1824 = vrot.lane.b32.xlu0 %v7800_v60, %s7522_s2 }
0x1f7a   :  { %v1503_v63 = vpop.permute.xlu0 %1502 }
0x1f7b   :  { %v1505_v4 = vmul.f32 %v1503_v63, %v1500_v62 }
0x1f7d   :  { %v7804_v22 = vadd.f32 %v1508_v0, %v1505_v4 }
0x1f7e   :  { %v1825_v26 = vpop.permute.xlu0 %1824 }
0x1f7f   :  { %v1511_v5 = vrot.slane %v7804_v22, 4  ;;  %v1610_v54 = vrot.slane %v7804_v22, 2 }
0x1f81   :  { %1512 = vrot.lane.b32.xlu1 %v1511_v5, %s7526_s30 }
0x1ff3   :  { %v1513_v10 = vpop.permute.xlu1 %1512 }
0x1ff4   :  { %6401 = vmatmul.mubr.msk.f32.vlgmr.msra.gmra.mrb[12].mxu1 %vm158_vm3, %v1513_v10 }
0x1ff5   :  { %6415 = vmatpush3.msk.msra.mxu1 %vm54_vm0, %v1719_v58  ;;  %6416 = vmatprep.mubr.msk.f32.mxu1 %vm47_vm1, %v7811_v9 }
0x1ff6   :  { %7051 = vmatprep.subr.bf16.mxu1 %v7523_v21 }
0x1ff8   :  { %6417 = vmatmul.mubr.msk.f32.vlgmr.msra.gmra.mrb[14].mxu1 %vm47_vm1, %v7820_v25 }
0x1ff9   :  { %6427 = vmatprep.mubr.msk.f32.mxu1 %vm7524_vm2, %v7525_v24  ;;  %7053 = vmatpush3.bf16.msra.mxu1 %v7835_v36 }
0x1ffa   :  { %7054 = vmatprep.subr.bf16.mxu1 %v7523_v21 }
0x1ffd   :  { %7056 = vmatpush3.bf16.msra.mxu1 %v7838_v37 }
0x1ffe   :  { %7063 = vmatprep.subr.bf16.mxu1 %v7523_v21 }
0x20c7   :  { %v1582_v11 = vpop.f32.mrb[12].mxu1 }
0x20c8   :  { %v6402_v12 = vpop.f32.mrb[13].mxu1  ;;  %v1583_v38 = vadd.f32 %v7676_v14, %v1582_v11 }
0x20ca   :  { %v1587_v40 = vrot.slane %v1583_v38, 6 }
0x20cb   :  { %v6418_v15 = vpop.f32.mrb[14].mxu1 }
0x20cc   :  { %v7827_v16 = vadd.f32 %v6418_v15, %v5846_v13  ;;  %v1809_v17 = vpop.f32.mrb[15].mxu1  ;;  %v1589_v41 = vadd.f32 %v1587_v40, %v7695_v33 }
0x20cd   :  { %v7829_v18 = vadd.f32 %v5846_v13, %v1809_v17 }
0x20ce   :  { %v1590_v8 = vmul.f32 0.5, %v1589_v41 }
0x20cf   :  { %v1818_v19 = vadd.f32 %v7800_v60, %v7829_v18 }
0x20d1   :  { %v1819_v20 = vmul.f32 0.5, %v1818_v19 }
0x20d3   :  { %7408 = vtanh.f32 %v1819_v20 }
0x20dd   :  { %v7409_v31 = vpop.eup %7408 }
0x20de   :  { %v1821_v23 = vmul.f32 0.5, %v7409_v31 }
0x20e0   :  { %v1822_v27 = vadd.f32 0.5, %v1821_v23 }
0x20e2   :  { %v1827_v28 = vmul.f32 %v1825_v26, %v1822_v27  ;;  %v1834_v44 = vsub.f32 1.0, %v1822_v27 }
0x20e4   :  { %1829 = vrot.lane.b32.xlu1 %v1827_v28, %s7522_s2 }
0x2156   :  { %v1830_v30 = vpop.permute.xlu1 %1829 }
0x2157   :  { %v1832_v32 = vadd.f32 %v1830_v30, %v7829_v18 }
0x2159   :  { %7410 = vtanh.f32 %v1832_v32 }
0x215a   :  { %7412 = vtanh.f32 %v1590_v8 }
0x2163   :  { %v7411_v39 = vpop.eup %7410 }
0x2164   :  { %1836 = vrot.lane.b32.xlu0 %v7411_v39, %s7526_s30  ;;  %v7413_v42 = vpop.eup %7412 }
0x2165   :  { %v1592_v46 = vmul.f32 0.5, %v7413_v42 }
0x2167   :  { %v1593_v14 = vadd.f32 0.5, %v1592_v46 }
0x2168   :  { %1594 = vrot.lane.b32.xlu0 %v1587_v40, %s7522_s2 }
0x2169   :  { %v1604_v55 = vsub.f32 1.0, %v1593_v14  ;;  %v1612_v56 = vmul.f32 %v1610_v54, %v1593_v14 }
0x21d6   :  { %v1837_v47 = vpop.permute.xlu0 %1836 }
0x21d7   :  { %v1839_v48 = vmul.f32 %v1837_v47, %v1834_v44 }
0x21d9   :  { %1841 = vrot.lane.b32.xlu1 %v1839_v48, %s7526_s30  ;;  %v1939_v23 = vrot.slane %v1839_v48, 6 }
0x21da   :  { %v1595_v49 = vpop.permute.xlu0 %1594 }
0x21db   :  { %v1597_v50 = vmul.f32 %v1595_v49, %v1593_v14 }
0x21dd   :  { %1599 = vrot.lane.b32.xlu0 %v1597_v50, %s7522_s2 }
0x224b   :  { %v1842_v51 = vpop.permute.xlu1 %1841 }
0x224c   :  { %6428 = vmatmul.mubr.msk.f32.vlgmr.msra.gmra.mrb[16].mxu1 %vm158_vm3, %v1842_v51 }
0x224d   :  { %7065 = vmatpush3.bf16.msra.mxu1 %v7835_v36  ;;  %6449 = vmatprep.mubr.msk.f32.mxu1 %vm7524_vm2, %v7525_v24 }
0x224e   :  { %7066 = vmatprep.subr.bf16.mxu1 %v7523_v21 }
0x224f   :  { %v1600_v52 = vpop.permute.xlu0 %1599 }
0x2250   :  { %v1602_v53 = vadd.f32 %v1600_v52, %v7695_v33 }
0x2251   :  { %7068 = vmatpush3.bf16.msra.mxu1 %v7838_v37 }
0x2252   :  { %7414 = vtanh.f32 %v1602_v53  ;;  %7075 = vmatprep.subr.bf16.mxu1 %v7523_v21 }
0x225c   :  { %v7415_v43 = vpop.eup %7414 }
0x225d   :  { %1606 = vrot.lane.b32.xlu0 %v7415_v43, %s7526_s30 }
0x22cf   :  { %v1607_v3 = vpop.permute.xlu0 %1606 }
0x22d0   :  { %v1609_v45 = vmul.f32 %v1607_v3, %v1604_v55 }
0x22d2   :  { %v7859_v57 = vadd.f32 %v1612_v56, %v1609_v45 }
0x22d4   :  { %v1615_v58 = vrot.slane %v7859_v57, 2 }
0x22d6   :  { %1616 = vrot.lane.b32.xlu0 %v1615_v58, %s7526_s30 }
0x231f   :  { %v1911_v59 = vpop.f32.mrb[16].mxu1 }
0x2320   :  { %v1912_v61 = vadd.f32 %v7800_v60, %v1911_v59  ;;  %v6429_v62 = vpop.f32.mrb[17].mxu1 }
0x2322   :  { %v1916_v63 = vrot.slane %v1912_v61, 6 }
0x2324   :  { %1923 = vrot.lane.b32.xlu1 %v1916_v63, %s7522_s2  ;;  %v1918_v4 = vadd.f32 %v1916_v63, %v7829_v18 }
0x2326   :  { %v1919_v22 = vmul.f32 0.5, %v1918_v4 }
0x2328   :  { %7416 = vtanh.f32 %v1919_v22 }
0x2332   :  { %v7417_v5 = vpop.eup %7416 }
0x2333   :  { %v1921_v10 = vmul.f32 0.5, %v7417_v5 }
0x2335   :  { %v1922_v11 = vadd.f32 0.5, %v1921_v10 }
0x2337   :  { %v1933_v26 = vsub.f32 1.0, %v1922_v11  ;;  %v1941_v30 = vmul.f32 %v1939_v23, %v1922_v11 }
0x2348   :  { %v1617_v0 = vpop.permute.xlu0 %1616 }
0x2349   :  { %6412 = vmatmul.mubr.msk.f32.vlgmr.msra.gmra.mrb[16].mxu0 %vm158_vm3, %v1617_v0 }
0x234a   :  { %7059 = vmatpush3.bf16.msra.mxu0 %v7835_v36  ;;  %6438 = vmatprep.mubr.msk.f32.mxu0 %vm7524_vm2, %v7525_v24 }
0x234b   :  { %7060 = vmatprep.subr.bf16.mxu0 %v7523_v21 }
0x234e   :  { %7062 = vmatpush3.bf16.msra.mxu0 %v7838_v37 }
0x234f   :  { %7069 = vmatprep.subr.bf16.mxu0 %v7523_v21 }
0x2396   :  { %v1924_v12 = vpop.permute.xlu1 %1923 }
0x2397   :  { %v1926_v13 = vmul.f32 %v1924_v12, %v1922_v11  ;;  %v2355_v11 = vld [vmem:[#allocation2 + $0xa8] sm:$0xf] }
0x2399   :  { %1928 = vrot.lane.b32.xlu1 %v1926_v13, %s7522_s2  ;;  %v7908_v13 = vld [vmem:[#allocation2 + $0xd8] ss:$0 sm:$0xff] }
0x240b   :  { %v1929_v15 = vpop.permute.xlu1 %1928 }
0x240c   :  { %v1931_v17 = vadd.f32 %v1929_v15, %v7829_v18 }
0x240e   :  { %7418 = vtanh.f32 %v1931_v17 }
0x2418   :  { %v7419_v19 = vpop.eup %7418 }
0x2419   :  { %1935 = vrot.lane.b32.xlu1 %v7419_v19, %s7526_s30 }
0x241c   :  { %v7878_v20 = vpop.f32.mrb[16].mxu0 }
0x241d   :  { %v6413_v31 = vpop.f32.mrb[17].mxu0 }
0x248b   :  { %v1936_v27 = vpop.permute.xlu1 %1935 }
0x248c   :  { %v1938_v28 = vmul.f32 %v1936_v27, %v1933_v26 }
0x248e   :  { %v1942_v32 = vadd.f32 %v1941_v30, %v1938_v28 }
0x2490   :  { %v1944_v1 = vrot.slane %v1942_v32, 2  ;;  %v2043_v50 = vrot.slane %v1942_v32, 6  ;;  %v5856_v32 = vld [vmem:[#allocation2 + $0xd0] ss:$0 sm:$0xff] }
0x2492   :  { %1945 = vrot.lane.b32.xlu1 %v1944_v1, %s7526_s30 }
0x2504   :  { %v1946_v34 = vpop.permute.xlu1 %1945 }
0x2505   :  { %6439 = vmatmul.mubr.msk.f32.vlgmr.msra.gmra.mrb[18].mxu0 %vm158_vm3, %v1946_v34 }
0x2506   :  { %7071 = vmatpush3.bf16.msra.mxu0 %v7835_v36  ;;  %6460 = vmatprep.mubr.msk.f32.mxu0 %vm7524_vm2, %v7525_v24 }
0x2507   :  { %7072 = vmatprep.subr.bf16.mxu0 %v7523_v21 }
0x250a   :  { %7074 = vmatpush3.bf16.msra.mxu0 %v7838_v37 }
0x250b   :  { %6474 = vmatprep.subr.msk.mxu0 %vm54_vm0, %v2355_v11 }
0x25d8   :  { %v2015_v35 = vpop.f32.mrb[18].mxu0 }
0x25d9   :  { %v2016_v2 = vadd.f32 %v7800_v60, %v2015_v35  ;;  %v6440_v38 = vpop.f32.mrb[19].mxu0 }
0x25db   :  { %v2020_v39 = vrot.slane %v2016_v2, 4 }
0x25dd   :  { %2027 = vrot.lane.b32.xlu0 %v2020_v39, %s7522_s2  ;;  %v2022_v40 = vadd.f32 %v2020_v39, %v7829_v18 }
0x25df   :  { %v2023_v41 = vmul.f32 0.5, %v2022_v40 }
0x25e1   :  { %7420 = vtanh.f32 %v2023_v41 }
0x25eb   :  { %v7421_v8 = vpop.eup %7420 }
0x25ec   :  { %v2025_v42 = vmul.f32 0.5, %v7421_v8 }
0x25ee   :  { %v2026_v44 = vadd.f32 0.5, %v2025_v42 }
0x25f0   :  { %v2037_v51 = vsub.f32 1.0, %v2026_v44  ;;  %v2045_v53 = vmul.f32 %v2043_v50, %v2026_v44 }
0x264f   :  { %v2028_v46 = vpop.permute.xlu0 %2027 }
0x2650   :  { %v2030_v47 = vmul.f32 %v2028_v46, %v2026_v44  ;;  %v2356_v46 = vld [vmem:[#allocation2 + $0xb0] sm:$0xff] }
0x2652   :  { %2032 = vrot.lane.b32.xlu1 %v2030_v47, %s7522_s2  ;;  %v2357_v47 = vld [vmem:[#allocation2 + $0xb8] sm:$0xff] }
0x26c4   :  { %v2033_v48 = vpop.permute.xlu1 %2032 }
0x26c5   :  { %v2035_v14 = vadd.f32 %v2033_v48, %v7829_v18  ;;  %v2358_v48 = vld [vmem:[#allocation2 + $0xc0] sm:$0xff] }
0x26c7   :  { %7422 = vtanh.f32 %v2035_v14  ;;  %v7935_v14 = vpack.c.bf16 %v2357_v47, %v2356_v46 }
0x26d1   :  { %v7423_v49 = vpop.eup %7422 }
0x26d2   :  { %2039 = vrot.lane.b32.xlu0 %v7423_v49, %s7526_s30  ;;  %v2359_v49 = vld [vmem:[#allocation2 + $0xc8] sm:$0xff] }
0x26d3   :  { %v7938_v50 = vpack.c.bf16 %v2359_v49, %v2358_v48 }
0x2744   :  { %v2040_v52 = vpop.permute.xlu0 %2039 }
0x2745   :  { %v2042_v43 = vmul.f32 %v2040_v52, %v2037_v51 }
0x2747   :  { %v2046_v54 = vadd.f32 %v2045_v53, %v2042_v43 }
0x2749   :  { %v2048_v55 = vrot.slane %v2046_v54, 4  ;;  %v2147_v15 = vrot.slane %v2046_v54, 6 }
0x274b   :  { %2049 = vrot.lane.b32.xlu1 %v2048_v55, %s7526_s30 }
0x27bd   :  { %v2050_v3 = vpop.permute.xlu1 %2049 }
0x27be   :  { %6450 = vmatmul.mubr.msk.f32.vlgmr.msra.gmra.mrb[18].mxu1 %vm158_vm3, %v2050_v3 }
0x27bf   :  { %7077 = vmatpush3.bf16.msra.mxu1 %v7835_v36  ;;  %6471 = vmatprep.mubr.msk.f32.mxu1 %vm7524_vm2, %v7525_v24 }
0x27c0   :  { %7078 = vmatprep.subr.bf16.mxu1 %v7523_v21 }
0x27c3   :  { %7080 = vmatpush3.bf16.msra.mxu1 %v7838_v37 }
0x27c4   :  { %7087 = vmatprep.subr.bf16.mxu1 %v7523_v21 }
0x2891   :  { %v2119_v56 = vpop.f32.mrb[18].mxu1 }
0x2892   :  { %v2120_v45 = vadd.f32 %v7800_v60, %v2119_v56  ;;  %v6451_v59 = vpop.f32.mrb[19].mxu1 }
0x2894   :  { %v2124_v61 = vrot.slane %v2120_v45, 2 }
0x2896   :  { %2131 = vrot.lane.b32.xlu0 %v2124_v61, %s7522_s2  ;;  %v2126_v62 = vadd.f32 %v2124_v61, %v7829_v18 }
0x2898   :  { %v2127_v63 = vmul.f32 0.5, %v2126_v62 }
0x289a   :  { %7424 = vtanh.f32 %v2127_v63 }
0x28a4   :  { %v7425_v36 = vpop.eup %7424 }
0x28a5   :  { %v2129_v0 = vmul.f32 0.5, %v7425_v36 }
0x28a7   :  { %v2130_v4 = vadd.f32 0.5, %v2129_v0 }
0x28a9   :  { %v2141_v17 = vsub.f32 1.0, %v2130_v4  ;;  %v2149_v31 = vmul.f32 %v2147_v15, %v2130_v4 }
0x2908   :  { %v2132_v22 = vpop.permute.xlu0 %2131 }
0x2909   :  { %v2134_v5 = vmul.f32 %v2132_v22, %v2130_v4 }
0x290b   :  { %2136 = vrot.lane.b32.xlu1 %v2134_v5, %s7522_s2 }
0x297d   :  { %v2137_v37 = vpop.permute.xlu1 %2136 }
0x297e   :  { %v2139_v10 = vadd.f32 %v2137_v37, %v7829_v18 }
0x2980   :  { %7426 = vtanh.f32 %v2139_v10 }
0x298a   :  { %v7427_v12 = vpop.eup %7426 }
0x298b   :  { %2143 = vrot.lane.b32.xlu0 %v7427_v12, %s7526_s30 }
0x298f   :  { %2454 = vrot.lane.b32.xlu0 %v7908_v13, %s7522_s2 }
0x29fd   :  { %v2144_v19 = vpop.permute.xlu0 %2143 }
0x29fe   :  { %v2146_v23 = vmul.f32 %v2144_v19, %v2141_v17 }
0x2a00   :  { %v7912_v26 = vadd.f32 %v2149_v31, %v2146_v23 }
0x2a02   :  { %v2152_v18 = vrot.slane %v7912_v26, 6 }
0x2a04   :  { %2153 = vrot.lane.b32.xlu1 %v2152_v18, %s7526_s30 }
0x2a76   :  { %v2154_v27 = vpop.permute.xlu1 %2153 }
0x2a77   :  { %6461 = vmatmul.mubr.msk.f32.vlgmr.msra.gmra.mrb[20].mxu0 %vm158_vm3, %v2154_v27 }
0x2a78   :  { %6475 = vmatpush3.msk.msra.mxu0 %vm54_vm0, %v2355_v11  ;;  %6476 = vmatprep.mubr.msk.f32.mxu0 %vm47_vm1, %v7811_v9 }
0x2a79   :  { %7081 = vmatprep.subr.bf16.mxu0 %v7523_v21 }
0x2a7b   :  { %6477 = vmatmul.mubr.msk.f32.vlgmr.msra.gmra.mrb[22].mxu0 %vm47_vm1, %v7820_v25  ;;  %v2455_v25 = vpop.permute.xlu0 %2454 }
0x2a7c   :  { %6487 = vmatprep.mubr.msk.f32.mxu0 %vm7524_vm2, %v7525_v24  ;;  %7083 = vmatpush3.bf16.msra.mxu0 %v7935_v14 }
0x2a7d   :  { %7084 = vmatprep.subr.bf16.mxu0 %v7523_v21 }
0x2a80   :  { %7086 = vmatpush3.bf16.msra.mxu0 %v7938_v50 }
0x2a81   :  { %7093 = vmatprep.subr.bf16.mxu0 %v7523_v21 }
0x2b4a   :  { %v2223_v28 = vpop.f32.mrb[20].mxu0 }
0x2b4b   :  { %v6462_v30 = vpop.f32.mrb[21].mxu0  ;;  %v2224_v52 = vadd.f32 %v7800_v60, %v2223_v28 }
0x2b4d   :  { %v2227_v53 = vadd.f32 %v2224_v52, %v7827_v16 }
0x2b4e   :  { %v6478_v1 = vpop.f32.mrb[22].mxu0 }
0x2b4f   :  { %v7927_v34 = vadd.f32 %v6478_v1, %v5856_v32  ;;  %v2439_v35 = vpop.f32.mrb[23].mxu0  ;;  %v2228_v43 = vmul.f32 0.5, %v2227_v53 }
0x2b50   :  { %v7929_v2 = vadd.f32 %v5856_v32, %v2439_v35 }
0x2b51   :  { %v2448_v9 = vadd.f32 %v7908_v13, %v7927_v34 }
0x2b53   :  { %v2449_v38 = vmul.f32 0.5, %v2448_v9 }
0x2b55   :  { %7428 = vtanh.f32 %v2449_v38 }
0x2b5f   :  { %v7429_v39 = vpop.eup %7428 }
0x2b60   :  { %v2451_v40 = vmul.f32 0.5, %v7429_v39 }
0x2b62   :  { %v2452_v41 = vadd.f32 0.5, %v2451_v40 }
0x2b64   :  { %v2457_v8 = vmul.f32 %v2455_v25, %v2452_v41  ;;  %v2464_v55 = vsub.f32 1.0, %v2452_v41 }
0x2b66   :  { %2459 = vrot.lane.b32.xlu1 %v2457_v8, %s7522_s2 }
0x2bd8   :  { %v2460_v42 = vpop.permute.xlu1 %2459 }
0x2bd9   :  { %v2462_v44 = vadd.f32 %v2460_v42, %v7927_v34 }
0x2bdb   :  { %7430 = vtanh.f32 %v2462_v44 }
0x2bdc   :  { %7432 = vtanh.f32 %v2228_v43 }
0x2be5   :  { %v7431_v51 = vpop.eup %7430 }
0x2be6   :  { %2466 = vrot.lane.b32.xlu0 %v7431_v51, %s7526_s30  ;;  %v7433_v54 = vpop.eup %7432 }
0x2be7   :  { %v2230_v3 = vmul.f32 0.5, %v7433_v54 }
0x2be9   :  { %v2231_v61 = vadd.f32 0.5, %v2230_v3 }
0x2bea   :  { %2233 = vrot.lane.b32.xlu0 %v2224_v52, %s7522_s2 }
0x2beb   :  { %v2243_v5 = vsub.f32 1.0, %v2231_v61  ;;  %v2250_v10 = vmul.f32 %v2231_v61, %v2152_v18 }
0x2c58   :  { %v2467_v56 = vpop.permute.xlu0 %2466 }
0x2c59   :  { %v2469_v45 = vmul.f32 %v2467_v56, %v2464_v55 }
0x2c5b   :  { %v2471_v59 = vrot.slane %v2469_v45, 2 }
0x2c5c   :  { %v2234_v62 = vpop.permute.xlu0 %2233 }
0x2c5d   :  { %v2236_v63 = vmul.f32 %v2234_v62, %v2231_v61  ;;  %2472 = vrot.lane.b32.xlu1 %v2471_v59, %s7526_s30 }
0x2c5f   :  { %2238 = vrot.lane.b32.xlu0 %v2236_v63, %s7522_s2 }
0x2ccf   :  { %v2473_v36 = vpop.permute.xlu1 %2472 }
0x2cd0   :  { %6488 = vmatmul.mubr.msk.f32.vlgmr.msra.gmra.mrb[24].mxu0 %vm158_vm3, %v2473_v36 }
0x2cd1   :  { %v2239_v0 = vpop.permute.xlu0 %2238  ;;  %7095 = vmatpush3.bf16.msra.mxu0 %v7935_v14  ;;  %6509 = vmatprep.mubr.msk.f32.mxu0 %vm7524_vm2, %v7525_v24 }
0x2cd2   :  { %v2241_v4 = vadd.f32 %v2239_v0, %v7827_v16  ;;  %7096 = vmatprep.subr.bf16.mxu0 %v7523_v21 }
0x2cd4   :  { %7434 = vtanh.f32 %v2241_v4 }
0x2cd5   :  { %7098 = vmatpush3.bf16.msra.mxu0 %v7938_v50 }
0x2cd6   :  { %7105 = vmatprep.subr.bf16.mxu0 %v7523_v21 }
0x2cde   :  { %v7435_v22 = vpop.eup %7434 }
0x2cdf   :  { %2245 = vrot.lane.b32.xlu0 %v7435_v22, %s7526_s30 }
0x2d51   :  { %v2246_v37 = vpop.permute.xlu0 %2245 }
0x2d52   :  { %v2248_v11 = vmul.f32 %v2246_v37, %v2243_v5 }
0x2d54   :  { %v7960_v12 = vadd.f32 %v2250_v10, %v2248_v11 }
0x2d56   :  { %2253 = vrot.lane.b32.xlu0 %v7960_v12, %s7526_s30 }
0x2da3   :  { %v2542_v15 = vpop.f32.mrb[24].mxu0 }
0x2da4   :  { %v2543_v17 = vadd.f32 %v7908_v13, %v2542_v15  ;;  %v6489_v19 = vpop.f32.mrb[25].mxu0 }
0x2da6   :  { %2552 = vrot.lane.b32.xlu1 %v2543_v17, %s7522_s2  ;;  %v2546_v23 = vadd.f32 %v2543_v17, %v7927_v34 }
0x2da8   :  { %v2547_v26 = vmul.f32 0.5, %v2546_v23 }
0x2daa   :  { %7436 = vtanh.f32 %v2547_v26 }
0x2db4   :  { %v7437_v18 = vpop.eup %7436 }
0x2db5   :  { %v2549_v27 = vmul.f32 0.5, %v7437_v18 }
0x2db7   :  { %v2550_v28 = vadd.f32 0.5, %v2549_v27 }
0x2db9   :  { %v2562_v40 = vsub.f32 1.0, %v2550_v28  ;;  %v2569_v41 = vmul.f32 %v2550_v28, %v2471_v59 }
0x2dc8   :  { %v2254_v31 = vpop.permute.xlu0 %2253 }
0x2dc9   :  { %6472 = vmatmul.mubr.msk.f32.vlgmr.msra.gmra.mrb[20].mxu1 %vm158_vm3, %v2254_v31 }
0x2dca   :  { %7089 = vmatpush3.bf16.msra.mxu1 %v7935_v14  ;;  %6498 = vmatprep.mubr.msk.f32.mxu1 %vm7524_vm2, %v7525_v24 }
0x2dcb   :  { %7090 = vmatprep.subr.bf16.mxu1 %v7523_v21 }
0x2dce   :  { %7092 = vmatpush3.bf16.msra.mxu1 %v7938_v50 }
0x2dcf   :  { %7099 = vmatprep.subr.bf16.mxu1 %v7523_v21 }
0x2e18   :  { %v2553_v30 = vpop.permute.xlu1 %2552 }
0x2e19   :  { %v2555_v32 = vmul.f32 %v2553_v30, %v2550_v28 }
0x2e1b   :  { %2557 = vrot.lane.b32.xlu1 %v2555_v32, %s7522_s2 }
0x2e8d   :  { %v2558_v1 = vpop.permute.xlu1 %2557 }
0x2e8e   :  { %v2560_v35 = vadd.f32 %v2558_v1, %v7927_v34 }
0x2e90   :  { %7438 = vtanh.f32 %v2560_v35 }
0x2e9a   :  { %v7439_v9 = vpop.eup %7438 }
0x2e9b   :  { %2564 = vrot.lane.b32.xlu1 %v7439_v9, %s7526_s30 }
0x2e9c   :  { %v7977_v38 = vpop.f32.mrb[20].mxu1 }
0x2e9d   :  { %v6473_v39 = vpop.f32.mrb[21].mxu1 }
0x2f0d   :  { %v2565_v25 = vpop.permute.xlu1 %2564 }
0x2f0e   :  { %v2567_v8 = vmul.f32 %v2565_v25, %v2562_v40 }
0x2f10   :  { %v2570_v42 = vadd.f32 %v2569_v41, %v2567_v8 }
0x2f12   :  { %2572 = vrot.lane.b32.xlu1 %v2570_v42, %s7526_s30  ;;  %v2670_v59 = vrot.slane %v2570_v42, 2 }
0x2f84   :  { %v2573_v44 = vpop.permute.xlu1 %2572 }
0x2f85   :  { %6499 = vmatmul.mubr.msk.f32.vlgmr.msra.gmra.mrb[22].mxu1 %vm158_vm3, %v2573_v44 }
0x2f86   :  { %7101 = vmatpush3.bf16.msra.mxu1 %v7935_v14  ;;  %6520 = vmatprep.mubr.msk.f32.mxu1 %vm7524_vm2, %v7525_v24 }
0x2f87   :  { %7102 = vmatprep.subr.bf16.mxu1 %v7523_v21 }
0x2f8a   :  { %7104 = vmatpush3.bf16.msra.mxu1 %v7938_v50 }
0x2f8b   :  { %7111 = vmatprep.subr.bf16.mxu1 %v7523_v21 }
0x3058   :  { %v2642_v34 = vpop.f32.mrb[22].mxu1 }
0x3059   :  { %v2643_v46 = vadd.f32 %v7908_v13, %v2642_v34  ;;  %v6500_v47 = vpop.f32.mrb[23].mxu1 }
0x305b   :  { %v2647_v48 = vrot.slane %v2643_v46, 2 }
0x305d   :  { %2654 = vrot.lane.b32.xlu0 %v2647_v48, %s7522_s2  ;;  %v2649_v49 = vadd.f32 %v2647_v48, %v7929_v2 }
0x305f   :  { %v2650_v51 = vmul.f32 0.5, %v2649_v49 }
0x3061   :  { %7440 = vtanh.f32 %v2650_v51 }
0x306b   :  { %v7441_v52 = vpop.eup %7440 }
0x306c   :  { %v2652_v53 = vmul.f32 0.5, %v7441_v52 }
0x306e   :  { %v2653_v43 = vadd.f32 0.5, %v2652_v53 }
0x3070   :  { %v2664_v61 = vsub.f32 1.0, %v2653_v43  ;;  %v2672_v63 = vmul.f32 %v2670_v59, %v2653_v43 }
0x30cf   :  { %v2655_v54 = vpop.permute.xlu0 %2654 }
0x30d0   :  { %v2657_v55 = vmul.f32 %v2655_v54, %v2653_v43  ;;  %v7492_v54 = vld [vmem:[#allocation2 + $0x30] ss:$0 sm:$0xff] }
0x30d2   :  { %2659 = vrot.lane.b32.xlu1 %v2657_v55, %s7522_s2  ;;  %v848_v55 = vadd.f32 %v7492_v54, %v7742_v29 }
0x3144   :  { %v2660_v3 = vpop.permute.xlu1 %2659 }
0x3145   :  { %v2662_v56 = vadd.f32 %v2660_v3, %v7929_v2  ;;  %v7493_v3 = vld [vmem:[#allocation2 + $0x68] ss:$0 sm:$0xff] }
0x3147   :  { %7442 = vtanh.f32 %v2662_v56  ;;  %v1687_v56 = vadd.f32 %v7493_v3, %v7878_v20  ;;  %v2989_v3 = vld [vmem:[#allocation2 + $0xf0] sm:$0xff] }
0x3149   :  { %v1690_v59 = vadd.f32 %v1687_v56, %v7695_v33 }
0x3151   :  { %v7443_v45 = vpop.eup %7442 }
0x3152   :  { %2666 = vrot.lane.b32.xlu0 %v7443_v45, %s7526_s30  ;;  %v852_v45 = vrot.slane %v848_v55, 2 }
0x31c4   :  { %v2667_v62 = vpop.permute.xlu0 %2666 }
0x31c5   :  { %v2669_v36 = vmul.f32 %v2667_v62, %v2664_v61  ;;  %v854_v61 = vadd.f32 %v852_v45, %v7579_v6  ;;  %v1691_v62 = vmul.f32 0.5, %v1690_v59 }
0x31c7   :  { %v2673_v0 = vadd.f32 %v2672_v63, %v2669_v36  ;;  %v855_v63 = vmul.f32 0.5, %v854_v61 }
0x31c9   :  { %v2675_v4 = vrot.slane %v2673_v0, 6  ;;  %v2774_v28 = vrot.slane %v2673_v0, 2 }
0x31cb   :  { %2676 = vrot.lane.b32.xlu1 %v2675_v4, %s7526_s30 }
0x323d   :  { %v2677_v22 = vpop.permute.xlu1 %2676 }
0x323e   :  { %6510 = vmatmul.mubr.msk.f32.vlgmr.msra.gmra.mrb[26].mxu0 %vm158_vm3, %v2677_v22 }
0x323f   :  { %7107 = vmatpush3.bf16.msra.mxu0 %v7935_v14  ;;  %6531 = vmatprep.mubr.msk.f32.mxu0 %vm7524_vm2, %v7525_v24 }
0x3240   :  { %7108 = vmatprep.subr.bf16.mxu0 %v7523_v21 }
0x3243   :  { %7110 = vmatpush3.bf16.msra.mxu0 %v7938_v50 }
0x3244   :  { %7117 = vmatprep.subr.bf16.mxu0 %v7523_v21 }
0x3311   :  { %v2746_v5 = vpop.f32.mrb[26].mxu0 }
0x3312   :  { %v2747_v37 = vadd.f32 %v7908_v13, %v2746_v5  ;;  %v6511_v10 = vpop.f32.mrb[27].mxu0 }
0x3314   :  { %v2751_v11 = vrot.slane %v2747_v37, 4 }
0x3316   :  { %2758 = vrot.lane.b32.xlu0 %v2751_v11, %s7522_s2  ;;  %v2753_v15 = vadd.f32 %v2751_v11, %v7929_v2 }
0x3318   :  { %v2754_v17 = vmul.f32 0.5, %v2753_v15 }
0x331a   :  { %7444 = vtanh.f32 %v2754_v17 }
0x3324   :  { %v7445_v14 = vpop.eup %7444 }
0x3325   :  { %v2756_v19 = vmul.f32 0.5, %v7445_v14 }
0x3327   :  { %v2757_v31 = vadd.f32 0.5, %v2756_v19 }
0x3329   :  { %v2768_v30 = vsub.f32 1.0, %v2757_v31  ;;  %v2776_v1 = vmul.f32 %v2774_v28, %v2757_v31 }
0x3388   :  { %v2759_v23 = vpop.permute.xlu0 %2758 }
0x3389   :  { %v2761_v26 = vmul.f32 %v2759_v23, %v2757_v31 }
0x338b   :  { %2763 = vrot.lane.b32.xlu1 %v2761_v26, %s7522_s2 }
0x33fd   :  { %v2764_v50 = vpop.permute.xlu1 %2763 }
0x33fe   :  { %v2766_v18 = vadd.f32 %v2764_v50, %v7929_v2 }
0x3400   :  { %7446 = vtanh.f32 %v2766_v18 }
0x340a   :  { %v7447_v27 = vpop.eup %7446 }
0x340b   :  { %2770 = vrot.lane.b32.xlu0 %v7447_v27, %s7526_s30 }
0x347d   :  { %v2771_v32 = vpop.permute.xlu0 %2770 }
0x347e   :  { %v2773_v35 = vmul.f32 %v2771_v32, %v2768_v30 }
0x3480   :  { %v2777_v9 = vadd.f32 %v2776_v1, %v2773_v35 }
0x3482   :  { %v2779_v39 = vrot.slane %v2777_v9, 4  ;;  %v2878_v0 = vrot.slane %v2777_v9, 2 }
0x3484   :  { %2780 = vrot.lane.b32.xlu1 %v2779_v39, %s7526_s30 }
0x34f6   :  { %v2781_v40 = vpop.permute.xlu1 %2780 }
0x34f7   :  { %6521 = vmatmul.mubr.msk.f32.vlgmr.msra.gmra.mrb[24].mxu1 %vm158_vm3, %v2781_v40 }
0x34f8   :  { %6542 = vmatprep.mubr.msk.f32.mxu1 %vm7524_vm2, %v7525_v24 }
0x35ca   :  { %v2850_v25 = vpop.f32.mrb[24].mxu1 }
0x35cb   :  { %v2851_v41 = vadd.f32 %v7908_v13, %v2850_v25  ;;  %v6522_v8 = vpop.f32.mrb[25].mxu1 }
0x35cd   :  { %v2855_v42 = vrot.slane %v2851_v41, 6 }
0x35cf   :  { %2862 = vrot.lane.b32.xlu0 %v2855_v42, %s7522_s2  ;;  %v2857_v44 = vadd.f32 %v2855_v42, %v7929_v2 }
0x35d1   :  { %v2858_v34 = vmul.f32 0.5, %v2857_v44 }
0x35d3   :  { %7448 = vtanh.f32 %v2858_v34 }
0x35dd   :  { %v7449_v46 = vpop.eup %7448 }
0x35de   :  { %v2860_v47 = vmul.f32 0.5, %v7449_v46 }
0x35e0   :  { %v2861_v48 = vadd.f32 0.5, %v2860_v47 }
0x35e2   :  { %v2872_v4 = vsub.f32 1.0, %v2861_v48  ;;  %v2880_v20 = vmul.f32 %v2878_v0, %v2861_v48 }
0x3641   :  { %v2863_v49 = vpop.permute.xlu0 %2862 }
0x3642   :  { %v2865_v51 = vmul.f32 %v2863_v49, %v2861_v48 }
0x3644   :  { %2867 = vrot.lane.b32.xlu1 %v2865_v51, %s7522_s2 }
0x36b6   :  { %v2868_v52 = vpop.permute.xlu1 %2867 }
0x36b7   :  { %v2870_v53 = vadd.f32 %v2868_v52, %v7929_v2  ;;  %v2987_v52 = vld [vmem:[#allocation2 + $0xe0] sm:$0xff] }
0x36b9   :  { %7450 = vtanh.f32 %v2870_v53  ;;  %v2988_v53 = vld [vmem:[#allocation2 + $0xe8] sm:$0xff] }
0x36ba   :  { %7452 = vtanh.f32 %v1691_v62  ;;  %v7118_v54 = vpack.c.bf16 %v2988_v53, %v2987_v52  ;;  %v3245_v53 = vld [vmem:[#allocation2 + $0x188] sm:$0xff] }
0x36bb   :  { %7454 = vtanh.f32 %v855_v63 }
0x36c3   :  { %v7451_v43 = vpop.eup %7450 }
0x36c4   :  { %2874 = vrot.lane.b32.xlu0 %v7451_v43, %s7526_s30  ;;  %v7453_v36 = vpop.eup %7452 }
0x36c5   :  { %v1693_v29 = vmul.f32 0.5, %v7453_v36  ;;  %v7455_v22 = vpop.eup %7454 }
0x36c6   :  { %v857_v15 = vmul.f32 0.5, %v7455_v22 }
0x36c7   :  { %v8025_v11 = vadd.f32 0.5, %v1693_v29 }
0x36c8   :  { %1696 = vrot.lane.b32.xlu0 %v1687_v56, %s7522_s2  ;;  %v8033_v31 = vadd.f32 0.5, %v857_v15  ;;  %v2990_v56 = vld [vmem:[#allocation2 + $0xf8] sm:$0xff]  ;;  %v2992_v15 = vld [vmem:[#allocation2 + $0x108] sm:$0xff] }
0x36c9   :  { %v7121_v61 = vpack.c.bf16 %v2990_v56, %v2989_v3  ;;  %v5867_v56 = vld [vmem:[#allocation2 + $0x120] ss:$0 sm:$0xff] }
0x36ca   :  { %v869_v0 = vsub.f32 1.0, %v8033_v31 }
0x36cc   :  { %859 = vrot.lane.b32.xlu0 %v852_v45, %s7522_s2  ;;  %v1706_v45 = vsub.f32 1.0, %v8025_v11 }
0x3736   :  { %v2875_v5 = vpop.permute.xlu0 %2874 }
0x3737   :  { %v2877_v37 = vmul.f32 %v2875_v5, %v2872_v4  ;;  %v1713_v4 = vmul.f32 %v8025_v11, %v1615_v58 }
0x3739   :  { %v8023_v10 = vadd.f32 %v2880_v20, %v2877_v37 }
0x373a   :  { %v1697_v17 = vpop.permute.xlu0 %1696 }
0x373b   :  { %v2883_v14 = vrot.slane %v8023_v10, 2  ;;  %v1699_v19 = vmul.f32 %v1697_v17, %v8025_v11  ;;  %v2993_v17 = vld [vmem:[#allocation2 + $0x110] sm:$0xff] }
0x373d   :  { %2884 = vrot.lane.b32.xlu1 %v2883_v14, %s7526_s30  ;;  %1701 = vrot.lane.b32.xlu0 %v1699_v19, %s7522_s2 }
0x373e   :  { %v860_v23 = vpop.permute.xlu0 %859 }
0x373f   :  { %v862_v26 = vmul.f32 %v860_v23, %v8033_v31 }
0x3741   :  { %864 = vrot.lane.b32.xlu0 %v862_v26, %s7522_s2  ;;  %v2994_v26 = vld [vmem:[#allocation2 + $0x118] sm:$0xff] }
0x37af   :  { %v2885_v50 = vpop.permute.xlu1 %2884  ;;  %v1702_v18 = vpop.permute.xlu0 %1701 }
0x37b0   :  { %v1704_v27 = vadd.f32 %v1702_v18, %v7695_v33  ;;  %6532 = vmatmul.mubr.msk.f32.vlgmr.msra.gmra.mrb[28].mxu0 %vm158_vm3, %v2885_v50  ;;  %v2324_v33 = vadd.f32 %v7800_v60, %v7977_v38 }
0x37b1   :  { %6553 = vmatprep.mubr.msk.f32.mxu0 %vm7524_vm2, %v7525_v24  ;;  %7119 = vmatpush3.bf16.msra.mxu0 %v7118_v54 }
0x37b2   :  { %7456 = vtanh.f32 %v1704_v27  ;;  %v2328_v40 = vrot.slane %v2324_v33, 6  ;;  %7120 = vmatprep.subr.bf16.mxu0 %v7523_v21 }
0x37b3   :  { %v865_v28 = vpop.permute.xlu0 %864 }
0x37b4   :  { %v867_v30 = vadd.f32 %v865_v28, %v7579_v6  ;;  %v2330_v25 = vadd.f32 %v2328_v40, %v7827_v16  ;;  %v2351_v28 = vrot.slane %v7960_v12, 6  ;;  %v3154_v12 = vld [vmem:[#allocation2 + $0x128] sm:$0xff] }
0x37b5   :  { %7122 = vmatpush3.bf16.msra.mxu0 %v7121_v61 }
0x37b6   :  { %7458 = vtanh.f32 %v867_v30  ;;  %v2331_v8 = vmul.f32 0.5, %v2330_v25  ;;  %7135 = vmatprep.subr.bf16.mxu0 %v7523_v21 }
0x37bc   :  { %v7457_v32 = vpop.eup %7456 }
0x37bd   :  { %1708 = vrot.lane.b32.xlu0 %v7457_v32, %s7526_s30 }
0x37c0   :  { %v7459_v1 = vpop.eup %7458 }
0x37c1   :  { %871 = vrot.lane.b32.xlu0 %v7459_v1, %s7526_s30 }
0x382f   :  { %v1709_v51 = vpop.permute.xlu0 %1708 }
0x3830   :  { %v1711_v36 = vmul.f32 %v1709_v51, %v1706_v45  ;;  %v3244_v51 = vld [vmem:[#allocation2 + $0x180] sm:$0xff] }
0x3832   :  { %v1714_v22 = vadd.f32 %v1713_v4, %v1711_v36  ;;  %v3247_v36 = vld [vmem:[#allocation2 + $0x198] sm:$0xff]  ;;  %v3342_v4 = vld [vmem:[#allocation2 + $0x1d0] sm:$0xff] }
0x3833   :  { %v872_v62 = vpop.permute.xlu0 %871 }
0x3834   :  { %v874_v29 = vmul.f32 %v872_v62, %v869_v0  ;;  %v1716_v19 = vrot.slane %v1714_v22, 2 }
0x3883   :  { %v2954_v35 = vpop.f32.mrb[28].mxu0 }
0x3884   :  { %v2955_v9 = vadd.f32 %v7908_v13, %v2954_v35  ;;  %v6533_v39 = vpop.f32.mrb[29].mxu0 }
0x3886   :  { %2964 = vrot.lane.b32.xlu1 %v2955_v9, %s7522_s2  ;;  %v2958_v6 = vadd.f32 %v2955_v9, %v7929_v2 }
0x3888   :  { %v2959_v41 = vmul.f32 0.5, %v2958_v6 }
0x388a   :  { %2335 = vrot.lane.b32.xlu1 %v2328_v40, %s7522_s2  ;;  %7460 = vtanh.f32 %v2959_v41  ;;  %v3156_v41 = vld [vmem:[#allocation2 + $0x138] sm:$0xff] }
0x388b   :  { %7462 = vtanh.f32 %v2331_v8  ;;  %v3157_v8 = vld [vmem:[#allocation2 + $0x140] sm:$0xff] }
0x3894   :  { %v7461_v42 = vpop.eup %7460 }
0x3895   :  { %v2961_v44 = vmul.f32 0.5, %v7461_v42  ;;  %v7463_v34 = vpop.eup %7462 }
0x3896   :  { %v2333_v38 = vmul.f32 0.5, %v7463_v34  ;;  %v3158_v34 = vld [vmem:[#allocation2 + $0x148] sm:$0xff] }
0x3897   :  { %v2962_v60 = vadd.f32 0.5, %v2961_v44  ;;  %v7127_v44 = vpack.c.bf16 %v3157_v8, %v3156_v41 }
0x3898   :  { %v2334_v47 = vadd.f32 0.5, %v2333_v38 }
0x3899   :  { %v2974_v11 = vsub.f32 1.0, %v2962_v60  ;;  %v2981_v18 = vmul.f32 %v2962_v60, %v2883_v14  ;;  %v3155_v14 = vld [vmem:[#allocation2 + $0x130] sm:$0xff] }
0x389a   :  { %v2345_v32 = vsub.f32 1.0, %v2334_v47  ;;  %v2353_v35 = vmul.f32 %v2351_v28, %v2334_v47  ;;  %v7124_v25 = vpack.c.bf16 %v3155_v14, %v3154_v12 }
0x38f8   :  { %v2965_v13 = vpop.permute.xlu1 %2964 }
0x38f9   :  { %v2967_v46 = vmul.f32 %v2965_v13, %v2962_v60  ;;  %v3159_v60 = vld [vmem:[#allocation2 + $0x150] sm:$0xff]  ;;  %v3160_v13 = vld [vmem:[#allocation2 + $0x158] sm:$0xff] }
0x38fa   :  { %v7130_v38 = vpack.c.bf16 %v3159_v60, %v3158_v34 }
0x38fb   :  { %2969 = vrot.lane.b32.xlu1 %v2967_v46, %s7522_s2  ;;  %v3161_v46 = vld [vmem:[#allocation2 + $0x160] sm:$0xff] }
0x38fc   :  { %v2336_v48 = vpop.permute.xlu1 %2335 }
0x38fd   :  { %v2338_v49 = vmul.f32 %v2336_v48, %v2334_v47  ;;  %v7133_v47 = vpack.c.bf16 %v3161_v46, %v3160_v13  ;;  %v3242_v48 = vld [vmem:[#allocation2 + $0x170] sm:$0xff] }
0x38ff   :  { %2340 = vrot.lane.b32.xlu1 %v2338_v49, %s7522_s2  ;;  %v3243_v49 = vld [vmem:[#allocation2 + $0x178] sm:$0xff] }
0x3900   :  { %v7136_v52 = vpack.c.bf16 %v3243_v49, %v3242_v48  ;;  %v3495_v48 = vld [vmem:[#allocation2 + $0x228] sm:$0xff]  ;;  %v3496_v49 = vld [vmem:[#allocation2 + $0x230] sm:$0xff] }
0x396d   :  { %v2970_v43 = vpop.permute.xlu1 %2969 }
0x396e   :  { %v2972_v55 = vadd.f32 %v2970_v43, %v7929_v2  ;;  %v875_v2 = vrot.slane %v7725_v7, 6  ;;  %v7115_v7 = vpack.c.bf16 %v2994_v26, %v2993_v17 }
0x3970   :  { %7464 = vtanh.f32 %v2972_v55  ;;  %v877_v5 = vmul.f32 %v875_v2, %v8033_v31  ;;  %v7139_v55 = vpack.c.bf16 %v3245_v53, %v3244_v51  ;;  %v3341_v2 = vld [vmem:[#allocation2 + $0x1c8] sm:$0xff] }
0x3971   :  { %v2341_v59 = vpop.permute.xlu1 %2340  ;;  %v7145_v22 = vpack.c.bf16 %v3342_v4, %v3341_v2 }
0x3972   :  { %v2343_v63 = vadd.f32 %v2341_v59, %v7827_v16  ;;  %v878_v20 = vadd.f32 %v877_v5, %v874_v29  ;;  %v2991_v16 = vld [vmem:[#allocation2 + $0x100] sm:$0xff]  ;;  %v3343_v29 = vld [vmem:[#allocation2 + $0x1d8] sm:$0xff] }
0x3973   :  { %v7112_v23 = vpack.c.bf16 %v2992_v15, %v2991_v16  ;;  %v3344_v5 = vld [vmem:[#allocation2 + $0x1e0] sm:$0xff]  ;;  %v3337_v16 = vld [vmem:[#allocation2 + $0x1a8] sm:$0xff]  ;;  %v3338_v15 = vld [vmem:[#allocation2 + $0x1b0] sm:$0xff] }
0x3974   :  { %7466 = vtanh.f32 %v2343_v63  ;;  %v1718_v50 = vadd.f32 %v1716_v19, %v878_v20  ;;  %v3246_v63 = vld [vmem:[#allocation2 + $0x190] sm:$0xff]  ;;  %v7148_v20 = vpack.c.bf16 %v3344_v5, %v3343_v29  ;;  %v7151_v26 = vpack.c.bf16 %v3338_v15, %v3337_v16  ;;  %v3504_v29 = vld [vmem:[#allocation2 + $0x278] sm:$0xff]  ;;  %v3518_v16 = vld [vmem:[#allocation2 + $0x2a0] sm:$0xff] }
0x3975   :  { %7113 = vmatpush3.bf16.msra.mxu1 %v7112_v23  ;;  %v7142_v0 = vpack.c.bf16 %v3247_v36, %v3246_v63 }
0x3976   :  { %7114 = vmatprep.subr.bf16.mxu1 %v7523_v21  ;;  %v3072_v58 = vrot.slane %v1718_v50, 6 }
0x3979   :  { %7116 = vmatpush3.bf16.msra.mxu1 %v7115_v7  ;;  %v3339_v7 = vld [vmem:[#allocation2 + $0x1b8] sm:$0xff] }
0x397a   :  { %v7465_v37 = vpop.eup %7464  ;;  %7123 = vmatprep.subr.bf16.mxu1 %v7523_v21 }
0x397b   :  { %2976 = vrot.lane.b32.xlu1 %v7465_v37, %s7526_s30  ;;  %v5868_v37 = vld [vmem:[#allocation2 + $0x168] ss:$0 sm:$0xff] }
0x397e   :  { %v7467_v57 = vpop.eup %7466 }
0x397f   :  { %2347 = vrot.lane.b32.xlu1 %v7467_v57, %s7526_s30  ;;  %v3340_v57 = vld [vmem:[#allocation2 + $0x1c0] sm:$0xff] }
0x3983   :  { %3073 = vrot.lane.b32.xlu1 %v3072_v58, %s7526_s30  ;;  %v7154_v58 = vpack.c.bf16 %v3340_v57, %v3339_v7 }
0x39ed   :  { %v2977_v31 = vpop.permute.xlu1 %2976 }
0x39ee   :  { %v2979_v27 = vmul.f32 %v2977_v31, %v2974_v11  ;;  %v8103_v11 = vld [vmem:[#allocation2 + $0x218] ss:$0 sm:$0xff]  ;;  %v5870_v31 = vld [vmem:[#allocation2 + $0x1a0] ss:$0 sm:$0xff] }
0x39f0   :  { %v2982_v30 = vadd.f32 %v2981_v18, %v2979_v27 }
0x39f1   :  { %v2348_v1 = vpop.permute.xlu1 %2347 }
0x39f2   :  { %v2350_v33 = vmul.f32 %v2348_v1, %v2345_v32  ;;  %v2984_v9 = vrot.slane %v2982_v30, 6  ;;  %v8107_v30 = vld [vmem:[#allocation2 + $0x1e8] sm:$0xf] }
0x39f3   :  { %v7494_v32 = vld [vmem:[%s8469_s0 + $0x8] sm:$0xff] }
0x39f4   :  { %v2354_v39 = vadd.f32 %v2353_v35, %v2350_v33  ;;  %v3527_v1 = vrot.slane %v7494_v32, 6  ;;  %v3329_v32 = vld [vmem:[#allocation2 + $0x1f8] sm:$0xff] }
0x39f5   :  { %v8072_v40 = vpop.permute.xlu1 %3073 }
0x39f6   :  { %v2986_v6 = vadd.f32 %v2984_v9, %v2354_v39  ;;  %6554 = vmatmul.mubr.msk.f32.vlgmr.msra.gmra.mrb[30].mxu0 %vm158_vm3, %v8072_v40  ;;  %v5875_v39 = vld [vmem:[#allocation2 + $0x210] ss:$0 sm:$0xff] }
0x39f7   :  { %6587 = vmatprep.mubr.msk.f32.mxu0 %vm7524_vm2, %v7525_v24  ;;  %7137 = vmatpush3.bf16.msra.mxu0 %v7136_v52  ;;  %v3497_v52 = vld [vmem:[#allocation2 + $0x238] sm:$0xff] }
0x39f8   :  { %v2996_v10 = vrot.slane %v2986_v6, 2  ;;  %7138 = vmatprep.subr.bf16.mxu0 %v7523_v21  ;;  %v8129_v53 = vpack.c.bf16 %v3497_v52, %v3496_v49 }
0x39fa   :  { %2997 = vrot.lane.b32.xlu0 %v2996_v10, %s7526_s30 }
0x39fb   :  { %7140 = vmatpush3.bf16.msra.mxu0 %v7139_v55  ;;  %v3499_v55 = vld [vmem:[#allocation2 + $0x250] sm:$0xff] }
0x39fc   :  { %7141 = vmatprep.subr.bf16.mxu0 %v7523_v21 }
0x39fe   :  { %3610 = vrot.lane.b32.xlu0 %v8103_v11, %s7522_s2 }
0x39ff   :  { %7143 = vmatpush3.bf16.msra.mxu0 %v7142_v0 }
0x3a00   :  { %7150 = vmatprep.subr.bf16.mxu0 %v7523_v21 }
0x3a6c   :  { %v2998_v42 = vpop.permute.xlu0 %2997 }
0x3a6d   :  { %6543 = vmatmul.mubr.msk.f32.vlgmr.msra.gmra.mrb[26].mxu1 %vm158_vm3, %v2998_v42 }
0x3a6e   :  { %7125 = vmatpush3.bf16.msra.mxu1 %v7124_v25  ;;  %6572 = vmatprep.mubr.msk.f32.mxu1 %vm7524_vm2, %v7525_v24 }
0x3a6f   :  { %7126 = vmatprep.subr.bf16.mxu1 %v7523_v21 }
0x3a70   :  { %v3611_v34 = vpop.permute.xlu0 %3610 }
0x3a72   :  { %7128 = vmatpush3.bf16.msra.mxu1 %v7127_v44 }
0x3a73   :  { %7129 = vmatprep.subr.bf16.mxu1 %v7523_v21 }
0x3a76   :  { %7131 = vmatpush3.bf16.msra.mxu1 %v7130_v38 }
0x3a77   :  { %7132 = vmatprep.subr.bf16.mxu1 %v7523_v21 }
0x3a7a   :  { %7134 = vmatpush3.bf16.msra.mxu1 %v7133_v47  ;;  %v3494_v47 = vld [vmem:[#allocation2 + $0x220] sm:$0xff] }
0x3a7b   :  { %7144 = vmatprep.subr.bf16.mxu1 %v7523_v21  ;;  %v8126_v51 = vpack.c.bf16 %v3495_v48, %v3494_v47 }
0x3ac9   :  { %v3143_v43 = vpop.f32.mrb[30].mxu0 }
0x3aca   :  { %v6555_v54 = vpop.f32.mrb[31].mxu0 }
0x3acb   :  { %v3498_v54 = vld [vmem:[#allocation2 + $0x248] sm:$0xff] }
0x3b40   :  { %v3067_v3 = vpop.f32.mrb[26].mxu1 }
0x3b41   :  { %v3144_v45 = vadd.f32 %v3143_v43, %v3067_v3  ;;  %v6544_v59 = vpop.f32.mrb[27].mxu1  ;;  %v3500_v3 = vld [vmem:[#allocation2 + $0x258] sm:$0xff] }
0x3b43   :  { %v3152_v61 = vadd.f32 %v5867_v56, %v3144_v45  ;;  %v8135_v56 = vpack.c.bf16 %v3499_v55, %v3498_v54  ;;  %v3501_v45 = vld [vmem:[#allocation2 + $0x260] sm:$0xff] }
0x3b44   :  { %v8138_v59 = vpack.c.bf16 %v3501_v45, %v3500_v3 }
0x3b45   :  { %v3153_v62 = vmax.f32 %v3152_v61, 0.0  ;;  %v3502_v61 = vld [vmem:[#allocation2 + $0x268] sm:$0xff] }
0x3b47   :  { %6573 = vmatmul.mubr.msk.f32.vlgmr.msra.gmra.mrb[28].mxu1 %vm3167_vm4, %v3153_v62  ;;  %v3503_v62 = vld [vmem:[#allocation2 + $0x270] sm:$0xff] }
0x3b48   :  { %6598 = vmatprep.mubr.msk.f32.mxu1 %vm7524_vm2, %v7525_v24  ;;  %7146 = vmatpush3.bf16.msra.mxu1 %v7145_v22  ;;  %v8142_v63 = vpack.c.bf16 %v3503_v62, %v3502_v61  ;;  %v3505_v22 = vld [vmem:[#allocation2 + $0x280] sm:$0xff] }
0x3b49   :  { %7147 = vmatprep.subr.bf16.mxu1 %v7523_v21  ;;  %v8154_v5 = vpack.c.bf16 %v3505_v22, %v3504_v29 }
0x3b4c   :  { %7149 = vmatpush3.bf16.msra.mxu1 %v7148_v20  ;;  %v3516_v20 = vld [vmem:[#allocation2 + $0x290] sm:$0xff] }
0x3b4d   :  { %6612 = vmatprep.subr.mxu1 %v7525_v24 }
0x3c1a   :  { %v3237_v17 = vpop.f32.mrb[28].mxu1 }
0x3c1b   :  { %v3238_v19 = vadd.f32 %v5868_v37, %v3237_v17  ;;  %v6574_v23 = vpop.f32.mrb[29].mxu1  ;;  %v3517_v37 = vld [vmem:[#allocation2 + $0x298] sm:$0xff]  ;;  %v3519_v17 = vld [vmem:[#allocation2 + $0x2a8] sm:$0xff] }
0x3c1c   :  { %v8158_v15 = vpack.c.bf16 %v3517_v37, %v3516_v20  ;;  %v8166_v23 = vld [vmem:[#allocation2 + $0x240] ss:$0 sm:$0xff] }
0x3c1d   :  { %v3241_v50 = vmax.f32 %v3238_v19, 0.0  ;;  %v8161_v19 = vpack.c.bf16 %v3519_v17, %v3518_v16 }
0x3c1f   :  { %6588 = vmatmul.mubr.msk.f32.vlgmr.msra.gmra.mrb[32].mxu0 %vm3253_vm5, %v3241_v50 }
0x3c20   :  { %7152 = vmatpush3.bf16.msra.mxu0 %v7151_v26  ;;  %6609 = vmatprep.mubr.msk.f32.mxu0 %vm7524_vm2, %v7525_v24 }
0x3c21   :  { %7153 = vmatprep.subr.bf16.mxu0 %v7523_v21 }
0x3c24   :  { %7155 = vmatpush3.bf16.msra.mxu0 %v7154_v58  ;;  %v3520_v58 = vld [vmem:[#allocation2 + $0x2b0] sm:$0xff] }
0x3c25   :  { %7156 = vmatprep.subr.bf16.mxu0 %v7523_v21 }
0x3c27   :  { %6610 = vmatmul.mubr.msk.f32.vlgmr.msra.gmra.mrb[34].mxu0 %vm158_vm3, %v8072_v40 }
0x3c28   :  { %6625 = vmatprep.mubr.msk.f32.mxu0 %vm7524_vm2, %v7525_v24  ;;  %7158 = vmatpush3.bf16.msra.mxu0 %v8126_v51 }
0x3c29   :  { %7159 = vmatprep.subr.bf16.mxu0 %v7523_v21 }
0x3c2c   :  { %7161 = vmatpush3.bf16.msra.mxu0 %v8129_v53 }
0x3c2d   :  { %7174 = vmatprep.subr.bf16.mxu0 %v7523_v21 }
0x3cf2   :  { %v3323_v18 = vpop.f32.mrb[32].mxu0 }
0x3cf3   :  { %v3324_v27 = vadd.f32 %v5870_v31, %v3323_v18  ;;  %v6589_v28 = vpop.f32.mrb[33].mxu0  ;;  %v3521_v31 = vld [vmem:[#allocation2 + $0x2b8] sm:$0xff] }
0x3cf4   :  { %v8175_v18 = vpack.c.bf16 %v3521_v31, %v3520_v58  ;;  %v3328_v28 = vld [vmem:[#allocation2 + $0x1f0] sm:$0xff] }
0x3cf5   :  { %6599 = vmatmul.mubr.msk.f32.vlgmr.msra.gmra.mrb[30].mxu1 %vm158_vm3, %v3324_v27  ;;  %v8179_v27 = vld [vmem:[#allocation2 + $0x288] ss:$0 sm:$0xff] }
0x3cf6   :  { %6613 = vmatpush3.msk.msra.mxu1 %vm54_vm0, %v8107_v30  ;;  %6614 = vmatprep.mubr.msk.f32.mxu1 %vm7524_vm2, %v7525_v24 }
0x3cf7   :  { %7162 = vmatprep.subr.bf16.mxu1 %v7523_v21 }
0x3cf9   :  { %6615 = vmatmul.mubr.msk.f32.vlgmr.msra.gmra.mrb[32].mxu1 %vm47_vm1, %v3527_v1 }
0x3cfa   :  { %v3484_v35 = vpop.f32.mrb[34].mxu0  ;;  %6644 = vmatprep.mubr.msk.f32.mxu1 %vm7524_vm2, %v7525_v24  ;;  %7164 = vmatpush3.bf16.msra.mxu1 %v8135_v56 }
0x3cfb   :  { %v6611_v33 = vpop.f32.mrb[35].mxu0  ;;  %7165 = vmatprep.subr.bf16.mxu1 %v7523_v21 }
0x3cfe   :  { %7167 = vmatpush3.bf16.msra.mxu1 %v8138_v59 }
0x3cff   :  { %7168 = vmatprep.subr.bf16.mxu1 %v7523_v21 }
0x3d02   :  { %7170 = vmatpush3.bf16.msra.mxu1 %v8142_v63 }
0x3d03   :  { %7171 = vmatprep.subr.bf16.mxu1 %v7523_v21 }
0x3d06   :  { %7173 = vmatpush3.bf16.msra.mxu1 %v8154_v5 }
0x3d07   :  { %6662 = vmatprep.subr.mxu1 %v7525_v24 }
0x3dc8   :  { %v3414_v9 = vpop.f32.mrb[30].mxu1 }
0x3dc9   :  { %v3485_v40 = vadd.f32 %v3484_v35, %v3414_v9  ;;  %v6600_v6 = vpop.f32.mrb[31].mxu1  ;;  %v8182_v9 = vpack.c.bf16 %v3329_v32, %v3328_v28 }
0x3dca   :  { %v3331_v6 = vld [vmem:[#allocation2 + $0x208] sm:$0xff] }
0x3dcb   :  { %v8121_v10 = vadd.f32 %v5875_v39, %v3485_v40  ;;  %v3330_v40 = vld [vmem:[#allocation2 + $0x200] sm:$0xff] }
0x3dcc   :  { %v3599_v12 = vpop.f32.mrb[32].mxu1 }
0x3dcd   :  { %v3603_v14 = vadd.f32 %v3599_v12, %v8121_v10  ;;  %v6616_v25 = vpop.f32.mrb[33].mxu1  ;;  %v8186_v12 = vpack.c.bf16 %v3331_v6, %v3330_v40 }
0x3dcf   :  { %v3604_v41 = vadd.f32 %v8103_v11, %v3603_v14 }
0x3dd1   :  { %v3605_v8 = vmul.f32 0.5, %v3604_v41 }
0x3dd3   :  { %7468 = vtanh.f32 %v3605_v8 }
0x3ddd   :  { %v7469_v42 = vpop.eup %7468 }
0x3dde   :  { %v3607_v44 = vmul.f32 0.5, %v7469_v42 }
0x3de0   :  { %v3608_v60 = vadd.f32 0.5, %v3607_v44 }
0x3de2   :  { %v3613_v38 = vmul.f32 %v3611_v34, %v3608_v60  ;;  %v3620_v36 = vsub.f32 1.0, %v3608_v60 }
0x3de4   :  { %3615 = vrot.lane.b32.xlu1 %v3613_v38, %s7522_s2 }
0x3e56   :  { %v3616_v13 = vpop.permute.xlu1 %3615 }
0x3e57   :  { %v3618_v46 = vadd.f32 %v3616_v13, %v3603_v14  ;;  %v8204_v14 = vld [vmem:[#allocation2 + $0x2c0] ss:$0 sm:$0xff] }
0x3e59   :  { %7470 = vtanh.f32 %v3618_v46 }
0x3e63   :  { %v7471_v43 = vpop.eup %7470 }
0x3e64   :  { %3622 = vrot.lane.b32.xlu0 %v7471_v43, %s7526_s30 }
0x3ed6   :  { %v3623_v0 = vpop.permute.xlu0 %3622 }
0x3ed7   :  { %v8145_v2 = vmul.f32 %v3623_v0, %v3620_v36 }
0x3ed9   :  { %3627 = vrot.lane.b32.xlu1 %v8145_v2, %s7526_s30 }
0x3f4b   :  { %v3628_v4 = vpop.permute.xlu1 %3627 }
0x3f4c   :  { %6626 = vmatmul.mubr.msk.f32.vlgmr.msra.gmra.mrb[36].mxu0 %vm158_vm3, %v3628_v4 }
0x3f4d   :  { %6659 = vmatprep.mubr.msk.f32.mxu0 %vm7524_vm2, %v7525_v24  ;;  %7176 = vmatpush3.bf16.msra.mxu0 %v8158_v15 }
0x3f4e   :  { %7177 = vmatprep.subr.bf16.mxu0 %v7523_v21 }
0x3f51   :  { %7179 = vmatpush3.bf16.msra.mxu0 %v8161_v19 }
0x3f52   :  { %7180 = vmatprep.subr.bf16.mxu0 %v7523_v21 }
0x3f55   :  { %7182 = vmatpush3.bf16.msra.mxu0 %v8175_v18 }
0x3f56   :  { %7183 = vmatprep.subr.bf16.mxu0 %v7523_v21 }
0x401f   :  { %v3697_v26 = vpop.f32.mrb[36].mxu0 }
0x4020   :  { %v3698_v50 = vadd.f32 %v8166_v23, %v3697_v26  ;;  %v6627_v7 = vpop.f32.mrb[37].mxu0 }
0x4022   :  { %v3701_v57 = vmax.f32 %v3698_v50, 0.0 }
0x4024   :  { %6645 = vmatmul.mubr.msk.f32.vlgmr.msra.gmra.mrb[34].mxu1 %vm3167_vm4, %v3701_v57 }
0x4025   :  { %6663 = vmatpush3.msk.msra.mxu1 %vm54_vm0, %v8107_v30  ;;  %6664 = vmatprep.mubr.msk.f32.mxu1 %vm7524_vm2, %v7525_v24 }
0x4026   :  { %7189 = vmatprep.subr.bf16.mxu1 %v7523_v21 }
0x40f7   :  { %v3771_v1 = vpop.f32.mrb[34].mxu1 }
0x40f8   :  { %v3772_v35 = vadd.f32 %v8179_v27, %v3771_v1  ;;  %v6646_v33 = vpop.f32.mrb[35].mxu1 }
0x40fa   :  { %v3775_v39 = vmax.f32 %v3772_v35, 0.0 }
0x40fc   :  { %6660 = vmatmul.mubr.msk.f32.vlgmr.msra.gmra.mrb[38].mxu0 %vm3253_vm5, %v3775_v39 }
0x40fd   :  { %7185 = vmatpush3.bf16.msra.mxu0 %v8182_v9  ;;  %6675 = vmatprep.mubr.msk.f32.mxu0 %vm7524_vm2, %v7525_v24 }
0x40fe   :  { %7186 = vmatprep.subr.bf16.mxu0 %v7523_v21 }
0x4101   :  { %7188 = vmatpush3.bf16.msra.mxu0 %v8186_v12 }
0x4102   :  { %7195 = vmatprep.subr.bf16.mxu0 %v7523_v21 }
0x4104   :  { %6676 = vmatmul.mubr.msk.f32.vlgmr.msra.gmra.mrb[40].mxu0 %vm158_vm3, %v3628_v4 }
0x4105   :  { %7197 = vmatpush3.bf16.msra.mxu0 %v8135_v56  ;;  %6705 = vmatprep.mubr.msk.f32.mxu0 %vm7524_vm2, %v7525_v24 }
0x4106   :  { %7198 = vmatprep.subr.bf16.mxu0 %v7523_v21 }
0x4109   :  { %7200 = vmatpush3.bf16.msra.mxu0 %v8138_v59 }
0x410a   :  { %7201 = vmatprep.subr.bf16.mxu0 %v7523_v21 }
0x410d   :  { %7203 = vmatpush3.bf16.msra.mxu0 %v8142_v63 }
0x410e   :  { %7204 = vmatprep.subr.bf16.mxu0 %v7523_v21 }
0x4111   :  { %7206 = vmatpush3.bf16.msra.mxu0 %v8154_v5 }
0x4112   :  { %7216 = vmatprep.subr.bf16.mxu0 %v7523_v21 }
0x41cf   :  { %v3845_v25 = vpop.f32.mrb[38].mxu0 }
0x41d0   :  { %v3846_v41 = vadd.f32 %v8204_v14, %v3845_v25  ;;  %v6661_v8 = vpop.f32.mrb[39].mxu0 }
0x41d2   :  { %3850 = vst.msk [vmem:[%s8472_s3] sm:$0x3] %vm3849_vm6, %v3846_v41  ;;  %6665 = vmatmul.mubr.msk.f32.vlgmr.msra.gmra.mrb[36].mxu1 %vm47_vm1, %v3846_v41 }
0x41d3   :  { %7191 = vmatpush3.bf16.msra.mxu1 %v8126_v51  ;;  %6686 = vmatprep.mubr.msk.f32.mxu1 %vm7524_vm2, %v7525_v24 }
0x41d4   :  { %7192 = vmatprep.subr.bf16.mxu1 %v7523_v21 }
0x41d7   :  { %v3991_v42 = vpop.f32.mrb[40].mxu0  ;;  %7194 = vmatpush3.bf16.msra.mxu1 %v8129_v53 }
0x41d8   :  { %v3992_v44 = vadd.f32 %v8103_v11, %v3991_v42  ;;  %v6677_v34 = vpop.f32.mrb[41].mxu0  ;;  %7207 = vmatprep.subr.bf16.mxu1 %v7523_v21 }
0x41da   :  { %4001 = vrot.lane.b32.xlu0 %v3992_v44, %s7522_s2 }
0x424c   :  { %v4002_v43 = vpop.permute.xlu0 %4001 }
0x42a5   :  { %v3920_v60 = vpop.f32.mrb[36].mxu1 }
0x42a6   :  { %v3924_v38 = vadd.f32 %v3920_v60, %v8121_v10  ;;  %v6666_v13 = vpop.f32.mrb[37].mxu1 }
0x42a8   :  { %v3995_v46 = vadd.f32 %v3992_v44, %v3924_v38 }
0x42aa   :  { %v3996_v47 = vmul.f32 0.5, %v3995_v46 }
0x42ac   :  { %7472 = vtanh.f32 %v3996_v47 }
0x42b6   :  { %v7473_v48 = vpop.eup %7472 }
0x42b7   :  { %v3998_v49 = vmul.f32 0.5, %v7473_v48 }
0x42b9   :  { %v3999_v52 = vadd.f32 0.5, %v3998_v49 }
0x42bb   :  { %v4004_v54 = vmul.f32 %v4002_v43, %v3999_v52  ;;  %v4011_v61 = vsub.f32 1.0, %v3999_v52  ;;  %v4017_v36 = vmul.f32 %v3999_v52, %v8145_v2 }
0x42bd   :  { %4006 = vrot.lane.b32.xlu1 %v4004_v54, %s7522_s2 }
0x432f   :  { %v4007_v55 = vpop.permute.xlu1 %4006 }
0x4330   :  { %v4009_v3 = vadd.f32 %v4007_v55, %v3924_v38 }
0x4332   :  { %7474 = vtanh.f32 %v4009_v3 }
0x433c   :  { %v7475_v45 = vpop.eup %7474 }
0x433d   :  { %4013 = vrot.lane.b32.xlu0 %v7475_v45, %s7526_s30 }
0x43af   :  { %v4014_v62 = vpop.permute.xlu0 %4013 }
0x43b0   :  { %v4016_v0 = vmul.f32 %v4014_v62, %v4011_v61 }
0x43b2   :  { %v8224_v4 = vadd.f32 %v4017_v36, %v4016_v0 }
0x43b4   :  { %4020 = vrot.lane.b32.xlu1 %v8224_v4, %s7526_s30 }
0x4426   :  { %v4021_v29 = vpop.permute.xlu1 %4020 }
0x4427   :  { %6687 = vmatmul.mubr.msk.f32.vlgmr.msra.gmra.mrb[38].mxu1 %vm158_vm3, %v4021_v29 }
0x4428   :  { %7209 = vmatpush3.bf16.msra.mxu1 %v8158_v15  ;;  %6720 = vmatprep.mubr.msk.f32.mxu1 %vm7524_vm2, %v7525_v24 }
0x4429   :  { %7210 = vmatprep.subr.bf16.mxu1 %v7523_v21 }
0x442c   :  { %7212 = vmatpush3.bf16.msra.mxu1 %v8161_v19 }
0x442d   :  { %7213 = vmatprep.subr.bf16.mxu1 %v7523_v21 }
0x4430   :  { %7215 = vmatpush3.bf16.msra.mxu1 %v8175_v18 }
0x4431   :  { %6723 = vmatprep.subr.mxu1 %v7525_v24 }
0x44fa   :  { %v4090_v2 = vpop.f32.mrb[38].mxu1 }
0x44fb   :  { %v4091_v22 = vadd.f32 %v8166_v23, %v4090_v2  ;;  %v6688_v20 = vpop.f32.mrb[39].mxu1 }
0x44fd   :  { %v4094_v37 = vmax.f32 %v4091_v22, 0.0 }
0x44ff   :  { %6706 = vmatmul.mubr.msk.f32.vlgmr.msra.gmra.mrb[42].mxu0 %vm3167_vm4, %v4094_v37 }
0x4500   :  { %7218 = vmatpush3.bf16.msra.mxu0 %v8182_v9  ;;  %6736 = vmatprep.mubr.msk.f32.mxu0 %vm7524_vm2, %v7525_v24 }
0x4501   :  { %7219 = vmatprep.subr.bf16.mxu0 %v7523_v21 }
0x4504   :  { %7221 = vmatpush3.bf16.msra.mxu0 %v8186_v12 }
0x4505   :  { %7228 = vmatprep.subr.bf16.mxu0 %v7523_v21 }
0x4507   :  { %6737 = vmatmul.mubr.msk.f32.vlgmr.msra.gmra.mrb[44].mxu0 %vm158_vm3, %v4021_v29 }
0x4508   :  { %7230 = vmatpush3.bf16.msra.mxu0 %v8135_v56  ;;  %6766 = vmatprep.mubr.msk.f32.mxu0 %vm7524_vm2, %v7525_v24 }
0x4509   :  { %7231 = vmatprep.subr.bf16.mxu0 %v7523_v21 }
0x450c   :  { %7233 = vmatpush3.bf16.msra.mxu0 %v8138_v59 }
0x450d   :  { %7234 = vmatprep.subr.bf16.mxu0 %v7523_v21 }
0x4510   :  { %7236 = vmatpush3.bf16.msra.mxu0 %v8142_v63 }
0x4511   :  { %7237 = vmatprep.subr.bf16.mxu0 %v7523_v21 }
0x4514   :  { %7239 = vmatpush3.bf16.msra.mxu0 %v8154_v5 }
0x4515   :  { %7249 = vmatprep.subr.bf16.mxu0 %v7523_v21 }
0x45d2   :  { %v4164_v16 = vpop.f32.mrb[42].mxu0 }
0x45d3   :  { %v4165_v17 = vadd.f32 %v8179_v27, %v4164_v16  ;;  %v6707_v26 = vpop.f32.mrb[43].mxu0 }
0x45d5   :  { %v4168_v50 = vmax.f32 %v4165_v17, 0.0 }
0x45d7   :  { %6721 = vmatmul.mubr.msk.f32.vlgmr.msra.gmra.mrb[40].mxu1 %vm3253_vm5, %v4168_v50 }
0x45d8   :  { %6724 = vmatpush3.msk.msra.mxu1 %vm54_vm0, %v8107_v30  ;;  %6725 = vmatprep.mubr.msk.f32.mxu1 %vm7524_vm2, %v7525_v24 }
0x45d9   :  { %7222 = vmatprep.subr.bf16.mxu1 %v7523_v21 }
0x45da   :  { %v4384_v7 = vpop.f32.mrb[44].mxu0 }
0x45db   :  { %v4385_v57 = vadd.f32 %v8103_v11, %v4384_v7  ;;  %v6738_v58 = vpop.f32.mrb[45].mxu0 }
0x45dd   :  { %4394 = vrot.lane.b32.xlu0 %v4385_v57, %s7522_s2 }
0x464f   :  { %v4395_v8 = vpop.permute.xlu0 %4394 }
0x46aa   :  { %v4238_v31 = vpop.f32.mrb[40].mxu1 }
0x46ab   :  { %v4239_v28 = vadd.f32 %v8204_v14, %v4238_v31  ;;  %v6722_v32 = vpop.f32.mrb[41].mxu1 }
0x46ad   :  { %5890 = vst.msk [vmem:[%s8472_s3 + $0x2] sm:$0x3] %vm3849_vm6, %v4239_v28  ;;  %6726 = vmatmul.mubr.msk.f32.vlgmr.msra.gmra.mrb[42].mxu1 %vm47_vm1, %v4239_v28 }
0x46ae   :  { %7224 = vmatpush3.bf16.msra.mxu1 %v8126_v51  ;;  %6747 = vmatprep.mubr.msk.f32.mxu1 %vm7524_vm2, %v7525_v24 }
0x46af   :  { %7225 = vmatprep.subr.bf16.mxu1 %v7523_v21 }
0x46b2   :  { %7227 = vmatpush3.bf16.msra.mxu1 %v8129_v53 }
0x46b3   :  { %7240 = vmatprep.subr.bf16.mxu1 %v7523_v21 }
0x4780   :  { %v4313_v1 = vpop.f32.mrb[42].mxu1 }
0x4781   :  { %v4317_v35 = vadd.f32 %v4313_v1, %v8121_v10  ;;  %v6727_v33 = vpop.f32.mrb[43].mxu1 }
0x4783   :  { %v4388_v39 = vadd.f32 %v4385_v57, %v4317_v35 }
0x4785   :  { %v4389_v40 = vmul.f32 0.5, %v4388_v39 }
0x4787   :  { %7476 = vtanh.f32 %v4389_v40 }
0x4791   :  { %v7477_v6 = vpop.eup %7476 }
0x4792   :  { %v4391_v25 = vmul.f32 0.5, %v7477_v6 }
0x4794   :  { %v4392_v41 = vadd.f32 0.5, %v4391_v25 }
0x4796   :  { %v4397_v42 = vmul.f32 %v4395_v8, %v4392_v41  ;;  %v4404_v38 = vsub.f32 1.0, %v4392_v41  ;;  %v4410_v46 = vmul.f32 %v4392_v41, %v8224_v4 }
0x4798   :  { %4399 = vrot.lane.b32.xlu1 %v4397_v42, %s7522_s2 }
0x480a   :  { %v4400_v44 = vpop.permute.xlu1 %4399 }
0x480b   :  { %v4402_v34 = vadd.f32 %v4400_v44, %v4317_v35 }
0x480d   :  { %7478 = vtanh.f32 %v4402_v34 }
0x4817   :  { %v7479_v60 = vpop.eup %7478 }
0x4818   :  { %4406 = vrot.lane.b32.xlu0 %v7479_v60, %s7526_s30 }
0x488a   :  { %v4407_v13 = vpop.permute.xlu0 %4406 }
0x488b   :  { %v4409_v47 = vmul.f32 %v4407_v13, %v4404_v38 }
0x488d   :  { %v8281_v48 = vadd.f32 %v4410_v46, %v4409_v47 }
0x488f   :  { %4413 = vrot.lane.b32.xlu1 %v8281_v48, %s7526_s30 }
0x4901   :  { %v4414_v49 = vpop.permute.xlu1 %4413 }
0x4902   :  { %6748 = vmatmul.mubr.msk.f32.vlgmr.msra.gmra.mrb[44].mxu1 %vm158_vm3, %v4414_v49 }
0x4903   :  { %7242 = vmatpush3.bf16.msra.mxu1 %v8158_v15  ;;  %6781 = vmatprep.mubr.msk.f32.mxu1 %vm7524_vm2, %v7525_v24 }
0x4904   :  { %7243 = vmatprep.subr.bf16.mxu1 %v7523_v21 }
0x4907   :  { %7245 = vmatpush3.bf16.msra.mxu1 %v8161_v19 }
0x4908   :  { %7246 = vmatprep.subr.bf16.mxu1 %v7523_v21 }
0x490b   :  { %7248 = vmatpush3.bf16.msra.mxu1 %v8175_v18 }
0x490c   :  { %6784 = vmatprep.subr.mxu1 %v7525_v24 }
0x49d5   :  { %v4483_v52 = vpop.f32.mrb[44].mxu1 }
0x49d6   :  { %v4484_v43 = vadd.f32 %v8166_v23, %v4483_v52  ;;  %v6749_v54 = vpop.f32.mrb[45].mxu1 }
0x49d8   :  { %v4487_v55 = vmax.f32 %v4484_v43, 0.0 }
0x49da   :  { %6767 = vmatmul.mubr.msk.f32.vlgmr.msra.gmra.mrb[46].mxu0 %vm3167_vm4, %v4487_v55 }
0x49db   :  { %7251 = vmatpush3.bf16.msra.mxu0 %v8182_v9  ;;  %6797 = vmatprep.mubr.msk.f32.mxu0 %vm7524_vm2, %v7525_v24 }
0x49dc   :  { %7252 = vmatprep.subr.bf16.mxu0 %v7523_v21 }
0x49df   :  { %7254 = vmatpush3.bf16.msra.mxu0 %v8186_v12 }
0x49e0   :  { %7261 = vmatprep.subr.bf16.mxu0 %v7523_v21 }
0x49e2   :  { %6798 = vmatmul.mubr.msk.f32.vlgmr.msra.gmra.mrb[48].mxu0 %vm158_vm3, %v4414_v49 }
0x49e3   :  { %7263 = vmatpush3.bf16.msra.mxu0 %v8135_v56  ;;  %6827 = vmatprep.mubr.msk.f32.mxu0 %vm7524_vm2, %v7525_v24 }
0x49e4   :  { %7264 = vmatprep.subr.bf16.mxu0 %v7523_v21 }
0x49e7   :  { %7266 = vmatpush3.bf16.msra.mxu0 %v8138_v59 }
0x49e8   :  { %7267 = vmatprep.subr.bf16.mxu0 %v7523_v21 }
0x49eb   :  { %7269 = vmatpush3.bf16.msra.mxu0 %v8142_v63 }
0x49ec   :  { %7270 = vmatprep.subr.bf16.mxu0 %v7523_v21 }
0x49ef   :  { %7272 = vmatpush3.bf16.msra.mxu0 %v8154_v5 }
0x49f0   :  { %7282 = vmatprep.subr.bf16.mxu0 %v7523_v21 }
0x4aad   :  { %v4557_v3 = vpop.f32.mrb[46].mxu0 }
0x4aae   :  { %v4558_v45 = vadd.f32 %v8179_v27, %v4557_v3  ;;  %v6768_v61 = vpop.f32.mrb[47].mxu0 }
0x4ab0   :  { %v4561_v62 = vmax.f32 %v4558_v45, 0.0 }
0x4ab2   :  { %6782 = vmatmul.mubr.msk.f32.vlgmr.msra.gmra.mrb[46].mxu1 %vm3253_vm5, %v4561_v62 }
0x4ab3   :  { %6785 = vmatpush3.msk.msra.mxu1 %vm54_vm0, %v8107_v30  ;;  %6786 = vmatprep.mubr.msk.f32.mxu1 %vm7524_vm2, %v7525_v24 }
0x4ab4   :  { %7255 = vmatprep.subr.bf16.mxu1 %v7523_v21 }
0x4ab5   :  { %v4777_v36 = vpop.f32.mrb[48].mxu0 }
0x4ab6   :  { %v4778_v0 = vadd.f32 %v8103_v11, %v4777_v36  ;;  %v6799_v4 = vpop.f32.mrb[49].mxu0 }
0x4ab8   :  { %4787 = vrot.lane.b32.xlu0 %v4778_v0, %s7522_s2 }
0x4b2a   :  { %v4788_v58 = vpop.permute.xlu0 %4787 }
0x4b85   :  { %v4631_v29 = vpop.f32.mrb[46].mxu1 }
0x4b86   :  { %v4632_v2 = vadd.f32 %v8204_v14, %v4631_v29  ;;  %v6783_v22 = vpop.f32.mrb[47].mxu1 }
0x4b88   :  { %5897 = vst.msk [vmem:[%s8472_s3 + $0x4] sm:$0x3] %vm3849_vm6, %v4632_v2  ;;  %6787 = vmatmul.mubr.msk.f32.vlgmr.msra.gmra.mrb[48].mxu1 %vm47_vm1, %v4632_v2 }
0x4b89   :  { %7257 = vmatpush3.bf16.msra.mxu1 %v8126_v51  ;;  %6808 = vmatprep.mubr.msk.f32.mxu1 %vm7524_vm2, %v7525_v24 }
0x4b8a   :  { %7258 = vmatprep.subr.bf16.mxu1 %v7523_v21 }
0x4b8d   :  { %7260 = vmatpush3.bf16.msra.mxu1 %v8129_v53 }
0x4b8e   :  { %7273 = vmatprep.subr.bf16.mxu1 %v7523_v21 }
0x4c5b   :  { %v4706_v20 = vpop.f32.mrb[48].mxu1 }
0x4c5c   :  { %v4710_v37 = vadd.f32 %v4706_v20, %v8121_v10  ;;  %v6788_v16 = vpop.f32.mrb[49].mxu1 }
0x4c5e   :  { %v4781_v17 = vadd.f32 %v4778_v0, %v4710_v37 }
0x4c60   :  { %v4782_v26 = vmul.f32 0.5, %v4781_v17 }
0x4c62   :  { %7480 = vtanh.f32 %v4782_v26 }
0x4c6c   :  { %v7481_v50 = vpop.eup %7480 }
0x4c6d   :  { %v4784_v7 = vmul.f32 0.5, %v7481_v50 }
0x4c6f   :  { %v4785_v57 = vadd.f32 0.5, %v4784_v7 }
0x4c71   :  { %v4790_v31 = vmul.f32 %v4788_v58, %v4785_v57  ;;  %v4797_v35 = vsub.f32 1.0, %v4785_v57  ;;  %v4803_v39 = vmul.f32 %v4785_v57, %v8281_v48 }
0x4c73   :  { %4792 = vrot.lane.b32.xlu1 %v4790_v31, %s7522_s2 }
0x4ce5   :  { %v4793_v28 = vpop.permute.xlu1 %4792 }
0x4ce6   :  { %v4795_v32 = vadd.f32 %v4793_v28, %v4710_v37 }
0x4ce8   :  { %7482 = vtanh.f32 %v4795_v32 }
0x4cf2   :  { %v7483_v1 = vpop.eup %7482 }
0x4cf3   :  { %4799 = vrot.lane.b32.xlu0 %v7483_v1, %s7526_s30 }
0x4d65   :  { %v4800_v33 = vpop.permute.xlu0 %4799 }
0x4d66   :  { %v4802_v40 = vmul.f32 %v4800_v33, %v4797_v35 }
0x4d68   :  { %v8338_v6 = vadd.f32 %v4803_v39, %v4802_v40 }
0x4d6a   :  { %4806 = vrot.lane.b32.xlu1 %v8338_v6, %s7526_s30 }
0x4ddc   :  { %v4807_v25 = vpop.permute.xlu1 %4806 }
0x4ddd   :  { %6809 = vmatmul.mubr.msk.f32.vlgmr.msra.gmra.mrb[50].mxu1 %vm158_vm3, %v4807_v25 }
0x4dde   :  { %7275 = vmatpush3.bf16.msra.mxu1 %v8158_v15  ;;  %6842 = vmatprep.mubr.msk.f32.mxu1 %vm7524_vm2, %v7525_v24 }
0x4ddf   :  { %7276 = vmatprep.subr.bf16.mxu1 %v7523_v21 }
0x4de2   :  { %7278 = vmatpush3.bf16.msra.mxu1 %v8161_v19 }
0x4de3   :  { %7279 = vmatprep.subr.bf16.mxu1 %v7523_v21 }
0x4de6   :  { %7281 = vmatpush3.bf16.msra.mxu1 %v8175_v18 }
0x4de7   :  { %6845 = vmatprep.subr.mxu1 %v7525_v24 }
0x4eb0   :  { %v4876_v41 = vpop.f32.mrb[50].mxu1 }
0x4eb1   :  { %v4877_v8 = vadd.f32 %v8166_v23, %v4876_v41  ;;  %v6810_v42 = vpop.f32.mrb[51].mxu1 }
0x4eb3   :  { %v4880_v44 = vmax.f32 %v4877_v8, 0.0 }
0x4eb5   :  { %6828 = vmatmul.mubr.msk.f32.vlgmr.msra.gmra.mrb[50].mxu0 %vm3167_vm4, %v4880_v44 }
0x4eb6   :  { %7284 = vmatpush3.bf16.msra.mxu0 %v8182_v9  ;;  %6858 = vmatprep.mubr.msk.f32.mxu0 %vm7524_vm2, %v7525_v24 }
0x4eb7   :  { %7285 = vmatprep.subr.bf16.mxu0 %v7523_v21 }
0x4eba   :  { %7287 = vmatpush3.bf16.msra.mxu0 %v8186_v12 }
0x4ebb   :  { %7294 = vmatprep.subr.bf16.mxu0 %v7523_v21 }
0x4ebd   :  { %6859 = vmatmul.mubr.msk.f32.vlgmr.msra.gmra.mrb[52].mxu0 %vm158_vm3, %v4807_v25 }
0x4ebe   :  { %7296 = vmatpush3.bf16.msra.mxu0 %v8135_v56  ;;  %6888 = vmatprep.mubr.msk.f32.mxu0 %vm7524_vm2, %v7525_v24 }
0x4ebf   :  { %7297 = vmatprep.subr.bf16.mxu0 %v7523_v21 }
0x4ec2   :  { %7299 = vmatpush3.bf16.msra.mxu0 %v8138_v59 }
0x4ec3   :  { %7300 = vmatprep.subr.bf16.mxu0 %v7523_v21 }
0x4ec6   :  { %7302 = vmatpush3.bf16.msra.mxu0 %v8142_v63 }
0x4ec7   :  { %7303 = vmatprep.subr.bf16.mxu0 %v7523_v21 }
0x4eca   :  { %7305 = vmatpush3.bf16.msra.mxu0 %v8154_v5 }
0x4ecb   :  { %7315 = vmatprep.subr.bf16.mxu0 %v7523_v21 }
0x4f88   :  { %v4950_v34 = vpop.f32.mrb[50].mxu0 }
0x4f89   :  { %v4951_v60 = vadd.f32 %v8179_v27, %v4950_v34  ;;  %v6829_v38 = vpop.f32.mrb[51].mxu0 }
0x4f8b   :  { %v4954_v13 = vmax.f32 %v4951_v60, 0.0 }
0x4f8d   :  { %6843 = vmatmul.mubr.msk.f32.vlgmr.msra.gmra.mrb[52].mxu1 %vm3253_vm5, %v4954_v13 }
0x4f8e   :  { %6846 = vmatpush3.msk.msra.mxu1 %vm54_vm0, %v8107_v30  ;;  %6847 = vmatprep.mubr.msk.f32.mxu1 %vm7524_vm2, %v7525_v24 }
0x4f8f   :  { %7288 = vmatprep.subr.bf16.mxu1 %v7523_v21 }
0x4f90   :  { %v5170_v46 = vpop.f32.mrb[52].mxu0 }
0x4f91   :  { %v5171_v47 = vadd.f32 %v8103_v11, %v5170_v46  ;;  %v6860_v48 = vpop.f32.mrb[53].mxu0 }
0x4f93   :  { %5180 = vrot.lane.b32.xlu0 %v5171_v47, %s7522_s2 }
0x5005   :  { %v5181_v4 = vpop.permute.xlu0 %5180 }
0x5060   :  { %v5024_v49 = vpop.f32.mrb[52].mxu1 }
0x5061   :  { %v5025_v52 = vadd.f32 %v8204_v14, %v5024_v49  ;;  %v6844_v43 = vpop.f32.mrb[53].mxu1 }
0x5063   :  { %5904 = vst.msk [vmem:[%s8472_s3 + $0x6] sm:$0x3] %vm3849_vm6, %v5025_v52  ;;  %6848 = vmatmul.mubr.msk.f32.vlgmr.msra.gmra.mrb[54].mxu1 %vm47_vm1, %v5025_v52 }
0x5064   :  { %7290 = vmatpush3.bf16.msra.mxu1 %v8126_v51  ;;  %6869 = vmatprep.mubr.msk.f32.mxu1 %vm7524_vm2, %v7525_v24 }
0x5065   :  { %7291 = vmatprep.subr.bf16.mxu1 %v7523_v21 }
0x5068   :  { %7293 = vmatpush3.bf16.msra.mxu1 %v8129_v53 }
0x5069   :  { %7306 = vmatprep.subr.bf16.mxu1 %v7523_v21 }
0x5136   :  { %v5099_v54 = vpop.f32.mrb[54].mxu1 }
0x5137   :  { %v5103_v55 = vadd.f32 %v5099_v54, %v8121_v10  ;;  %v6849_v3 = vpop.f32.mrb[55].mxu1 }
0x5139   :  { %v5174_v45 = vadd.f32 %v5171_v47, %v5103_v55 }
0x513b   :  { %v5175_v61 = vmul.f32 0.5, %v5174_v45 }
0x513d   :  { %7484 = vtanh.f32 %v5175_v61 }
0x5147   :  { %v7485_v62 = vpop.eup %7484 }
0x5148   :  { %v5177_v36 = vmul.f32 0.5, %v7485_v62 }
0x514a   :  { %v5178_v0 = vadd.f32 0.5, %v5177_v36 }
0x514c   :  { %v5183_v29 = vmul.f32 %v5181_v4, %v5178_v0  ;;  %v5190_v37 = vsub.f32 1.0, %v5178_v0  ;;  %v5196_v17 = vmul.f32 %v5178_v0, %v8338_v6 }
0x514e   :  { %5185 = vrot.lane.b32.xlu1 %v5183_v29, %s7522_s2 }
0x51c0   :  { %v5186_v2 = vpop.permute.xlu1 %5185 }
0x51c1   :  { %v5188_v22 = vadd.f32 %v5186_v2, %v5103_v55 }
0x51c3   :  { %7486 = vtanh.f32 %v5188_v22 }
0x51cd   :  { %v7487_v20 = vpop.eup %7486 }
0x51ce   :  { %5192 = vrot.lane.b32.xlu0 %v7487_v20, %s7526_s30 }
0x5240   :  { %v5193_v16 = vpop.permute.xlu0 %5192 }
0x5241   :  { %v5195_v26 = vmul.f32 %v5193_v16, %v5190_v37 }
0x5243   :  { %v8395_v50 = vadd.f32 %v5196_v17, %v5195_v26 }
0x5245   :  { %5199 = vrot.lane.b32.xlu1 %v8395_v50, %s7526_s30 }
0x52b7   :  { %v5200_v7 = vpop.permute.xlu1 %5199 }
0x52b8   :  { %6870 = vmatmul.mubr.msk.f32.vlgmr.msra.gmra.mrb[56].mxu1 %vm158_vm3, %v5200_v7 }
0x52b9   :  { %7308 = vmatpush3.bf16.msra.mxu1 %v8158_v15  ;;  %6903 = vmatprep.mubr.msk.f32.mxu1 %vm7524_vm2, %v7525_v24 }
0x52ba   :  { %7309 = vmatprep.subr.bf16.mxu1 %v7523_v21 }
0x52bd   :  { %7311 = vmatpush3.bf16.msra.mxu1 %v8161_v19 }
0x52be   :  { %7312 = vmatprep.subr.bf16.mxu1 %v7523_v21 }
0x52c1   :  { %7314 = vmatpush3.bf16.msra.mxu1 %v8175_v18 }
0x52c2   :  { %6906 = vmatprep.subr.mxu1 %v7525_v24 }
0x538b   :  { %v5269_v57 = vpop.f32.mrb[56].mxu1 }
0x538c   :  { %v5270_v58 = vadd.f32 %v8166_v23, %v5269_v57  ;;  %v6871_v31 = vpop.f32.mrb[57].mxu1 }
0x538e   :  { %v5273_v28 = vmax.f32 %v5270_v58, 0.0 }
0x5390   :  { %6889 = vmatmul.mubr.msk.f32.vlgmr.msra.gmra.mrb[54].mxu0 %vm3167_vm4, %v5273_v28 }
0x5391   :  { %7317 = vmatpush3.bf16.msra.mxu0 %v8182_v9  ;;  %6919 = vmatprep.mubr.msk.f32.mxu0 %vm7524_vm2, %v7525_v24 }
0x5392   :  { %7318 = vmatprep.subr.bf16.mxu0 %v7523_v21 }
0x5395   :  { %7320 = vmatpush3.bf16.msra.mxu0 %v8186_v12 }
0x5396   :  { %7327 = vmatprep.subr.bf16.mxu0 %v7523_v21 }
0x5398   :  { %6920 = vmatmul.mubr.msk.f32.vlgmr.msra.gmra.mrb[56].mxu0 %vm158_vm3, %v5200_v7 }
0x5399   :  { %7329 = vmatpush3.bf16.msra.mxu0 %v8135_v56  ;;  %6949 = vmatprep.mubr.msk.f32.mxu0 %vm7524_vm2, %v7525_v24 }
0x539a   :  { %7330 = vmatprep.subr.bf16.mxu0 %v7523_v21 }
0x539d   :  { %7332 = vmatpush3.bf16.msra.mxu0 %v8138_v59 }
0x539e   :  { %7333 = vmatprep.subr.bf16.mxu0 %v7523_v21 }
0x53a1   :  { %7335 = vmatpush3.bf16.msra.mxu0 %v8142_v63 }
0x53a2   :  { %7336 = vmatprep.subr.bf16.mxu0 %v7523_v21 }
0x53a5   :  { %7338 = vmatpush3.bf16.msra.mxu0 %v8154_v5 }
0x5463   :  { %v5343_v9 = vpop.f32.mrb[54].mxu0 }
0x5464   :  { %v5344_v12 = vadd.f32 %v8179_v27, %v5343_v9  ;;  %v6890_v32 = vpop.f32.mrb[55].mxu0 }
0x5466   :  { %v5347_v56 = vmax.f32 %v5344_v12, 0.0 }
0x5468   :  { %6904 = vmatmul.mubr.msk.f32.vlgmr.msra.gmra.mrb[58].mxu1 %vm3253_vm5, %v5347_v56 }
0x5469   :  { %6907 = vmatpush3.msk.msra.mxu1 %vm54_vm0, %v8107_v30  ;;  %6908 = vmatprep.mubr.msk.f32.mxu1 %vm7524_vm2, %v7525_v24 }
0x546a   :  { %7321 = vmatprep.subr.bf16.mxu1 %v7523_v21 }
0x546b   :  { %v5563_v59 = vpop.f32.mrb[56].mxu0 }
0x546c   :  { %v5564_v63 = vadd.f32 %v8103_v11, %v5563_v59  ;;  %v6921_v1 = vpop.f32.mrb[57].mxu0 }
0x546e   :  { %5573 = vrot.lane.b32.xlu0 %v5564_v63, %s7522_s2 }
0x553b   :  { %v5417_v5 = vpop.f32.mrb[58].mxu1 }
0x553c   :  { %v5418_v35 = vadd.f32 %v8204_v14, %v5417_v5  ;;  %v6905_v33 = vpop.f32.mrb[59].mxu1 }
0x553e   :  { %5911 = vst.msk [vmem:[%s8472_s3 + $0x8] sm:$0x3] %vm3849_vm6, %v5418_v35  ;;  %6909 = vmatmul.mubr.msk.f32.vlgmr.msra.gmra.mrb[60].mxu1 %vm47_vm1, %v5418_v35 }
0x553f   :  { %7323 = vmatpush3.bf16.msra.mxu1 %v8126_v51  ;;  %6930 = vmatprep.mubr.msk.f32.mxu1 %vm7524_vm2, %v7525_v24  ;;  %v5574_v51 = vpop.permute.xlu0 %5573 }
0x5540   :  { %7324 = vmatprep.subr.bf16.mxu1 %v7523_v21 }
0x5543   :  { %7326 = vmatpush3.bf16.msra.mxu1 %v8129_v53 }
0x5544   :  { %7339 = vmatprep.subr.bf16.mxu1 %v7523_v21 }
0x5611   :  { %v5492_v11 = vpop.f32.mrb[60].mxu1 }
0x5612   :  { %v5496_v30 = vadd.f32 %v5492_v11, %v8121_v10  ;;  %v6910_v39 = vpop.f32.mrb[61].mxu1 }
0x5614   :  { %v5567_v40 = vadd.f32 %v5564_v63, %v5496_v30 }
0x5616   :  { %v5568_v6 = vmul.f32 0.5, %v5567_v40 }
0x5618   :  { %7488 = vtanh.f32 %v5568_v6 }
0x5622   :  { %v7489_v25 = vpop.eup %7488 }
0x5623   :  { %v5570_v41 = vmul.f32 0.5, %v7489_v25 }
0x5625   :  { %v5571_v8 = vadd.f32 0.5, %v5570_v41 }
0x5627   :  { %v5576_v42 = vmul.f32 %v5574_v51, %v5571_v8  ;;  %v5583_v60 = vsub.f32 1.0, %v5571_v8  ;;  %v5589_v10 = vmul.f32 %v5571_v8, %v8395_v50 }
0x5629   :  { %5578 = vrot.lane.b32.xlu1 %v5576_v42, %s7522_s2 }
0x569b   :  { %v5579_v44 = vpop.permute.xlu1 %5578 }
0x569c   :  { %v5581_v34 = vadd.f32 %v5579_v44, %v5496_v30 }
0x569e   :  { %7490 = vtanh.f32 %v5581_v34 }
0x56a8   :  { %v7491_v53 = vpop.eup %7490 }
0x56a9   :  { %5585 = vrot.lane.b32.xlu0 %v7491_v53, %s7526_s30 }
0x571b   :  { %v5586_v38 = vpop.permute.xlu0 %5585 }
0x571c   :  { %v5588_v13 = vmul.f32 %v5586_v38, %v5583_v60 }
0x571e   :  { %v5590_v46 = vadd.f32 %v5589_v10, %v5588_v13 }
0x5720   :  { %5592 = vrot.lane.b32.xlu1 %v5590_v46, %s7526_s30 }
0x5792   :  { %v5593_v47 = vpop.permute.xlu1 %5592 }
0x5793   :  { %6931 = vmatmul.mubr.msk.f32.vlgmr.msra.gmra.mrb[62].mxu1 %vm158_vm3, %v5593_v47 }
0x5794   :  { %7341 = vmatpush3.bf16.msra.mxu1 %v8158_v15  ;;  %6964 = vmatprep.mubr.msk.f32.mxu1 %vm7524_vm2, %v7525_v24 }
0x5795   :  { %7342 = vmatprep.subr.bf16.mxu1 %v7523_v21 }
0x5798   :  { %7344 = vmatpush3.bf16.msra.mxu1 %v8161_v19 }
0x5799   :  { %7345 = vmatprep.subr.bf16.mxu1 %v7523_v21 }
0x579c   :  { %7347 = vmatpush3.bf16.msra.mxu1 %v8175_v18 }
0x5866   :  { %v5662_v48 = vpop.f32.mrb[62].mxu1 }
0x5867   :  { %v5663_v49 = vadd.f32 %v8166_v23, %v5662_v48  ;;  %v6932_v52 = vpop.f32.mrb[63].mxu1 }
0x5869   :  { %v5666_v43 = vmax.f32 %v5663_v49, 0.0 }
0x586b   :  { %6950 = vmatmul.mubr.msk.f32.vlgmr.msra.gmra.mrb[58].mxu0 %vm3167_vm4, %v5666_v43 }
0x593e   :  { %v5736_v54 = vpop.f32.mrb[58].mxu0 }
0x593f   :  { %v5737_v15 = vadd.f32 %v8179_v27, %v5736_v54  ;;  %v6951_v55 = vpop.f32.mrb[59].mxu0 }
0x5941   :  { %v5740_v24 = vmax.f32 %v5737_v15, 0.0 }
0x5943   :  { %6965 = vmatmul.mubr.msk.f32.vlgmr.msra.gmra.mrb[64].mxu1 %vm3253_vm5, %v5740_v24 }
0x5a16   :  { %v5810_v3 = vpop.f32.mrb[64].mxu1 }
0x5a17   :  { %v5811_v19 = vadd.f32 %v8204_v14, %v5810_v3  ;;  %v6966_v21 = vpop.f32.mrb[65].mxu1 }
0x5a19   :  { %5918 = vst.msk [vmem:[%s8472_s3 + $0xa] sm:$0x3] %vm3849_vm6, %v5811_v19 }
0x5a1a   :  { %5820 = vsyncpa [#allocation3], 1 }

</bundles_post_ra>
